<compile_context>
chip_gen: v5e
topology: v5e:2x2
jax: 0.10.0
libtpu: 0.0.40
codegen_flags: <defaults>
</compile_context>

<pallas_src>
import jax
import jax.numpy as jnp
from jax import lax
from jax.experimental import pallas as pl
from jax.experimental.pallas import tpu as pltpu

INPUT_DIM = 16          # input_dim
D_MODEL = 32            # d_model
NHEAD = 4               # nhead
HEAD_DIM = D_MODEL // NHEAD
SEQ_L = 16              # L (query sequence length)
SEQ_S = 16              # S (source sequence length)

LANE_PACK = 4           # problems packed along the lane axis (4 * 32 = 128 lanes)
BLOCK_B = 16            # problems per grid step (=> BG = 4 lane groups / step)

_LN_EPS = 1e-5          # torch.nn.LayerNorm default eps
_ATTN_EPS = 1e-6        # LoFTR LinearAttention eps


def loftr_encoder_kernel(xs_ref, cond_ref, adap_w_ref, mod_w_ref, qkv_w_ref,
                         misc_ref, mlp1_ref, mlp2_ref, vec_ref, out_ref):
    f32 = jnp.float32
    DP = LANE_PACK * D_MODEL              # 128 lanes (4 packed problems)
    L = SEQ_L
    LS = SEQ_L + SEQ_S
    BG = BLOCK_B // LANE_PACK             # lane groups per grid step

    # ---- unpack packed vector params ([16, 128] slab) ----
    vec = vec_ref[...]
    adap_b = vec[0:1]
    n0_g, n0_b = vec[1:2], vec[2:3]
    n1_g, n1_b = vec[3:4], vec[4:5]
    n2_g, n2_b = vec[5:6], vec[6:7]
    m1sc_b, m1sh_b = vec[7:8], vec[8:9]
    m2sc_b, m2sh_b = vec[9:10], vec[10:11]

    misc = misc_ref[...]                  # [128, 384] = merge | head_mask | seg_avg
    merge_w = misc[:, 0:DP]
    head_mask = misc[:, DP:2 * DP]
    seg_avg = misc[:, 2 * DP:3 * DP]

    def seg_ln(v, g, b):
        # Per-problem LayerNorm over 32-lane segments via constant matmul.
        mu = jnp.dot(v, seg_avg, preferred_element_type=f32)
        d = v - mu
        var = jnp.dot(d * d, seg_avg, preferred_element_type=f32)
        return d * lax.rsqrt(var + _LN_EPS) * g + b

    # ---- adapdim + norm0 on the lane-packed, row-stacked (x | source) ----
    h = jnp.dot(xs_ref[...], adap_w_ref[...], preferred_element_type=f32) + adap_b
    h = seg_ln(h, n0_g, n0_b)                                   # [BG*LS, 128]

    # ---- modulation embeddings (mod1 & mod2 fused; depend only on cond) ----
    cond = cond_ref[...].reshape(BG, DP)
    silu_c = cond * jax.nn.sigmoid(cond)
    emb = jnp.dot(silu_c, mod_w_ref[...], preferred_element_type=f32)   # [BG, 512]
    sc1 = emb[:, 0:DP] + m1sc_b
    sh1 = emb[:, DP:2 * DP] + m1sh_b
    sc2 = emb[:, 2 * DP:3 * DP] + m2sc_b
    sh2 = emb[:, 3 * DP:4 * DP] + m2sh_b

    # ---- modulation1 applied once to the whole stacked stream ----
    h3 = h.reshape(BG, LS, DP)
    h3 = h3 * (1.0 + sc1[:, None, :]) + sh1[:, None, :]

    # ---- fused q|k|v projection on the stacked stream (bias=False) ----
    qkv = jnp.dot(h3.reshape(BG * LS, DP), qkv_w_ref[...],
                  preferred_element_type=f32).reshape(BG, LS, 3 * DP)
    q = qkv[:, 0:L, 0:DP]                                       # x rows
    k = qkv[:, L:LS, DP:2 * DP]                                 # source rows
    v = qkv[:, L:LS, 2 * DP:3 * DP]
    x_mod = h3[:, 0:L, :]                                       # modulated x

    # ---- LoFTR LinearAttention, block-diagonal (per problem, per head) ----
    qf = jnp.where(q > 0, q + 1.0, jnp.exp(q))                  # elu + 1
    kf = jnp.where(k > 0, k + 1.0, jnp.exp(k))

    kv_mat = jnp.einsum('gsd,gse->gde', kf, v,
                        preferred_element_type=f32) * head_mask[None]
    num = jnp.einsum('gld,gde->gle', qf, kv_mat,
                     preferred_element_type=f32).reshape(BG * L, DP)
    ksum = jnp.sum(kf, axis=1)                                  # [BG, 128]
    t = (qf * ksum[:, None, :]).reshape(BG * L, DP)
    denom = jnp.dot(t, head_mask, preferred_element_type=f32) + _ATTN_EPS
    message = num * pl.reciprocal(denom, approx=True)           # [BG*L, 128]

    # ---- merge + norm1 + modulation2 ----
    message = jnp.dot(message, merge_w, preferred_element_type=f32)
    message = seg_ln(message, n1_g, n1_b)
    m3 = message.reshape(BG, L, DP)
    m3 = m3 * (1.0 + sc2[:, None, :]) + sh2[:, None, :]

    # ---- mlp(cat([x, message])) without the lane concat, then norm2 ----
    x_flat = x_mod.reshape(BG * L, DP)
    m_flat = m3.reshape(BG * L, DP)
    mlp1 = mlp1_ref[...]                                        # [128, 512]
    h1 = jnp.maximum(
        jnp.dot(x_flat, mlp1[:, 0:2 * DP], preferred_element_type=f32)
        + jnp.dot(m_flat, mlp1[:, 2 * DP:4 * DP], preferred_element_type=f32),
        0.0)                                                    # [BG*L, 256]
    m_out = jnp.dot(h1, mlp2_ref[...], preferred_element_type=f32)
    m_out = seg_ln(m_out, n2_g, n2_b)

    out_ref[...] = x_flat + m_out                               # lane-dense store


def _pack_params(p):
    """Pack 18 parameter tensors into 7 block-diagonal / replicated slabs."""
    P = LANE_PACK
    D = D_MODEL
    eye_p = jnp.eye(P, dtype=jnp.float32)

    def bd(w):  # block-diagonal replication across the 4 lane-packed problems
        return jnp.kron(eye_p, w.astype(jnp.float32))

    def rep(v):  # lane-replicated vector
        return jnp.tile(v.reshape(1, -1).astype(jnp.float32), (1, P)).reshape(-1)

    adap_w = bd(p["adap_w"])                                             # [64, 128]
    mod_w = jnp.concatenate([
        bd(p["m1_w"][:, :D]), bd(p["m1_w"][:, D:]),
        bd(p["m2_w"][:, :D]), bd(p["m2_w"][:, D:])], axis=1)             # [128, 512]
    qkv_w = jnp.concatenate(
        [bd(p["q_w"]), bd(p["k_w"]), bd(p["v_w"])], axis=1)              # [128, 384]

    head_mask = jnp.kron(jnp.eye(P * NHEAD, dtype=jnp.float32),
                         jnp.ones((HEAD_DIM, HEAD_DIM), jnp.float32))    # [128, 128]
    seg_avg = jnp.kron(eye_p, jnp.full((D, D), 1.0 / D, jnp.float32))    # [128, 128]
    misc = jnp.concatenate([bd(p["merge_w"]), head_mask, seg_avg], axis=1)  # [128, 384]

    mlp1 = jnp.concatenate(
        [bd(p["mlp1_w"][:D, :]), bd(p["mlp1_w"][D:, :])], axis=1)        # [128, 512]
    mlp2 = bd(p["mlp2_w"])                                               # [256, 128]

    vec = jnp.zeros((16, P * D), jnp.float32)
    rows = [p["adap_b"], p["n0_g"], p["n0_b"], p["n1_g"], p["n1_b"],
            p["n2_g"], p["n2_b"],
            p["m1_b"][:, :D], p["m1_b"][:, D:],
            p["m2_b"][:, :D], p["m2_b"][:, D:]]
    for i, r in enumerate(rows):
        vec = vec.at[i].set(rep(r))
    return adap_w, mod_w, qkv_w, misc, mlp1, mlp2, vec


@jax.jit
def loftr_encoder_layer(x, source, modulation_cond, params):
    """Batched LoFTREncoderLayer forward.

    x:               [B, L, input_dim]
    source:          [B, S, input_dim]
    modulation_cond: [B, d_model]
    Returns [B, L, d_model]; out[b] equals the PyTorch module's forward for
    problem b (with its size-1 batch dim squeezed).
    """
    B, L, CIN = x.shape
    S = source.shape[1]
    assert L == SEQ_L and S == SEQ_S and CIN == INPUT_DIM
    assert B % BLOCK_B == 0 and BLOCK_B % LANE_PACK == 0
    D = D_MODEL
    P = LANE_PACK
    G = B // P
    LS = L + S
    DP = P * D
    BG = BLOCK_B // P

    adap_w, mod_w, qkv_w, misc, mlp1, mlp2, vec = _pack_params(params)

    # Wrapper-side stacking + lane packing (fuses into the input DMA in XLA).
    xs = jnp.concatenate([x, source], axis=1)                    # [B, L+S, CIN]
    xs = xs.reshape(G, P, LS, CIN).transpose(0, 2, 1, 3).reshape(G * LS, P * CIN)
    cond_p = modulation_cond.reshape(G, 1, DP)

    out2d = pl.pallas_call(
        loftr_encoder_kernel,
        out_shape=jax.ShapeDtypeStruct((G * L, DP), jnp.float32),
        grid_spec=pltpu.PrefetchScalarGridSpec(
            num_scalar_prefetch=0,
            grid=(B // BLOCK_B,),
            in_specs=[
                pl.BlockSpec((BG * LS, P * CIN), lambda i: (i, 0)),   # packed x|source
                pl.BlockSpec((BG, 1, DP), lambda i: (i, 0, 0)),       # packed cond
                pl.BlockSpec((P * CIN, DP), lambda i: (0, 0)),        # adapdim W
                pl.BlockSpec((DP, 4 * DP), lambda i: (0, 0)),         # modulation W
                pl.BlockSpec((DP, 3 * DP), lambda i: (0, 0)),         # q|k|v W
                pl.BlockSpec((DP, 3 * DP), lambda i: (0, 0)),         # merge|mask|segavg
                pl.BlockSpec((DP, 4 * DP), lambda i: (0, 0)),         # mlp1 (a|b)
                pl.BlockSpec((2 * DP, DP), lambda i: (0, 0)),         # mlp2
                pl.BlockSpec((16, DP), lambda i: (0, 0)),             # vector slab
            ],
            out_specs=pl.BlockSpec((BG * L, DP), lambda i: (i, 0)),
        ),
        compiler_params=pltpu.CompilerParams(
            dimension_semantics=("parallel",)),
    )(xs, cond_p, adap_w, mod_w, qkv_w, misc, mlp1, mlp2, vec)

    # Un-pack the lane-packed problems back to [B, L, D] (free in XLA).
    out = out2d.reshape(G, L, P, D).transpose(0, 2, 1, 3).reshape(B, L, D)
    return out


def init_params(key):
    # Deterministic synthetic parameters.  NOTE: the torch module uses
    # zero_init=True for the modulation Linear; small random values are used so
    # the modulation path is numerically exercised.
    ks = jax.random.split(key, 20)

    def w(k, shape, scale=0.1):
        return jax.random.normal(k, shape, jnp.float32) * scale

    return {
        "adap_w": w(ks[0], (INPUT_DIM, D_MODEL)),
        "adap_b": w(ks[1], (1, D_MODEL)),
        "n0_g": 1.0 + w(ks[2], (1, D_MODEL)),
        "n0_b": w(ks[3], (1, D_MODEL)),
        "m1_w": w(ks[4], (D_MODEL, 2 * D_MODEL)),
        "m1_b": w(ks[5], (1, 2 * D_MODEL)),
        "q_w": w(ks[6], (D_MODEL, D_MODEL)),
        "k_w": w(ks[7], (D_MODEL, D_MODEL)),
        "v_w": w(ks[8], (D_MODEL, D_MODEL)),
        "merge_w": w(ks[9], (D_MODEL, D_MODEL)),
        "n1_g": 1.0 + w(ks[10], (1, D_MODEL)),
        "n1_b": w(ks[11], (1, D_MODEL)),
        "m2_w": w(ks[12], (D_MODEL, 2 * D_MODEL)),
        "m2_b": w(ks[13], (1, 2 * D_MODEL)),
        "mlp1_w": w(ks[14], (2 * D_MODEL, 2 * D_MODEL)),
        "mlp2_w": w(ks[15], (2 * D_MODEL, D_MODEL)),
        "n2_g": 1.0 + w(ks[16], (1, D_MODEL)),
        "n2_b": w(ks[17], (1, D_MODEL)),
    }


def _reference_forward(x, source, cond, p):
    """Pure-JAX reference following the PyTorch module op-for-op (per head)."""
    D, H, dh = D_MODEL, NHEAD, HEAD_DIM
    with jax.default_matmul_precision("highest"):
        def ln(v, g, b):
            mu = v.mean(-1, keepdims=True)
            var = ((v - mu) ** 2).mean(-1, keepdims=True)
            return (v - mu) / jnp.sqrt(var + _LN_EPS) * g + b

        def mod(v, c, w_, b_):
            e = (c * jax.nn.sigmoid(c)) @ w_ + b_
            sc, sh = e[:, :D], e[:, D:]
            return v * (1.0 + sc[:, None, :]) + sh[:, None, :]

        xa = x @ p["adap_w"] + p["adap_b"]
        sa = source @ p["adap_w"] + p["adap_b"]
        xa = mod(ln(xa, p["n0_g"], p["n0_b"]), cond, p["m1_w"], p["m1_b"])
        sa = mod(ln(sa, p["n0_g"], p["n0_b"]), cond, p["m1_w"], p["m1_b"])
        B, L, _ = xa.shape
        S = sa.shape[1]
        Q = (jax.nn.elu(xa @ p["q_w"]) + 1.0).reshape(B, L, H, dh)
        K = (jax.nn.elu(sa @ p["k_w"]) + 1.0).reshape(B, S, H, dh)
        V = ((sa @ p["v_w"]) / S).reshape(B, S, H, dh)
        KV = jnp.einsum('bshd,bshe->bhde', K, V)
        Z = 1.0 / (jnp.einsum('blhd,bhd->blh', Q, K.sum(axis=1)) + _ATTN_EPS)
        msg = jnp.einsum('blhd,bhde,blh->blhe', Q, KV, Z) * S
        msg = msg.reshape(B, L, D) @ p["merge_w"]
        msg = mod(ln(msg, p["n1_g"], p["n1_b"]), cond, p["m2_w"], p["m2_b"])
        cat = jnp.concatenate([xa, msg], axis=-1)
        msg = jax.nn.relu(cat @ p["mlp1_w"]) @ p["mlp2_w"]
        msg = ln(msg, p["n2_g"], p["n2_b"])
        return xa + msg


if __name__ == "__main__":
    root = jax.random.PRNGKey(0)
    k_x, k_s, k_c, k_p = jax.random.split(root, 4)

    B = 32                              # batch of independent encoder problems
    x = jax.random.normal(k_x, (B, SEQ_L, INPUT_DIM), jnp.float32)
    source = jax.random.normal(k_s, (B, SEQ_S, INPUT_DIM), jnp.float32)
    modulation_cond = jax.random.normal(k_c, (B, D_MODEL), jnp.float32)
    params = init_params(k_p)

    out = loftr_encoder_layer(x, source, modulation_cond, params)
    jax.block_until_ready(out)

    assert out.shape == (B, SEQ_L, D_MODEL), out.shape
    assert bool(jnp.all(jnp.isfinite(out)))

    ref = _reference_forward(x, source, modulation_cond, params)
    max_err = float(jnp.max(jnp.abs(out - ref)))
    assert bool(jnp.allclose(out, ref, atol=1e-2, rtol=1e-2)), max_err
    print("KERNEL_OK")
</pallas_src>

<mosaic_0001>
module attributes {stable_mosaic.version = 11 : i64} {
  func.func @loftr_encoder_kernel(%arg0: i32, %arg1: memref<128x64xf32, #tpu.memory_space<vmem>>, %arg2: memref<4x1x128xf32, #tpu.memory_space<vmem>>, %arg3: memref<64x128xf32, #tpu.memory_space<vmem>>, %arg4: memref<128x512xf32, #tpu.memory_space<vmem>>, %arg5: memref<128x384xf32, #tpu.memory_space<vmem>>, %arg6: memref<128x384xf32, #tpu.memory_space<vmem>>, %arg7: memref<128x512xf32, #tpu.memory_space<vmem>>, %arg8: memref<256x128xf32, #tpu.memory_space<vmem>>, %arg9: memref<16x128xf32, #tpu.memory_space<vmem>>, %arg10: memref<64x128xf32, #tpu.memory_space<vmem>>) attributes {dimension_semantics = [#tpu.dimension_semantics<parallel>], iteration_bounds = array<i64: 2>, scalar_prefetch = 0 : i64, scratch_operands = 0 : i64, tpu.core_type = #tpu.core_type<tc>, window_params = [{transform_indices = @transform_0, window_bounds = array<i64: 128, 64>}, {transform_indices = @transform_1, window_bounds = array<i64: 4, 1, 128>}, {pipeline_mode = #tpu.pipeline_mode<synchronous>, transform_indices = @transform_2, window_bounds = array<i64: 64, 128>}, {pipeline_mode = #tpu.pipeline_mode<synchronous>, transform_indices = @transform_3, window_bounds = array<i64: 128, 512>}, {pipeline_mode = #tpu.pipeline_mode<synchronous>, transform_indices = @transform_4, window_bounds = array<i64: 128, 384>}, {pipeline_mode = #tpu.pipeline_mode<synchronous>, transform_indices = @transform_5, window_bounds = array<i64: 128, 384>}, {pipeline_mode = #tpu.pipeline_mode<synchronous>, transform_indices = @transform_6, window_bounds = array<i64: 128, 512>}, {pipeline_mode = #tpu.pipeline_mode<synchronous>, transform_indices = @transform_7, window_bounds = array<i64: 256, 128>}, {pipeline_mode = #tpu.pipeline_mode<synchronous>, transform_indices = @transform_8, window_bounds = array<i64: 16, 128>}, {transform_indices = @transform_9, window_bounds = array<i64: 64, 128>}]} {
    %c0 = arith.constant 0 : index
    %c0_0 = arith.constant 0 : index
    %0 = vector.load %arg9[%c0, %c0_0] : memref<16x128xf32, #tpu.memory_space<vmem>>, vector<16x128xf32>
    %1 = vector.extract_strided_slice %0 {offsets = [0, 0], sizes = [1, 128], strides = [1, 1]} : vector<16x128xf32> to vector<1x128xf32>
    %2 = vector.extract_strided_slice %0 {offsets = [1, 0], sizes = [1, 128], strides = [1, 1]} : vector<16x128xf32> to vector<1x128xf32>
    %3 = vector.extract_strided_slice %0 {offsets = [2, 0], sizes = [1, 128], strides = [1, 1]} : vector<16x128xf32> to vector<1x128xf32>
    %4 = vector.extract_strided_slice %0 {offsets = [3, 0], sizes = [1, 128], strides = [1, 1]} : vector<16x128xf32> to vector<1x128xf32>
    %5 = vector.extract_strided_slice %0 {offsets = [4, 0], sizes = [1, 128], strides = [1, 1]} : vector<16x128xf32> to vector<1x128xf32>
    %6 = vector.extract_strided_slice %0 {offsets = [5, 0], sizes = [1, 128], strides = [1, 1]} : vector<16x128xf32> to vector<1x128xf32>
    %7 = vector.extract_strided_slice %0 {offsets = [6, 0], sizes = [1, 128], strides = [1, 1]} : vector<16x128xf32> to vector<1x128xf32>
    %8 = vector.extract_strided_slice %0 {offsets = [7, 0], sizes = [1, 128], strides = [1, 1]} : vector<16x128xf32> to vector<1x128xf32>
    %9 = vector.extract_strided_slice %0 {offsets = [8, 0], sizes = [1, 128], strides = [1, 1]} : vector<16x128xf32> to vector<1x128xf32>
    %10 = vector.extract_strided_slice %0 {offsets = [9, 0], sizes = [1, 128], strides = [1, 1]} : vector<16x128xf32> to vector<1x128xf32>
    %11 = vector.extract_strided_slice %0 {offsets = [10, 0], sizes = [1, 128], strides = [1, 1]} : vector<16x128xf32> to vector<1x128xf32>
    %c0_1 = arith.constant 0 : index
    %c0_2 = arith.constant 0 : index
    %12 = vector.load %arg6[%c0_1, %c0_2] : memref<128x384xf32, #tpu.memory_space<vmem>>, vector<128x384xf32>
    %13 = vector.extract_strided_slice %12 {offsets = [0, 0], sizes = [128, 128], strides = [1, 1]} : vector<128x384xf32> to vector<128x128xf32>
    %14 = vector.extract_strided_slice %12 {offsets = [0, 128], sizes = [128, 128], strides = [1, 1]} : vector<128x384xf32> to vector<128x128xf32>
    %15 = vector.extract_strided_slice %12 {offsets = [0, 256], sizes = [128, 128], strides = [1, 1]} : vector<128x384xf32> to vector<128x128xf32>
    %c0_3 = arith.constant 0 : index
    %c0_4 = arith.constant 0 : index
    %16 = vector.load %arg1[%c0_3, %c0_4] : memref<128x64xf32, #tpu.memory_space<vmem>>, vector<128x64xf32>
    %c0_5 = arith.constant 0 : index
    %c0_6 = arith.constant 0 : index
    %17 = vector.load %arg3[%c0_5, %c0_6] : memref<64x128xf32, #tpu.memory_space<vmem>>, vector<64x128xf32>
    %cst = arith.constant dense<0.000000e+00> : vector<128x128xf32>
    %18 = tpu.matmul %16, %17, %cst {dimension_numbers = #tpu.dot_dimension_numbers<[1], [0], [0], [1], [0, 0, 1, 1], [], []>} : vector<128x64xf32>, vector<64x128xf32>, vector<128x128xf32> -> vector<128x128xf32>
    %19 = vector.broadcast %1 : vector<1x128xf32> to vector<128x128xf32>
    %20 = arith.addf %18, %19 : vector<128x128xf32>
    %cst_7 = arith.constant dense<0.000000e+00> : vector<128x128xf32>
    %21 = tpu.matmul %20, %15, %cst_7 {dimension_numbers = #tpu.dot_dimension_numbers<[1], [0], [0], [1], [0, 0, 1, 1], [], []>} : vector<128x128xf32>, vector<128x128xf32>, vector<128x128xf32> -> vector<128x128xf32>
    %22 = arith.subf %20, %21 : vector<128x128xf32>
    %23 = arith.mulf %22, %22 : vector<128x128xf32>
    %cst_8 = arith.constant dense<0.000000e+00> : vector<128x128xf32>
    %24 = tpu.matmul %23, %15, %cst_8 {dimension_numbers = #tpu.dot_dimension_numbers<[1], [0], [0], [1], [0, 0, 1, 1], [], []>} : vector<128x128xf32>, vector<128x128xf32>, vector<128x128xf32> -> vector<128x128xf32>
    %cst_9 = arith.constant 9.99999974E-6 : f32
    %25 = vector.broadcast %cst_9 : f32 to vector<128x128xf32>
    %26 = arith.addf %24, %25 : vector<128x128xf32>
    %27 = math.rsqrt %26 : vector<128x128xf32>
    %28 = arith.mulf %22, %27 : vector<128x128xf32>
    %29 = vector.broadcast %2 : vector<1x128xf32> to vector<128x128xf32>
    %30 = arith.mulf %28, %29 : vector<128x128xf32>
    %31 = vector.broadcast %3 : vector<1x128xf32> to vector<128x128xf32>
    %32 = arith.addf %30, %31 : vector<128x128xf32>
    %c0_10 = arith.constant 0 : index
    %c0_11 = arith.constant 0 : index
    %c0_12 = arith.constant 0 : index
    %33 = vector.load %arg2[%c0_10, %c0_11, %c0_12] : memref<4x1x128xf32, #tpu.memory_space<vmem>>, vector<4x1x128xf32>
    %34 = vector.shape_cast %33 : vector<4x1x128xf32> to vector<4x128xf32>
    %35 = arith.negf %34 : vector<4x128xf32>
    %36 = math.exp %35 : vector<4x128xf32>
    %cst_13 = arith.constant 1.000000e+00 : f32
    %37 = vector.broadcast %cst_13 : f32 to vector<4x128xf32>
    %38 = arith.addf %37, %36 : vector<4x128xf32>
    %39 = arith.divf %37, %38 : vector<4x128xf32>
    %40 = arith.mulf %34, %39 : vector<4x128xf32>
    %c0_14 = arith.constant 0 : index
    %c0_15 = arith.constant 0 : index
    %41 = vector.load %arg4[%c0_14, %c0_15] : memref<128x512xf32, #tpu.memory_space<vmem>>, vector<128x512xf32>
    %cst_16 = arith.constant dense<0.000000e+00> : vector<4x512xf32>
    %42 = tpu.matmul %40, %41, %cst_16 {dimension_numbers = #tpu.dot_dimension_numbers<[1], [0], [0], [1], [0, 0, 1, 1], [], []>} : vector<4x128xf32>, vector<128x512xf32>, vector<4x512xf32> -> vector<4x512xf32>
    %43 = vector.extract_strided_slice %42 {offsets = [0, 0], sizes = [4, 128], strides = [1, 1]} : vector<4x512xf32> to vector<4x128xf32>
    %44 = vector.broadcast %8 : vector<1x128xf32> to vector<4x128xf32>
    %45 = arith.addf %43, %44 : vector<4x128xf32>
    %46 = vector.extract_strided_slice %42 {offsets = [0, 128], sizes = [4, 128], strides = [1, 1]} : vector<4x512xf32> to vector<4x128xf32>
    %47 = vector.broadcast %9 : vector<1x128xf32> to vector<4x128xf32>
    %48 = arith.addf %46, %47 : vector<4x128xf32>
    %49 = vector.extract_strided_slice %42 {offsets = [0, 256], sizes = [4, 128], strides = [1, 1]} : vector<4x512xf32> to vector<4x128xf32>
    %50 = vector.broadcast %10 : vector<1x128xf32> to vector<4x128xf32>
    %51 = arith.addf %49, %50 : vector<4x128xf32>
    %52 = vector.extract_strided_slice %42 {offsets = [0, 384], sizes = [4, 128], strides = [1, 1]} : vector<4x512xf32> to vector<4x128xf32>
    %53 = vector.broadcast %11 : vector<1x128xf32> to vector<4x128xf32>
    %54 = arith.addf %52, %53 : vector<4x128xf32>
    %55 = vector.shape_cast %32 : vector<128x128xf32> to vector<4x32x128xf32>
    %56 = vector.shape_cast %45 : vector<4x128xf32> to vector<4x1x128xf32>
    %cst_17 = arith.constant 1.000000e+00 : f32
    %57 = vector.broadcast %cst_17 : f32 to vector<4x1x128xf32>
    %58 = arith.addf %57, %56 : vector<4x1x128xf32>
    %59 = vector.broadcast %58 : vector<4x1x128xf32> to vector<4x32x128xf32>
    %60 = arith.mulf %55, %59 : vector<4x32x128xf32>
    %61 = vector.shape_cast %48 : vector<4x128xf32> to vector<4x1x128xf32>
    %62 = vector.broadcast %61 : vector<4x1x128xf32> to vector<4x32x128xf32>
    %63 = arith.addf %60, %62 : vector<4x32x128xf32>
    %64 = vector.shape_cast %63 : vector<4x32x128xf32> to vector<128x128xf32>
    %c0_18 = arith.constant 0 : index
    %c0_19 = arith.constant 0 : index
    %65 = vector.load %arg5[%c0_18, %c0_19] : memref<128x384xf32, #tpu.memory_space<vmem>>, vector<128x384xf32>
    %cst_20 = arith.constant dense<0.000000e+00> : vector<128x384xf32>
    %66 = tpu.matmul %64, %65, %cst_20 {dimension_numbers = #tpu.dot_dimension_numbers<[1], [0], [0], [1], [0, 0, 1, 1], [], []>} : vector<128x128xf32>, vector<128x384xf32>, vector<128x384xf32> -> vector<128x384xf32>
    %67 = vector.shape_cast %66 : vector<128x384xf32> to vector<4x32x384xf32>
    %68 = vector.extract_strided_slice %67 {offsets = [0, 0, 0], sizes = [4, 16, 128], strides = [1, 1, 1]} : vector<4x32x384xf32> to vector<4x16x128xf32>
    %69 = vector.extract_strided_slice %67 {offsets = [0, 16, 128], sizes = [4, 16, 128], strides = [1, 1, 1]} : vector<4x32x384xf32> to vector<4x16x128xf32>
    %70 = vector.extract_strided_slice %67 {offsets = [0, 16, 256], sizes = [4, 16, 128], strides = [1, 1, 1]} : vector<4x32x384xf32> to vector<4x16x128xf32>
    %71 = vector.extract_strided_slice %63 {offsets = [0, 0, 0], sizes = [4, 16, 128], strides = [1, 1, 1]} : vector<4x32x128xf32> to vector<4x16x128xf32>
    %cst_21 = arith.constant 0.000000e+00 : f32
    %72 = vector.broadcast %cst_21 : f32 to vector<4x16x128xf32>
    %73 = arith.cmpf ogt, %68, %72 : vector<4x16x128xf32>
    %cst_22 = arith.constant 1.000000e+00 : f32
    %74 = vector.broadcast %cst_22 : f32 to vector<4x16x128xf32>
    %75 = arith.addf %68, %74 : vector<4x16x128xf32>
    %76 = math.exp %68 : vector<4x16x128xf32>
    %77 = arith.select %73, %75, %76 : vector<4x16x128xi1>, vector<4x16x128xf32>
    %cst_23 = arith.constant 0.000000e+00 : f32
    %78 = vector.broadcast %cst_23 : f32 to vector<4x16x128xf32>
    %79 = arith.cmpf ogt, %69, %78 : vector<4x16x128xf32>
    %cst_24 = arith.constant 1.000000e+00 : f32
    %80 = vector.broadcast %cst_24 : f32 to vector<4x16x128xf32>
    %81 = arith.addf %69, %80 : vector<4x16x128xf32>
    %82 = math.exp %69 : vector<4x16x128xf32>
    %83 = arith.select %79, %81, %82 : vector<4x16x128xi1>, vector<4x16x128xf32>
    "tpu.trace_start"() <{level = 10 : i32, message = "gsd,gse->gde"}> : () -> ()
    %cst_25 = arith.constant dense<0.000000e+00> : vector<4x128x128xf32>
    %84 = tpu.matmul %83, %70, %cst_25 {dimension_numbers = #tpu.dot_dimension_numbers<[1], [1], [2], [2], [0, 0, 0, 2, 1, 2], [0], [0]>} : vector<4x16x128xf32>, vector<4x16x128xf32>, vector<4x128x128xf32> -> vector<4x128x128xf32>
    "tpu.trace_stop"() : () -> ()
    %85 = vector.shape_cast %14 : vector<128x128xf32> to vector<1x128x128xf32>
    %86 = vector.broadcast %85 : vector<1x128x128xf32> to vector<4x128x128xf32>
    %87 = arith.mulf %84, %86 : vector<4x128x128xf32>
    "tpu.trace_start"() <{level = 10 : i32, message = "gld,gde->gle"}> : () -> ()
    %cst_26 = arith.constant dense<0.000000e+00> : vector<4x16x128xf32>
    %88 = tpu.matmul %77, %87, %cst_26 {dimension_numbers = #tpu.dot_dimension_numbers<[2], [1], [1], [2], [0, 0, 0, 1, 1, 2], [0], [0]>} : vector<4x16x128xf32>, vector<4x128x128xf32>, vector<4x16x128xf32> -> vector<4x16x128xf32>
    "tpu.trace_stop"() : () -> ()
    %89 = vector.shape_cast %88 : vector<4x16x128xf32> to vector<64x128xf32>
    %cst_27 = arith.constant dense<0.000000e+00> : vector<4x128xf32>
    %90 = vector.multi_reduction <add>, %83, %cst_27 [1] : vector<4x16x128xf32> to vector<4x128xf32>
    %91 = vector.shape_cast %90 : vector<4x128xf32> to vector<4x1x128xf32>
    %92 = vector.broadcast %91 : vector<4x1x128xf32> to vector<4x16x128xf32>
    %93 = arith.mulf %77, %92 : vector<4x16x128xf32>
    %94 = vector.shape_cast %93 : vector<4x16x128xf32> to vector<64x128xf32>
    %cst_28 = arith.constant dense<0.000000e+00> : vector<64x128xf32>
    %95 = tpu.matmul %94, %14, %cst_28 {dimension_numbers = #tpu.dot_dimension_numbers<[1], [0], [0], [1], [0, 0, 1, 1], [], []>} : vector<64x128xf32>, vector<128x128xf32>, vector<64x128xf32> -> vector<64x128xf32>
    %cst_29 = arith.constant 9.99999997E-7 : f32
    %96 = vector.broadcast %cst_29 : f32 to vector<64x128xf32>
    %97 = arith.addf %95, %96 : vector<64x128xf32>
    %98 = tpu.reciprocal %97 {approx = true} : vector<64x128xf32> -> vector<64x128xf32>
    %99 = arith.mulf %89, %98 : vector<64x128xf32>
    %cst_30 = arith.constant dense<0.000000e+00> : vector<64x128xf32>
    %100 = tpu.matmul %99, %13, %cst_30 {dimension_numbers = #tpu.dot_dimension_numbers<[1], [0], [0], [1], [0, 0, 1, 1], [], []>} : vector<64x128xf32>, vector<128x128xf32>, vector<64x128xf32> -> vector<64x128xf32>
    %cst_31 = arith.constant dense<0.000000e+00> : vector<64x128xf32>
    %101 = tpu.matmul %100, %15, %cst_31 {dimension_numbers = #tpu.dot_dimension_numbers<[1], [0], [0], [1], [0, 0, 1, 1], [], []>} : vector<64x128xf32>, vector<128x128xf32>, vector<64x128xf32> -> vector<64x128xf32>
    %102 = arith.subf %100, %101 : vector<64x128xf32>
    %103 = arith.mulf %102, %102 : vector<64x128xf32>
    %cst_32 = arith.constant dense<0.000000e+00> : vector<64x128xf32>
    %104 = tpu.matmul %103, %15, %cst_32 {dimension_numbers = #tpu.dot_dimension_numbers<[1], [0], [0], [1], [0, 0, 1, 1], [], []>} : vector<64x128xf32>, vector<128x128xf32>, vector<64x128xf32> -> vector<64x128xf32>
    %cst_33 = arith.constant 9.99999974E-6 : f32
    %105 = vector.broadcast %cst_33 : f32 to vector<64x128xf32>
    %106 = arith.addf %104, %105 : vector<64x128xf32>
    %107 = math.rsqrt %106 : vector<64x128xf32>
    %108 = arith.mulf %102, %107 : vector<64x128xf32>
    %109 = vector.broadcast %4 : vector<1x128xf32> to vector<64x128xf32>
    %110 = arith.mulf %108, %109 : vector<64x128xf32>
    %111 = vector.broadcast %5 : vector<1x128xf32> to vector<64x128xf32>
    %112 = arith.addf %110, %111 : vector<64x128xf32>
    %113 = vector.shape_cast %112 : vector<64x128xf32> to vector<4x16x128xf32>
    %114 = vector.shape_cast %51 : vector<4x128xf32> to vector<4x1x128xf32>
    %cst_34 = arith.constant 1.000000e+00 : f32
    %115 = vector.broadcast %cst_34 : f32 to vector<4x1x128xf32>
    %116 = arith.addf %115, %114 : vector<4x1x128xf32>
    %117 = vector.broadcast %116 : vector<4x1x128xf32> to vector<4x16x128xf32>
    %118 = arith.mulf %113, %117 : vector<4x16x128xf32>
    %119 = vector.shape_cast %54 : vector<4x128xf32> to vector<4x1x128xf32>
    %120 = vector.broadcast %119 : vector<4x1x128xf32> to vector<4x16x128xf32>
    %121 = arith.addf %118, %120 : vector<4x16x128xf32>
    %122 = vector.shape_cast %71 : vector<4x16x128xf32> to vector<64x128xf32>
    %123 = vector.shape_cast %121 : vector<4x16x128xf32> to vector<64x128xf32>
    %c0_35 = arith.constant 0 : index
    %c0_36 = arith.constant 0 : index
    %124 = vector.load %arg7[%c0_35, %c0_36] : memref<128x512xf32, #tpu.memory_space<vmem>>, vector<128x512xf32>
    %125 = vector.extract_strided_slice %124 {offsets = [0, 0], sizes = [128, 256], strides = [1, 1]} : vector<128x512xf32> to vector<128x256xf32>
    %cst_37 = arith.constant dense<0.000000e+00> : vector<64x256xf32>
    %126 = tpu.matmul %122, %125, %cst_37 {dimension_numbers = #tpu.dot_dimension_numbers<[1], [0], [0], [1], [0, 0, 1, 1], [], []>} : vector<64x128xf32>, vector<128x256xf32>, vector<64x256xf32> -> vector<64x256xf32>
    %127 = vector.extract_strided_slice %124 {offsets = [0, 256], sizes = [128, 256], strides = [1, 1]} : vector<128x512xf32> to vector<128x256xf32>
    %cst_38 = arith.constant dense<0.000000e+00> : vector<64x256xf32>
    %128 = tpu.matmul %123, %127, %cst_38 {dimension_numbers = #tpu.dot_dimension_numbers<[1], [0], [0], [1], [0, 0, 1, 1], [], []>} : vector<64x128xf32>, vector<128x256xf32>, vector<64x256xf32> -> vector<64x256xf32>
    %129 = arith.addf %126, %128 : vector<64x256xf32>
    %cst_39 = arith.constant 0.000000e+00 : f32
    %130 = vector.broadcast %cst_39 : f32 to vector<64x256xf32>
    %131 = arith.maximumf %129, %130 : vector<64x256xf32>
    %c0_40 = arith.constant 0 : index
    %c0_41 = arith.constant 0 : index
    %132 = vector.load %arg8[%c0_40, %c0_41] : memref<256x128xf32, #tpu.memory_space<vmem>>, vector<256x128xf32>
    %cst_42 = arith.constant dense<0.000000e+00> : vector<64x128xf32>
    %133 = tpu.matmul %131, %132, %cst_42 {dimension_numbers = #tpu.dot_dimension_numbers<[1], [0], [0], [1], [0, 0, 1, 1], [], []>} : vector<64x256xf32>, vector<256x128xf32>, vector<64x128xf32> -> vector<64x128xf32>
    %cst_43 = arith.constant dense<0.000000e+00> : vector<64x128xf32>
    %134 = tpu.matmul %133, %15, %cst_43 {dimension_numbers = #tpu.dot_dimension_numbers<[1], [0], [0], [1], [0, 0, 1, 1], [], []>} : vector<64x128xf32>, vector<128x128xf32>, vector<64x128xf32> -> vector<64x128xf32>
    %135 = arith.subf %133, %134 : vector<64x128xf32>
    %136 = arith.mulf %135, %135 : vector<64x128xf32>
    %cst_44 = arith.constant dense<0.000000e+00> : vector<64x128xf32>
    %137 = tpu.matmul %136, %15, %cst_44 {dimension_numbers = #tpu.dot_dimension_numbers<[1], [0], [0], [1], [0, 0, 1, 1], [], []>} : vector<64x128xf32>, vector<128x128xf32>, vector<64x128xf32> -> vector<64x128xf32>
    %cst_45 = arith.constant 9.99999974E-6 : f32
    %138 = vector.broadcast %cst_45 : f32 to vector<64x128xf32>
    %139 = arith.addf %137, %138 : vector<64x128xf32>
    %140 = math.rsqrt %139 : vector<64x128xf32>
    %141 = arith.mulf %135, %140 : vector<64x128xf32>
    %142 = vector.broadcast %6 : vector<1x128xf32> to vector<64x128xf32>
    %143 = arith.mulf %141, %142 : vector<64x128xf32>
    %144 = vector.broadcast %7 : vector<1x128xf32> to vector<64x128xf32>
    %145 = arith.addf %143, %144 : vector<64x128xf32>
    %146 = arith.addf %122, %145 : vector<64x128xf32>
    %c0_46 = arith.constant 0 : index
    %c0_47 = arith.constant 0 : index
    %147 = vector.load %arg10[%c0_46, %c0_47] : memref<64x128xf32, #tpu.memory_space<vmem>>, vector<64x128xf32>
    tpu.vector_store %arg10[%c0_46, %c0_47], %146 {strides = array<i32>} : memref<64x128xf32, #tpu.memory_space<vmem>>, vector<64x128xf32>,
    return
  }
  func.func @transform_0(%arg0: i32) -> (i32, i32) {
    %c0_i32 = arith.constant 0 : i32
    %c0_i32_0 = arith.constant 0 : i32
    return %arg0, %c0_i32 : i32, i32
  }
  func.func @transform_1(%arg0: i32) -> (i32, i32, i32) {
    %c0_i32 = arith.constant 0 : i32
    %c0_i32_0 = arith.constant 0 : i32
    %c0_i32_1 = arith.constant 0 : i32
    return %arg0, %c0_i32, %c0_i32_0 : i32, i32, i32
  }
  func.func @transform_2(%arg0: i32) -> (i32, i32) {
    %c0_i32 = arith.constant 0 : i32
    %c0_i32_0 = arith.constant 0 : i32
    %c0_i32_1 = arith.constant 0 : i32
    return %c0_i32, %c0_i32_0 : i32, i32
  }
  func.func @transform_3(%arg0: i32) -> (i32, i32) {
    %c0_i32 = arith.constant 0 : i32
    %c0_i32_0 = arith.constant 0 : i32
    %c0_i32_1 = arith.constant 0 : i32
    return %c0_i32, %c0_i32_0 : i32, i32
  }
  func.func @transform_4(%arg0: i32) -> (i32, i32) {
    %c0_i32 = arith.constant 0 : i32
    %c0_i32_0 = arith.constant 0 : i32
    %c0_i32_1 = arith.constant 0 : i32
    return %c0_i32, %c0_i32_0 : i32, i32
  }
  func.func @transform_5(%arg0: i32) -> (i32, i32) {
    %c0_i32 = arith.constant 0 : i32
    %c0_i32_0 = arith.constant 0 : i32
    %c0_i32_1 = arith.constant 0 : i32
    return %c0_i32, %c0_i32_0 : i32, i32
  }
  func.func @transform_6(%arg0: i32) -> (i32, i32) {
    %c0_i32 = arith.constant 0 : i32
    %c0_i32_0 = arith.constant 0 : i32
    %c0_i32_1 = arith.constant 0 : i32
    return %c0_i32, %c0_i32_0 : i32, i32
  }
  func.func @transform_7(%arg0: i32) -> (i32, i32) {
    %c0_i32 = arith.constant 0 : i32
    %c0_i32_0 = arith.constant 0 : i32
    %c0_i32_1 = arith.constant 0 : i32
    return %c0_i32, %c0_i32_0 : i32, i32
  }
  func.func @transform_8(%arg0: i32) -> (i32, i32) {
    %c0_i32 = arith.constant 0 : i32
    %c0_i32_0 = arith.constant 0 : i32
    %c0_i32_1 = arith.constant 0 : i32
    return %c0_i32, %c0_i32_0 : i32, i32
  }
  func.func @transform_9(%arg0: i32) -> (i32, i32) {
    %c0_i32 = arith.constant 0 : i32
    %c0_i32_0 = arith.constant 0 : i32
    return %arg0, %c0_i32 : i32, i32
  }
}

</mosaic_0001>

<bundles_post_ra>
// kernel: loftr_encoder_layer.1
= control target key start
LH: loop header
LB: loop body
LE: loop exit
PB: predicated region body
PF: predicated region fallthrough
CT: control target
= control target key end

     0   :  { %s3669_s30 = smov 0   ;;  %s5769_s0 = inlined_call_operand.vmem [shape: f32[256,64], index: 0, kind: input, shape index: {}]   ;;  %s5770_s1 = inlined_call_operand.vmem [shape: f32[8,1,128], index: 1, kind: input, shape index: {}]   ;;  %s5771_s2 = inlined_call_operand.vmem [shape: f32[64,128], index: 2, kind: input, shape index: {}]   ;;  %s5772_s3 = inlined_call_operand.vmem [shape: f32[128,512], index: 3, kind: input, shape index: {}]   ;;  %s5773_s4 = inlined_call_operand.vmem [shape: f32[128,384], index: 4, kind: input, shape index: {}]   ;;  %s5774_s5 = inlined_call_operand.vmem [shape: f32[128,384], index: 5, kind: input, shape index: {}]   ;;  %s5775_s6 = inlined_call_operand.vmem [shape: f32[128,512], index: 6, kind: input, shape index: {}]   ;;  %s5776_s7 = inlined_call_operand.vmem [shape: f32[256,128], index: 7, kind: input, shape index: {}]   ;;  %s5777_s8 = inlined_call_operand.vmem [shape: f32[16,128], index: 8, kind: input, shape index: {}]   ;;  %s5778_s9 = inlined_call_operand.vmem [shape: f32[128,128], index: 9, kind: output, shape index: {}]  }
   0x1 LB: > { %s3675_s10 = sadd.s32 4294967295, %s3617_s30   ;;  %p3304_p0 = scmp.ge.s32.totalorder %s3617_s30, 1  ;;  %s3617_s30 = sphi %s3669_s30, %s19_s30  }
   0x2   : > { %p298_p1 = scmp.lt.s32.totalorder %s3617_s30, 3 }
   0x4   : > { %p299_p2 = pnand %p3304_p0, %p298_p1 }
   0x6   : > { %302 = sbr.rel (%p299_p2) target bundleno = 2368 (0x940), region = 56 }
   0xb   : > { %v428_v0 = vld [vmem:[%s5771_s2 + $0x38] sm:$0xff]  ;;  %v427_v1 = vld [vmem:[%s5771_s2 + $0x30] sm:$0xff]  ;;  %s3305_s15 = sshll.u32 %s3675_s10, 4  ;;  %v426_v2 = vld [vmem:[%s5771_s2 + $0x28] sm:$0xff]  ;;  %vm430_vm0 = vcmask 523264   ;;  %s3307_s14 = sshll.u32 %s3675_s10, 2 }
   0xc   : > { %487 = vmatpush.msra.mxu0 %v428_v0  ;;  %p339_p3 = scmp.lt.s32.totalorder %s3305_s15, 31  ;;  %v425_v3 = vld [vmem:[%s5771_s2 + $0x20] sm:$0xff]  ;;  %v424_v4 = vld [vmem:[%s5771_s2 + $0x18] sm:$0xff]  ;;  %v423_v5 = vld [vmem:[%s5771_s2 + $0x10] sm:$0xff]  ;;  %p345_p4 = scmp.lt.s32.totalorder %s3307_s14, 7 }
   0xd   : > { %v422_v6 = vld [vmem:[%s5771_s2 + $0x8] sm:$0xff]  ;;  %v421_v7 = vld [vmem:[%s5771_s2] sm:$0xff]  ;;  %v404_v17 = vld [vmem:[%s5774_s5 + $0x178] sm:$0xff]  ;;  %s3308_s16 = sshll.u32 %s3675_s10, 3 }
   0xe   : > { %488 = vmatpush.msra.mxu0 %v427_v1  ;;  %s5826_s15 = smov (!%p339_p3, %s3305_s15), 31  ;;  %v401_v18 = vld [vmem:[%s5774_s5 + $0x160] sm:$0xff]  ;;  %544 = vmatpush.msra.mxu1 %v404_v17  ;;  %v398_v19 = vld [vmem:[%s5774_s5 + $0x148] sm:$0xff]  ;;  %v395_v20 = vld [vmem:[%s5774_s5 + $0x130] sm:$0xff]  ;;  %s5828_s14 = smov (!%p345_p4, %s3307_s14), 7 }
   0xf   : > { %s3306_s22 = sshll.u32 %s5826_s15, 3  ;;  %641 = vmatpush.msra.mxu2 %v404_v17  ;;  %v392_v22 = vld [vmem:[%s5774_s5 + $0x118] sm:$0xff]  ;;  %v389_v23 = vld [vmem:[%s5774_s5 + $0x100] sm:$0xff]  ;;  %v386_v24 = vld [vmem:[%s5774_s5 + $0xe8] sm:$0xff]  ;;  %p350_p5 = scmp.lt.s32.totalorder %s3308_s16, 15 }
  0x10   : > { %489 = vmatpush.msra.mxu0 %v426_v2  ;;  %s3704_s29 = scalar_lea.vmem %s5769_s0, %s3306_s22  ;;  %545 = vmatpush.msra.mxu1 %v401_v18  ;;  %v383_v25 = vld [vmem:[%s5774_s5 + $0xd0] sm:$0xff]  ;;  %v380_v27 = vld [vmem:[%s5774_s5 + $0xb8] sm:$0xff]  ;;  %v377_v28 = vld [vmem:[%s5774_s5 + $0xa0] sm:$0xff] }
  0x11   : > { %v405_v8 = vld [vmem:[%s3704_s29] sm:$0xff]  ;;  %v406_v9 = vld [vmem:[%s3704_s29 + $0x8] sm:$0xff]  ;;  %v407_v10 = vld [vmem:[%s3704_s29 + $0x10] sm:$0xff]  ;;  %642 = vmatpush.msra.mxu2 %v401_v18  ;;  %s5830_s16 = smov (!%p350_p5, %s3308_s16), 15 }
  0x12   : > { %490 = vmatpush.msra.mxu0 %v425_v3  ;;  %v408_v11 = vld [vmem:[%s3704_s29 + $0x18] sm:$0xff]  ;;  %v409_v12 = vld [vmem:[%s3704_s29 + $0x20] sm:$0xff]  ;;  %v410_v13 = vld [vmem:[%s3704_s29 + $0x28] sm:$0xff]  ;;  %546 = vmatpush.msra.mxu1 %v398_v19  ;;  %s3309_s10 = sshll.u32 %s5830_s16, 3 }
  0x13   : > { %v411_v14 = vld [vmem:[%s3704_s29 + $0x30] sm:$0xff]  ;;  %v412_v15 = vld [vmem:[%s3704_s29 + $0x38] sm:$0xff]  ;;  %v413_v16 = vld [vmem:[%s3704_s29 + $0x40] sm:$0xff]  ;;  %643 = vmatpush.msra.mxu2 %v398_v19  ;;  %s5727_s19 = scalar_lea.vmem %s5778_s9, %s3309_s10 }
  0x14   : > { %491 = vmatpush.msra.mxu0 %v424_v4  ;;  %v414_v21 = vld [vmem:[%s3704_s29 + $0x48] sm:$0xff]  ;;  %547 = vmatpush.msra.mxu1 %v395_v20  ;;  %v415_v26 = vld [vmem:[%s3704_s29 + $0x50] sm:$0xff]  ;;  %v416_v31 = vld [vmem:[%s3704_s29 + $0x58] sm:$0xff] }
  0x15   : > { %644 = vmatpush.msra.mxu2 %v395_v20  ;;  %v374_v29 = vld [vmem:[%s5774_s5 + $0x88] sm:$0xff]  ;;  %v371_v30 = vld [vmem:[%s5774_s5 + $0x70] sm:$0xff]  ;;  %v368_v32 = vld [vmem:[%s5774_s5 + $0x58] sm:$0xff] }
  0x16   : > { %492 = vmatpush.msra.mxu0 %v423_v5  ;;  %548 = vmatpush.msra.mxu1 %v392_v22  ;;  %v365_v33 = vld [vmem:[%s5774_s5 + $0x40] sm:$0xff]  ;;  %v362_v34 = vld [vmem:[%s5774_s5 + $0x28] sm:$0xff]  ;;  %v359_v36 = vld [vmem:[%s5774_s5 + $0x10] sm:$0xff] }
  0x17   : > { %645 = vmatpush.msra.mxu2 %v392_v22  ;;  %v417_v35 = vld [vmem:[%s3704_s29 + $0x60] sm:$0xff]  ;;  %v418_v37 = vld [vmem:[%s3704_s29 + $0x68] sm:$0xff]  ;;  %v419_v38 = vld [vmem:[%s3704_s29 + $0x70] sm:$0xff] }
  0x18   : > { %493 = vmatpush.msra.mxu0 %v422_v6  ;;  %549 = vmatpush.msra.mxu1 %v389_v23  ;;  %v420_v39 = vld [vmem:[%s3704_s29 + $0x78] sm:$0xff]  ;;  %v3791_v40 = vld [vmem:[%s5777_s8] sm:$0xff]  ;;  %s347_s29 = scalar_lea.vmem %s5770_s1, %s5828_s14 }
  0x19   : > { %646 = vmatpush.msra.mxu2 %v389_v23  ;;  %v3795_v41 = vperm.slane %v3791_v40, 0  ;;  %v1060_v58 = vld [vmem:[%s5772_s3 + $0x1e0] sm:$0xff] }
  0x1a   : > { %494 = vmatpush.msra.mxu0 %v421_v7  ;;  %550 = vmatpush.msra.mxu1 %v386_v24  ;;  %v1056_v60 = vld [vmem:[%s5772_s3 + $0x1c0] sm:$0xff] }
  0x1b   : > { %3310 = vmatmul.msk.f32.vlgmr.msra.gmra.mxu0 %vm430_vm0, %v405_v8  ;;  %647 = vmatpush.msra.mxu2 %v386_v24  ;;  %v1052_v62 = vld [vmem:[%s5772_s3 + $0x1a0] sm:$0xff] }
  0x1c   : > { %551 = vmatpush.msra.mxu1 %v383_v25  ;;  %1077 = vmatpush.msra.mxu3 %v1060_v58  ;;  %v1048_v63 = vld [vmem:[%s5772_s3 + $0x180] sm:$0xff] }
  0x1d   : > { %648 = vmatpush.msra.mxu2 %v383_v25  ;;  %v1044_v0 = vld [vmem:[%s5772_s3 + $0x160] sm:$0xff] }
  0x1e   : > { %552 = vmatpush.msra.mxu1 %v380_v27  ;;  %1078 = vmatpush.msra.mxu3 %v1056_v60  ;;  %v1040_v2 = vld [vmem:[%s5772_s3 + $0x140] sm:$0xff] }
  0x1f   : > { %649 = vmatpush.msra.mxu2 %v380_v27  ;;  %v1036_v4 = vld [vmem:[%s5772_s3 + $0x120] sm:$0xff] }
  0x20   : > { %553 = vmatpush.msra.mxu1 %v377_v28  ;;  %1079 = vmatpush.msra.mxu3 %v1052_v62  ;;  %v1032_v5 = vld [vmem:[%s5772_s3 + $0x100] sm:$0xff] }
  0x21   : > { %650 = vmatpush.msra.mxu2 %v377_v28  ;;  %v1028_v6 = vld [vmem:[%s5772_s3 + $0xe0] sm:$0xff] }
  0x22   : > { %554 = vmatpush.msra.mxu1 %v374_v29  ;;  %1080 = vmatpush.msra.mxu3 %v1048_v63  ;;  %v3868_v7 = vld [vmem:[%s347_s29] sm:$0x1]  ;;  %v3870_v8 = vld [vmem:[%s347_s29 + $0x1] sm:$0x1] }
  0x23   : > { %3311 = vmatmul.msk.f32.gmra.mxu0 %vm430_vm0, %v406_v9  ;;  %651 = vmatpush.msra.mxu2 %v374_v29  ;;  %v3872_v9 = vld [vmem:[%s347_s29 + $0x2] sm:$0x1] }
  0x24   : > { %555 = vmatpush.msra.mxu1 %v371_v30  ;;  %1081 = vmatpush.msra.mxu3 %v1044_v0  ;;  %v1020_v18 = vld [vmem:[%s5772_s3 + $0xa0] sm:$0xff] }
  0x25   : > { %652 = vmatpush.msra.mxu2 %v371_v30  ;;  %v1016_v19 = vld [vmem:[%s5772_s3 + $0x80] sm:$0xff] }
  0x26   : > { %556 = vmatpush.msra.mxu1 %v368_v32  ;;  %1082 = vmatpush.msra.mxu3 %v1040_v2  ;;  %v1012_v20 = vld [vmem:[%s5772_s3 + $0x60] sm:$0xff] }
  0x27   : > { %653 = vmatpush.msra.mxu2 %v368_v32  ;;  %v1008_v24 = vld [vmem:[%s5772_s3 + $0x40] sm:$0xff] }
  0x28   : > { %557 = vmatpush.msra.mxu1 %v365_v33  ;;  %1083 = vmatpush.msra.mxu3 %v1036_v4  ;;  %v1004_v30 = vld [vmem:[%s5772_s3 + $0x20] sm:$0xff] }
  0x29   : > { %654 = vmatpush.msra.mxu2 %v365_v33  ;;  %v1000_v32 = vld [vmem:[%s5772_s3] sm:$0xff]  ;;  %v1061_v33 = vld [vmem:[%s5772_s3 + $0x1e8] sm:$0xff] }
  0x2a   : > { %558 = vmatpush.msra.mxu1 %v362_v34  ;;  %1084 = vmatpush.msra.mxu3 %v1032_v5  ;;  %v1041_v5 = vld [vmem:[%s5772_s3 + $0x148] sm:$0xff] }
  0x2b   : > { %3312 = vmatmul.msk.f32.gmra.mxu0 %vm430_vm0, %v407_v10  ;;  %655 = vmatpush.msra.mxu2 %v362_v34  ;;  %v3874_v10 = vld [vmem:[%s347_s29 + $0x3] sm:$0x1] }
  0x2c   : > { %559 = vmatpush.msra.mxu1 %v359_v36  ;;  %1085 = vmatpush.msra.mxu3 %v1028_v6 }
  0x2d   : > { %656 = vmatpush.msra.mxu2 %v359_v36 }
  0x33   : > { %3313 = vmatmul.msk.f32.gmra.mxu0 %vm430_vm0, %v408_v11  ;;  %v3326_v11 = vmul.f32 -1.442695, %v3868_v7 }
  0x35   : > { %3437 = vpow2.f32 %v3326_v11 }
  0x3b   : > { %3314 = vmatmul.msk.f32.gmra.mxu0 %vm430_vm0, %v409_v12  ;;  %v3327_v12 = vmul.f32 -1.442695, %v3870_v8 }
  0x3d   : > { %3439 = vpow2.f32 %v3327_v12 }
  0x43   : > { %3315 = vmatmul.msk.f32.gmra.mxu0 %vm430_vm0, %v410_v13 }
  0x4b   : > { %3316 = vmatmul.msk.f32.gmra.mxu0 %vm430_vm0, %v411_v14  ;;  %v1024_v14 = vld [vmem:[%s5772_s3 + $0xc0] sm:$0xff] }
  0x4c   : > { %1086 = vmatpush.msra.mxu3 %v1024_v14 }
  0x4e   : > { %1087 = vmatpush.msra.mxu3 %v1020_v18  ;;  %v1033_v18 = vld [vmem:[%s5772_s3 + $0x108] sm:$0xff] }
  0x50   : > { %1088 = vmatpush.msra.mxu3 %v1016_v19 }
  0x52   : > { %1089 = vmatpush.msra.mxu3 %v1012_v20 }
  0x53   : > { %3317 = vmatmul.msk.f32.gmra.mxu0 %vm430_vm0, %v412_v15  ;;  %v3328_v15 = vmul.f32 -1.442695, %v3872_v9 }
  0x54   : > { %1090 = vmatpush.msra.mxu3 %v1008_v24 }
  0x55   : > { %3441 = vpow2.f32 %v3328_v15 }
  0x56   : > { %1091 = vmatpush.msra.mxu3 %v1004_v30 }
  0x58   : > { %1092 = vmatpush.msra.mxu3 %v1000_v32  ;;  %v1029_v32 = vld [vmem:[%s5772_s3 + $0xe8] sm:$0xff] }
  0x5a   : > { %1097 = vmatpush.msrb.mxu3 %v1061_v33 }
  0x5b   : > { %3318 = vmatmul.msk.f32.gmra.mxu0 %vm430_vm0, %v413_v16  ;;  %v3329_v16 = vmul.f32 -1.442695, %v3874_v10 }
  0x5d   : > { %3443 = vpow2.f32 %v3329_v16  ;;  %v1037_v16 = vld [vmem:[%s5772_s3 + $0x128] sm:$0xff] }
  0x63   : > { %3319 = vmatmul.msk.f32.gmra.mxu0 %vm430_vm0, %v414_v21  ;;  %v3438_v21 = vpop.eup %3437 }
  0x64   : > { %v3440_v22 = vpop.eup %3439  ;;  %v3899_v25 = vadd.f32 1.0, %v3438_v21 }
  0x65   : > { %v3904_v28 = vadd.f32 1.0, %v3440_v22 }
  0x66   : > { %3445 = vrcp.f32 %v3899_v25  ;;  %v947_v0 = vand.u32 2147483648, %v3899_v25  ;;  %vm941_vm1 = vweird.f32 %v3899_v25  ;;  %v945_v11 = vand.u32 2147483647, %v3899_v25 }
  0x67   : > { %3447 = vrcp.f32 %v3904_v28  ;;  %v962_v2 = vand.u32 2147483648, %v3904_v28  ;;  %vm956_vm4 = vweird.f32 %v3904_v28  ;;  %v960_v20 = vand.u32 2147483647, %v3904_v28 }
  0x68   : > { %vm946_vm6 = vcmp.eq.f32.partialorder %v945_v11, 8.507059e+37 }
  0x69   : > { %vm961_vm8 = vcmp.eq.f32.partialorder %v960_v20, 8.507059e+37  ;;  %v1278_v20 = vld [vmem:[%s5773_s4 + $0x170] sm:$0xff] }
  0x6a   : > { %1337 = vmatpush.msrb.mxu1 %v1278_v20  ;;  %v4196_v20 = vld [vmem:[%s5773_s4 + $0x100] sm:$0xff] }
  0x6b   : > { %3320 = vmatmul.msk.f32.gmra.mxu0 %vm430_vm0, %v415_v26  ;;  %v3442_v26 = vpop.eup %3441 }
  0x6c   : > { %v3444_v29 = vpop.eup %3443 }
  0x6d   : > { %v3919_v34 = vadd.f32 1.0, %v3444_v29  ;;  %v3446_v36 = vpop.eup %3445 }
  0x6e   : > { %vm942_vm2 = vweird.f32 %v3446_v36 }
  0x6f   : > { %vm943_vm3 = vmor %vm941_vm1, %vm942_vm2  ;;  %vm986_vm13 = vweird.f32 %v3919_v34  ;;  %v990_v33 = vand.u32 2147483647, %v3919_v34 }
  0x73   : > { %3321 = vmatmul.msk.f32.gmra.mxu0 %vm430_vm0, %v416_v31  ;;  %v3909_v31 = vadd.f32 1.0, %v3442_v26 }
  0x75   : > { %3449 = vrcp.f32 %v3909_v31  ;;  %v977_v4 = vand.u32 2147483648, %v3909_v31  ;;  %vm971_vm9 = vweird.f32 %v3909_v31 }
  0x76   : > { %3451 = vrcp.f32 %v3919_v34 }
  0x7b   : > { %3322 = vmatmul.msk.f32.gmra.mxu0 %vm430_vm0, %v417_v35  ;;  %v1057_v35 = vld [vmem:[%s5772_s3 + $0x1c8] sm:$0xff] }
  0x7c   : > { %1098 = vmatpush.msrb.mxu3 %v1057_v35 }
  0x83   : > { %3323 = vmatmul.msk.f32.gmra.mxu0 %vm430_vm0, %v418_v37 }
  0x8b   : > { %3324 = vmatmul.msk.f32.gmra.mxu0 %vm430_vm0, %v419_v38  ;;  %v3448_v38 = vpop.eup %3447 }
  0x8c   : > { %vm957_vm5 = vweird.f32 %v3448_v38 }
  0x8d   : > { %vm958_vm7 = vmor %vm956_vm4, %vm957_vm5 }
  0x93   : > { %3325 = vmatmul.msk.f32.gmra.mxu0 %vm430_vm0, %v420_v39  ;;  %vm991_vm0 = vcmp.eq.f32.partialorder %v990_v33, 8.507059e+37 }
  0x98   : > { %v496_v42 = vpop.f32.mrf.mxu0 }
  0x99   : > { %v3798_v43 = vadd.f32 %v496_v42, %v3795_v41  ;;  %v1053_v42 = vld [vmem:[%s5772_s3 + $0x1a8] sm:$0xff] }
  0x9a   : > { %1099 = vmatpush.msrb.mxu3 %v1053_v42 }
  0x9b   : > { %560 = vmatmul.f32.vlgmr.msra.gmra.mxu1 %v3798_v43 }
  0xa0   : > { %v499_v44 = vpop.f32.mrf.mxu0 }
  0xa1   : > { %v3802_v45 = vadd.f32 %v499_v44, %v3795_v41  ;;  %v1049_v44 = vld [vmem:[%s5772_s3 + $0x188] sm:$0xff] }
  0xa2   : > { %1100 = vmatpush.msrb.mxu3 %v1049_v44 }
  0xa3   : > { %563 = vmatmul.f32.gmra.mxu1 %v3802_v45 }
  0xa8   : > { %v502_v46 = vpop.f32.mrf.mxu0 }
  0xa9   : > { %v3806_v47 = vadd.f32 %v502_v46, %v3795_v41  ;;  %v937_v46 = vmul.f32 %v3446_v36, %v3899_v25  ;;  %v975_v25 = vand.u32 2147483647, %v3909_v31 }
  0xab   : > { %566 = vmatmul.f32.gmra.mxu1 %v3806_v47  ;;  %vm976_vm12 = vcmp.eq.f32.partialorder %v975_v25, 8.507059e+37 }
  0xb0   : > { %v505_v48 = vpop.f32.mrf.mxu0 }
  0xb1   : > { %v3810_v49 = vadd.f32 %v505_v48, %v3795_v41  ;;  %v3937_v48 = vpop.eup %3449 }
  0xb2   : > { %vm972_vm10 = vweird.f32 %v3937_v48 }
  0xb3   : > { %569 = vmatmul.f32.gmra.mxu1 %v3810_v49  ;;  %vm973_vm11 = vmor %vm971_vm9, %vm972_vm10 }
  0xb8   : > { %v508_v50 = vpop.f32.mrf.mxu0 }
  0xb9   : > { %v3814_v51 = vadd.f32 %v508_v50, %v3795_v41  ;;  %v952_v50 = vmul.f32 %v3448_v38, %v3904_v28  ;;  %v978_v28 = vor.u32 1.1754944e-38, %v977_v4 }
  0xbb   : > { %572 = vmatmul.f32.gmra.mxu1 %v3814_v51  ;;  %v953_v58 = vsub.f32 1.0, %v952_v50 }
  0xc0   : > { %v511_v52 = vpop.f32.mrf.mxu0 }
  0xc1   : > { %v3818_v53 = vadd.f32 %v511_v52, %v3795_v41  ;;  %v3940_v52 = vpop.eup %3451 }
  0xc2   : > { %v982_v63 = vmul.f32 %v3940_v52, %v3919_v34  ;;  %vm987_vm14 = vweird.f32 %v3940_v52 }
  0xc3   : > { %575 = vmatmul.f32.gmra.mxu1 %v3818_v53  ;;  %vm3988_vm15 = vmor %vm986_vm13, %vm987_vm14 }
  0xc4   : > { %v983_v30 = vsub.f32 1.0, %v982_v63 }
  0xc6   : > { %v984_v35 = vmul.f32 %v3940_v52, %v983_v30 }
  0xc8   : > { %v514_v54 = vpop.f32.mrf.mxu0 }
  0xc9   : > { %v3822_v55 = vadd.f32 %v514_v54, %v3795_v41  ;;  %v938_v54 = vsub.f32 1.0, %v937_v46 }
  0xcb   : > { %578 = vmatmul.f32.gmra.mxu1 %v3822_v55  ;;  %v939_v60 = vmul.f32 %v3446_v36, %v938_v54 }
  0xcd   : > { %v940_v6 = vadd.f32 %v3446_v36, %v939_v60  ;;  %v1013_v60 = vld [vmem:[%s5772_s3 + $0x68] sm:$0xff] }
  0xcf   : > { %v944_v19 = vsel %vm943_vm3, %v3446_v36, %v940_v6  ;;  %v992_v36 = vand.u32 2147483648, %v3919_v34 }
  0xd0   : > { %v517_v56 = vpop.f32.mrf.mxu0 }
  0xd1   : > { %v3826_v57 = vadd.f32 %v517_v56, %v3795_v41  ;;  %v967_v56 = vmul.f32 %v3937_v48, %v3909_v31  ;;  %v993_v54 = vor.u32 1.1754944e-38, %v992_v36 }
  0xd3   : > { %581 = vmatmul.f32.gmra.mxu1 %v3826_v57  ;;  %v968_v62 = vsub.f32 1.0, %v967_v56  ;;  %v1021_v56 = vld [vmem:[%s5772_s3 + $0xa8] sm:$0xff] }
  0xd5   : > { %v969_v24 = vmul.f32 %v3937_v48, %v968_v62  ;;  %v1009_v62 = vld [vmem:[%s5772_s3 + $0x48] sm:$0xff] }
  0xd7   : > { %v970_v29 = vadd.f32 %v3937_v48, %v969_v24 }
  0xd8   : > { %v520_v59 = vpop.f32.mrf.mxu0 }
  0xd9   : > { %v3837_v61 = vadd.f32 %v520_v59, %v3795_v41  ;;  %v1045_v59 = vld [vmem:[%s5772_s3 + $0x168] sm:$0xff]  ;;  %v974_v31 = vsel %vm973_vm11, %v3937_v48, %v970_v29  ;;  %v985_v48 = vadd.f32 %v3940_v52, %v984_v35 }
  0xda   : > { %1101 = vmatpush.msrb.mxu3 %v1045_v59  ;;  %v979_v42 = vsel %vm976_vm12, %v978_v28, %v974_v31 }
  0xdb   : > { %584 = vmatmul.f32.gmra.mxu1 %v3837_v61  ;;  %v998_v34 = vmul.f32 %v979_v42, %v3872_v9 }
  0xdc   : > { %1102 = vmatpush.msrb.mxu3 %v1041_v5 }
  0xdd   : > { %1072 = vst [vmem:[#allocation1 + $0x2] ss:$9 sm:$0xff] %v998_v34 }
  0xde   : > { %1103 = vmatpush.msrb.mxu3 %v1037_v16 }
  0xe0   : > { %v523_v1 = vpop.f32.mrf.mxu0  ;;  %1104 = vmatpush.msrb.mxu3 %v1033_v18 }
  0xe1   : > { %v3853_v3 = vadd.f32 %v523_v1, %v3795_v41  ;;  %v954_v1 = vmul.f32 %v3448_v38, %v953_v58  ;;  %v989_v58 = vsel %vm3988_vm15, %v3940_v52, %v985_v48  ;;  %v1254_v48 = vld [vmem:[%s5773_s4 + $0xb0] sm:$0xff] }
  0xe2   : > { %1105 = vmatpush.msrb.mxu3 %v1029_v32  ;;  %v994_v9 = vsel %vm991_vm0, %v993_v54, %v989_v58 }
  0xe3   : > { %587 = vmatmul.f32.gmra.mxu1 %v3853_v3  ;;  %v955_v14 = vadd.f32 %v3448_v38, %v954_v1  ;;  %v999_v59 = vmul.f32 %v994_v9, %v3874_v10  ;;  %v1001_v10 = vld [vmem:[%s5772_s3 + $0x8] sm:$0xff]  ;;  %v1274_v9 = vld [vmem:[%s5773_s4 + $0x150] sm:$0xff] }
  0xe5   : > { %v959_v22 = vsel %vm958_vm7, %v3448_v38, %v955_v14  ;;  %v1025_v38 = vld [vmem:[%s5772_s3 + $0xc8] sm:$0xff]  ;;  %1074 = vst [vmem:[#allocation1 + $0x3] ss:$9 sm:$0xff] %v999_v59  ;;  %v1271_v59 = vld [vmem:[%s5773_s4 + $0x138] sm:$0xff] }
  0xe6   : > { %1106 = vmatpush.msrb.mxu3 %v1025_v38 }
  0xe8   : > { %v526_v13 = vpop.f32.mrf.mxu0  ;;  %1107 = vmatpush.msrb.mxu3 %v1021_v56  ;;  %v1277_v56 = vld [vmem:[%s5773_s4 + $0x168] sm:$0xff] }
  0xe9   : > { %v3884_v17 = vadd.f32 %v526_v13, %v3795_v41  ;;  %v948_v13 = vor.u32 1.1754944e-38, %v947_v0  ;;  %v1005_v0 = vld [vmem:[%s5772_s3 + $0x28] sm:$0xff]  ;;  %1280 = vmatpush.msrb.mxu0 %v1277_v56 }
  0xeb   : > { %590 = vmatmul.f32.gmra.mxu1 %v3884_v17  ;;  %v949_v21 = vsel %vm946_vm6, %v948_v13, %v944_v19  ;;  %1281 = vmatpush.msrb.mxu0 %v1274_v9 }
  0xed   : > { %1282 = vmatpush.msrb.mxu0 %v1271_v59 }
  0xf0   : > { %v529_v23 = vpop.f32.mrf.mxu0 }
  0xf1   : > { %v3902_v27 = vadd.f32 %v529_v23, %v3795_v41  ;;  %v963_v23 = vor.u32 1.1754944e-38, %v962_v2 }
  0xf3   : > { %593 = vmatmul.f32.gmra.mxu1 %v3902_v27  ;;  %v964_v26 = vsel %vm961_vm8, %v963_v23, %v959_v22 }
  0xf4   : > { %v997_v46 = vmul.f32 %v964_v26, %v3870_v8  ;;  %v1017_v8 = vld [vmem:[%s5772_s3 + $0x88] sm:$0xff] }
  0xf5   : > { %1108 = vmatpush.msrb.mxu3 %v1017_v8 }
  0xf6   : > { %1070 = vst [vmem:[#allocation1 + $0x1] ss:$9 sm:$0xff] %v997_v46 }
  0xf7   : > { %1109 = vmatpush.msrb.mxu3 %v1013_v60  ;;  %v1268_v60 = vld [vmem:[%s5773_s4 + $0x120] sm:$0xff] }
  0xf8   : > { %v532_v37 = vpop.f32.mrf.mxu0  ;;  %1283 = vmatpush.msrb.mxu0 %v1268_v60 }
  0xf9   : > { %v3928_v39 = vadd.f32 %v532_v37, %v3795_v41  ;;  %v996_v37 = vmul.f32 %v949_v21, %v3868_v7  ;;  %1110 = vmatpush.msrb.mxu3 %v1009_v62  ;;  %v4140_v62 = vld [vmem:[%s5773_s4 + $0x178] sm:$0xff] }
  0xfa   : > { %3396 = vmatpush.msrb.mxu2 %v4140_v62 }
  0xfb   : > { %596 = vmatmul.f32.gmra.mxu1 %v3928_v39  ;;  %1068 = vst [vmem:[#allocation1] ss:$9 sm:$0xff] %v996_v37  ;;  %1111 = vmatpush.msrb.mxu3 %v1005_v0 }
  0xfd   : > { %1112 = vmatpush.msrb.mxu3 %v1001_v10  ;;  %v1262_v10 = vld [vmem:[%s5773_s4 + $0xf0] sm:$0xff] }
 0x100   : > { %v535_v12 = vpop.f32.mrf.mxu0 }
 0x101   : > { %v3960_v15 = vadd.f32 %v535_v12, %v3795_v41 }
 0x102   : > { %v1075_v1 = vld [vmem:[#allocation1] sm:$0xff] }
 0x103   : > { %599 = vmatmul.f32.gmra.mxu1 %v3960_v15  ;;  %1093 = vmatmul.f32.vlgmr.msra.gmra.mxu3 %v1075_v1 }
 0x108   : > { %v538_v50 = vpop.f32.mrf.mxu0 }
 0x109   : > { %v3996_v7 = vadd.f32 %v538_v50, %v3795_v41 }
 0x10b   : > { %602 = vmatmul.f32.gmra.mxu1 %v3996_v7  ;;  %1113 = vmatmul.f32.vlgmr.msrb.gmra.mxu3 %v1075_v1  ;;  %v4152_v1 = vld [vmem:[%s5773_s4 + $0x160] sm:$0xff] }
 0x10c   : > { %3397 = vmatpush.msrb.mxu2 %v4152_v1 }
 0x110   : > { %v541_v63 = vpop.f32.mrf.mxu0 }
 0x111   : > { %v4016_v52 = vadd.f32 %v541_v63, %v3795_v41 }
 0x113   : > { %605 = vmatmul.f32.gmra.mxu1 %v4016_v52 }
 0x118   : > { %v561_v2 = vpop.f32.mrf.mxu1 }
 0x119   : > { %v4026_v4 = vsub.f32 %v3798_v43, %v561_v2 }
 0x11b   : > { %v625_v41 = vmul.f32 %v4026_v4, %v4026_v4 }
 0x11d   : > { %657 = vmatmul.f32.vlgmr.msra.gmra.mxu2 %v625_v41  ;;  %v4163_v41 = vld [vmem:[%s5773_s4 + $0x148] sm:$0xff] }
 0x11e   : > { %3398 = vmatpush.msrb.mxu2 %v4163_v41 }
 0x120   : > { %v564_v5 = vpop.f32.mrf.mxu1 }
 0x121   : > { %v4031_v6 = vsub.f32 %v3802_v45, %v564_v5  ;;  %v1256_v5 = vld [vmem:[%s5773_s4 + $0xc0] sm:$0xff] }
 0x123   : > { %v626_v11 = vmul.f32 %v4031_v6, %v4031_v6 }
 0x125   : > { %660 = vmatmul.f32.gmra.mxu2 %v626_v11  ;;  %v4172_v11 = vld [vmem:[%s5773_s4 + $0x130] sm:$0xff] }
 0x126   : > { %3399 = vmatpush.msrb.mxu2 %v4172_v11 }
 0x128   : > { %v567_v12 = vpop.f32.mrf.mxu1 }
 0x129   : > { %v4036_v13 = vsub.f32 %v3806_v47, %v567_v12  ;;  %v1253_v12 = vld [vmem:[%s5773_s4 + $0xa8] sm:$0xff] }
 0x12b   : > { %v627_v43 = vmul.f32 %v4036_v13, %v4036_v13 }
 0x12d   : > { %663 = vmatmul.f32.gmra.mxu2 %v627_v43  ;;  %v4181_v43 = vld [vmem:[%s5773_s4 + $0x118] sm:$0xff] }
 0x12e   : > { %3400 = vmatpush.msrb.mxu2 %v4181_v43 }
 0x130   : > { %v570_v14 = vpop.f32.mrf.mxu1  ;;  %3401 = vmatpush.msrb.mxu2 %v4196_v20 }
 0x131   : > { %v4041_v16 = vsub.f32 %v3810_v49, %v570_v14 }
 0x133   : > { %v628_v45 = vmul.f32 %v4041_v16, %v4041_v16 }
 0x135   : > { %666 = vmatmul.f32.gmra.mxu2 %v628_v45 }
 0x138   : > { %v573_v18 = vpop.f32.mrf.mxu1 }
 0x139   : > { %v4046_v19 = vsub.f32 %v3814_v51, %v573_v18  ;;  %v1275_v51 = vld [vmem:[%s5773_s4 + $0x158] sm:$0xff] }
 0x13a   : > { %1338 = vmatpush.msrb.mxu1 %v1275_v51  ;;  %v1251_v18 = vld [vmem:[%s5773_s4 + $0x98] sm:$0xff]  ;;  %v1261_v51 = vld [vmem:[%s5773_s4 + $0xe8] sm:$0xff] }
 0x13b   : > { %v629_v47 = vmul.f32 %v4046_v19, %v4046_v19  ;;  %3402 = vmatpush.msrb.mxu2 %v1261_v51 }
 0x13d   : > { %669 = vmatmul.f32.gmra.mxu2 %v629_v47  ;;  %v1250_v47 = vld [vmem:[%s5773_s4 + $0x90] sm:$0xff] }
 0x140   : > { %v576_v21 = vpop.f32.mrf.mxu1 }
 0x141   : > { %v4054_v49 = vsub.f32 %v3818_v53, %v576_v21  ;;  %v1272_v53 = vld [vmem:[%s5773_s4 + $0x140] sm:$0xff] }
 0x142   : > { %1339 = vmatpush.msrb.mxu1 %v1272_v53  ;;  %v1258_v53 = vld [vmem:[%s5773_s4 + $0xd0] sm:$0xff] }
 0x143   : > { %v630_v22 = vmul.f32 %v4054_v49, %v4054_v49  ;;  %3403 = vmatpush.msrb.mxu2 %v1258_v53 }
 0x145   : > { %672 = vmatmul.f32.gmra.mxu2 %v630_v22  ;;  %v1247_v22 = vld [vmem:[%s5773_s4 + $0x78] sm:$0xff] }
 0x148   : > { %v579_v23 = vpop.f32.mrf.mxu1 }
 0x149   : > { %v4062_v24 = vsub.f32 %v3822_v55, %v579_v23  ;;  %v1269_v55 = vld [vmem:[%s5773_s4 + $0x128] sm:$0xff] }
 0x14a   : > { %1340 = vmatpush.msrb.mxu1 %v1269_v55  ;;  %v1245_v23 = vld [vmem:[%s5773_s4 + $0x68] sm:$0xff]  ;;  %v1255_v55 = vld [vmem:[%s5773_s4 + $0xb8] sm:$0xff] }
 0x14b   : > { %v631_v25 = vmul.f32 %v4062_v24, %v4062_v24  ;;  %3404 = vmatpush.msrb.mxu2 %v1255_v55 }
 0x14d   : > { %675 = vmatmul.f32.gmra.mxu2 %v631_v25  ;;  %v1244_v25 = vld [vmem:[%s5773_s4 + $0x60] sm:$0xff] }
 0x150   : > { %v582_v26 = vpop.f32.mrf.mxu1 }
 0x151   : > { %v4070_v29 = vsub.f32 %v3826_v57, %v582_v26  ;;  %v1266_v57 = vld [vmem:[%s5773_s4 + $0x110] sm:$0xff]  ;;  %v1241_v26 = vld [vmem:[%s5773_s4 + $0x48] sm:$0xff] }
 0x152   : > { %1341 = vmatpush.msrb.mxu1 %v1266_v57  ;;  %v1252_v57 = vld [vmem:[%s5773_s4 + $0xa0] sm:$0xff] }
 0x153   : > { %v632_v28 = vmul.f32 %v4070_v29, %v4070_v29  ;;  %3405 = vmatpush.msrb.mxu2 %v1252_v57 }
 0x155   : > { %678 = vmatmul.f32.gmra.mxu2 %v632_v28  ;;  %v1242_v28 = vld [vmem:[%s5773_s4 + $0x50] sm:$0xff] }
 0x158   : > { %v585_v30 = vpop.f32.mrf.mxu1 }
 0x159   : > { %v4078_v32 = vsub.f32 %v3837_v61, %v585_v30  ;;  %v1263_v61 = vld [vmem:[%s5773_s4 + $0xf8] sm:$0xff]  ;;  %v1238_v30 = vld [vmem:[%s5773_s4 + $0x30] sm:$0xff] }
 0x15a   : > { %1342 = vmatpush.msrb.mxu1 %v1263_v61  ;;  %v1249_v61 = vld [vmem:[%s5773_s4 + $0x88] sm:$0xff] }
 0x15b   : > { %v633_v33 = vmul.f32 %v4078_v32, %v4078_v32  ;;  %3406 = vmatpush.msrb.mxu2 %v1249_v61 }
 0x15d   : > { %681 = vmatmul.f32.gmra.mxu2 %v633_v33  ;;  %v1239_v33 = vld [vmem:[%s5773_s4 + $0x38] sm:$0xff] }
 0x160   : > { %v588_v31 = vpop.f32.mrf.mxu1 }
 0x161   : > { %v4086_v35 = vsub.f32 %v3853_v3, %v588_v31  ;;  %v1260_v3 = vld [vmem:[%s5773_s4 + $0xe0] sm:$0xff]  ;;  %v1235_v31 = vld [vmem:[%s5773_s4 + $0x18] sm:$0xff] }
 0x162   : > { %1343 = vmatpush.msrb.mxu1 %v1260_v3  ;;  %v1246_v3 = vld [vmem:[%s5773_s4 + $0x70] sm:$0xff] }
 0x163   : > { %v634_v36 = vmul.f32 %v4086_v35, %v4086_v35  ;;  %3407 = vmatpush.msrb.mxu2 %v1246_v3 }
 0x165   : > { %684 = vmatmul.f32.gmra.mxu2 %v634_v36  ;;  %v1236_v36 = vld [vmem:[%s5773_s4 + $0x20] sm:$0xff] }
 0x168   : > { %v591_v37 = vpop.f32.mrf.mxu1 }
 0x169   : > { %v4094_v38 = vsub.f32 %v3884_v17, %v591_v37  ;;  %v1257_v17 = vld [vmem:[%s5773_s4 + $0xc8] sm:$0xff]  ;;  %v1232_v37 = vld [vmem:[%s5773_s4] sm:$0xff] }
 0x16a   : > { %1344 = vmatpush.msrb.mxu1 %v1257_v17 }
 0x16b   : > { %v635_v42 = vmul.f32 %v4094_v38, %v4094_v38 }
 0x16c   : > { %1345 = vmatpush.msrb.mxu1 %v1254_v48  ;;  %v4262_v48 = vld [vmem:[%s5773_s4 + $0x40] sm:$0xff] }
 0x16d   : > { %687 = vmatmul.f32.gmra.mxu2 %v635_v42  ;;  %v1233_v42 = vld [vmem:[%s5773_s4 + $0x8] sm:$0xff] }
 0x16e   : > { %1346 = vmatpush.msrb.mxu1 %v1251_v18 }
 0x170   : > { %v594_v44 = vpop.f32.mrf.mxu1 }
 0x171   : > { %v4102_v46 = vsub.f32 %v3902_v27, %v594_v44  ;;  %v1243_v44 = vld [vmem:[%s5773_s4 + $0x58] sm:$0xff] }
 0x172   : > { %3408 = vmatpush.msrb.mxu2 %v1243_v44 }
 0x173   : > { %v636_v50 = vmul.f32 %v4102_v46, %v4102_v46 }
 0x174   : > { %3409 = vmatpush.msrb.mxu2 %v4262_v48 }
 0x175   : > { %690 = vmatmul.f32.gmra.mxu2 %v636_v50 }
 0x178   : > { %v597_v54 = vpop.f32.mrf.mxu1 }
 0x179   : > { %v4113_v34 = vsub.f32 %v3928_v39, %v597_v54  ;;  %v4268_v54 = vld [vmem:[%s5773_s4 + $0x28] sm:$0xff] }
 0x17a   : > { %3410 = vmatpush.msrb.mxu2 %v4268_v54 }
 0x17b   : > { %v637_v27 = vmul.f32 %v4113_v34, %v4113_v34 }
 0x17d   : > { %693 = vmatmul.f32.gmra.mxu2 %v637_v27  ;;  %v4275_v27 = vld [vmem:[%s5773_s4 + $0x10] sm:$0xff] }
 0x17e   : > { %3411 = vmatpush.msrb.mxu2 %v4275_v27 }
 0x180   : > { %v600_v8 = vpop.f32.mrf.mxu1 }
 0x181   : > { %v4121_v58 = vsub.f32 %v3960_v15, %v600_v8  ;;  %v1265_v15 = vld [vmem:[%s5773_s4 + $0x108] sm:$0xff] }
 0x182   : > { %1284 = vmatpush.msrb.mxu0 %v1265_v15  ;;  %v1157_v15 = vperm.slane %v3791_v40, 7 }
 0x183   : > { %v638_v39 = vmul.f32 %v4121_v58, %v4121_v58 }
 0x184   : > { %1285 = vmatpush.msrb.mxu0 %v1262_v10 }
 0x185   : > { %696 = vmatmul.f32.gmra.mxu2 %v638_v39 }
 0x186   : > { %v1094_v8 = vpop.f32.mrf.mxu3 }
 0x188   : > { %v603_v63 = vpop.f32.mrf.mxu1 }
 0x189   : > { %v4144_v0 = vsub.f32 %v3996_v7, %v603_v63  ;;  %v1259_v7 = vld [vmem:[%s5773_s4 + $0xd8] sm:$0xff]  ;;  %v356_v63 = vld [vmem:[%s5777_s8 + $0x8] sm:$0xff] }
 0x18a   : > { %1286 = vmatpush.msrb.mxu0 %v1259_v7 }
 0x18b   : > { %v639_v2 = vmul.f32 %v4144_v0, %v4144_v0 }
 0x18c   : > { %1287 = vmatpush.msrb.mxu0 %v1256_v5  ;;  %v1159_v5 = vperm.slane %v356_v63, 0 }
 0x18d   : > { %699 = vmatmul.f32.gmra.mxu2 %v639_v2 }
 0x18e   : > { %1288 = vmatpush.msrb.mxu0 %v1253_v12 }
 0x190   : > { %v606_v14 = vpop.f32.mrf.mxu1  ;;  %1289 = vmatpush.msrb.mxu0 %v1250_v47 }
 0x191   : > { %v4185_v45 = vsub.f32 %v4016_v52, %v606_v14  ;;  %v1248_v52 = vld [vmem:[%s5773_s4 + $0x80] sm:$0xff]  ;;  %v4289_v14 = vperm.slane %v3791_v40, 1 }
 0x192   : > { %1347 = vmatpush.msrb.mxu1 %v1248_v52  ;;  %1290 = vmatpush.msrb.mxu0 %v1247_v22 }
 0x193   : > { %v640_v21 = vmul.f32 %v4185_v45, %v4185_v45 }
 0x194   : > { %1348 = vmatpush.msrb.mxu1 %v1245_v23  ;;  %1291 = vmatpush.msrb.mxu0 %v1244_v25 }
 0x195   : > { %702 = vmatmul.f32.gmra.mxu2 %v640_v21  ;;  %v4293_v21 = vperm.slane %v3791_v40, 2 }
 0x196   : > { %1349 = vmatpush.msrb.mxu1 %v1242_v28  ;;  %1292 = vmatpush.msrb.mxu0 %v1241_v26 }
 0x198   : > { %1350 = vmatpush.msrb.mxu1 %v1239_v33  ;;  %1293 = vmatpush.msrb.mxu0 %v1238_v30 }
 0x19a   : > { %1351 = vmatpush.msrb.mxu1 %v1236_v36  ;;  %1294 = vmatpush.msrb.mxu0 %v1235_v31 }
 0x19c   : > { %1352 = vmatpush.msrb.mxu1 %v1233_v42  ;;  %1295 = vmatpush.msrb.mxu0 %v1232_v37 }
 0x19e   : > { %1394 = vmatpush.msra.mxu0 %v4140_v62 }
 0x1a0   : > { %v658_v50 = vpop.f32.mrf.mxu2  ;;  %1395 = vmatpush.msra.mxu0 %v4152_v1 }
 0x1a1   : > { %v659_v17 = vadd.f32 1e-05, %v658_v50 }
 0x1a2   : > { %1396 = vmatpush.msra.mxu0 %v4163_v41  ;;  %v4286_v41 = vadd.f32 %v1157_v15, %v1094_v8 }
 0x1a3   : > { %3453 = vrsqrt.f32 %v659_v17  ;;  %vm712_vm2 = vweird.f32 %v659_v17 }
 0x1a4   : > { %1397 = vmatpush.msra.mxu0 %v4172_v11  ;;  %v1172_v52 = vadd.f32 1.0, %v4286_v41 }
 0x1a6   : > { %1398 = vmatpush.msra.mxu0 %v4181_v43  ;;  %v1114_v43 = vpop.f32.mrf.mxu3 }
 0x1a7   : > { %v4296_v22 = vadd.f32 %v1159_v5, %v1114_v43 }
 0x1a8   : > { %v661_v56 = vpop.f32.mrf.mxu2  ;;  %1399 = vmatpush.msra.mxu0 %v4196_v20 }
 0x1a9   : > { %v3454_v9 = vpop.eup %3453  ;;  %v662_v39 = vadd.f32 1e-05, %v661_v56  ;;  %v4303_v40 = vperm.slane %v4296_v22, 0 }
 0x1aa   : > { %v707_v59 = vmul.f32 %v3454_v9, %v659_v17  ;;  %1400 = vmatpush.msra.mxu0 %v1261_v51  ;;  %vm713_vm1 = vweird.f32 %v3454_v9 }
 0x1ab   : > { %3455 = vrsqrt.f32 %v662_v39  ;;  %vm714_vm3 = vmor %vm712_vm2, %vm713_vm1  ;;  %vm722_vm5 = vweird.f32 %v662_v39 }
 0x1ac   : > { %v708_v60 = vmul.f32 %v3454_v9, %v707_v59  ;;  %1401 = vmatpush.msra.mxu0 %v1258_v53 }
 0x1ae   : > { %v709_v62 = vmul.f32 0.5, %v708_v60  ;;  %1402 = vmatpush.msra.mxu0 %v1255_v55  ;;  %v4300_v55 = vperm.slane %v1172_v52, 0 }
 0x1b0   : > { %v710_v10 = vsub.f32 1.5, %v709_v62  ;;  %v664_v1 = vpop.f32.mrf.mxu2  ;;  %1403 = vmatpush.msra.mxu0 %v1252_v57 }
 0x1b1   : > { %v3456_v2 = vpop.eup %3455  ;;  %v665_v7 = vadd.f32 1e-05, %v664_v1 }
 0x1b2   : > { %v711_v11 = vmul.f32 %v3454_v9, %v710_v10  ;;  %v717_v12 = vmul.f32 %v3456_v2, %v662_v39  ;;  %1404 = vmatpush.msra.mxu0 %v1249_v61  ;;  %vm723_vm4 = vweird.f32 %v3456_v2 }
 0x1b3   : > { %3457 = vrsqrt.f32 %v665_v7  ;;  %vm724_vm6 = vmor %vm722_vm5, %vm723_vm4  ;;  %vm732_vm8 = vweird.f32 %v665_v7 }
 0x1b4   : > { %v715_v18 = vsel %vm714_vm3, %v3454_v9, %v711_v11  ;;  %v718_v47 = vmul.f32 %v3456_v2, %v717_v12  ;;  %1405 = vmatpush.msra.mxu0 %v1246_v3 }
 0x1b5   : > { %v866_v20 = vmul.f32 %v715_v18, %v4026_v4 }
 0x1b6   : > { %v719_v51 = vmul.f32 0.5, %v718_v47  ;;  %1406 = vmatpush.msra.mxu0 %v1243_v44 }
 0x1b7   : > { %v883_v23 = vmul.f32 %v4289_v14, %v866_v20 }
 0x1b8   : > { %v720_v25 = vsub.f32 1.5, %v719_v51  ;;  %v667_v53 = vpop.f32.mrf.mxu2  ;;  %1407 = vmatpush.msra.mxu0 %v4262_v48 }
 0x1b9   : > { %v3458_v26 = vpop.eup %3457  ;;  %v900_v28 = vadd.f32 %v4293_v21, %v883_v23  ;;  %v668_v4 = vadd.f32 1e-05, %v667_v53 }
 0x1ba   : > { %v721_v30 = vmul.f32 %v3456_v2, %v720_v25  ;;  %v727_v33 = vmul.f32 %v3458_v26, %v665_v7  ;;  %1408 = vmatpush.msra.mxu0 %v4268_v54  ;;  %vm733_vm7 = vweird.f32 %v3458_v26  ;;  %v1166_v25 = vrot.slane %v4286_v41, 1 }
 0x1bb   : > { %v1188_v57 = vmul.f32 %v4300_v55, %v900_v28  ;;  %3459 = vrsqrt.f32 %v668_v4  ;;  %vm734_vm9 = vmor %vm732_vm8, %vm733_vm7  ;;  %vm742_vm11 = vweird.f32 %v668_v4 }
 0x1bc   : > { %v725_v31 = vsel %vm724_vm6, %v3456_v2, %v721_v30  ;;  %v728_v36 = vmul.f32 %v3458_v26, %v727_v33  ;;  %1409 = vmatpush.msra.mxu0 %v4275_v27 }
 0x1bd   : > { %v867_v61 = vmul.f32 %v725_v31, %v4031_v6  ;;  %v4310_v37 = vadd.f32 %v4303_v40, %v1188_v57  ;;  %v1173_v57 = vadd.f32 1.0, %v1166_v25 }
 0x1be   : > { %v729_v42 = vmul.f32 0.5, %v728_v36 }
 0x1bf   : > { %5799 = vst [vmem:[#allocation2_spill] sm:$0xff] %v4310_v37  ;;  %v884_v3 = vmul.f32 %v4289_v14, %v867_v61  ;;  %1296 = vmatmul.f32.vlgmr.msrb.gmra.mxu0 %v4310_v37  ;;  %1353 = vmatmul.f32.vlgmr.msrb.gmra.mxu1 %v4310_v37 }
 0x1c0   : > { %v730_v44 = vsub.f32 1.5, %v729_v42  ;;  %v670_v50 = vpop.f32.mrf.mxu2  ;;  %v1205_v42 = vrot.slane %v4296_v22, 1 }
 0x1c1   : > { %v3460_v17 = vpop.eup %3459  ;;  %v901_v48 = vadd.f32 %v4293_v21, %v884_v3  ;;  %v671_v54 = vadd.f32 1e-05, %v670_v50 }
 0x1c2   : > { %v731_v6 = vmul.f32 %v3458_v26, %v730_v44  ;;  %v737_v56 = vmul.f32 %v3460_v17, %v668_v4  ;;  %vm743_vm10 = vweird.f32 %v3460_v17 }
 0x1c3   : > { %v1189_v8 = vmul.f32 %v4300_v55, %v901_v48  ;;  %3461 = vrsqrt.f32 %v671_v54  ;;  %vm744_vm12 = vmor %vm742_vm11, %vm743_vm10  ;;  %vm752_vm14 = vweird.f32 %v671_v54 }
 0x1c4   : > { %v735_v27 = vsel %vm734_vm9, %v3458_v26, %v731_v6  ;;  %v738_v9 = vmul.f32 %v3460_v17, %v737_v56  ;;  %v4341_v6 = vperm.slane %v1205_v42, 0  ;;  %v1167_v42 = vrot.slane %v4286_v41, 2 }
 0x1c5   : > { %v868_v39 = vmul.f32 %v735_v27, %v4036_v13  ;;  %v4320_v59 = vadd.f32 %v4303_v40, %v1189_v8 }
 0x1c6   : > { %v739_v60 = vmul.f32 0.5, %v738_v9 }
 0x1c7   : > { %5800 = vst [vmem:[#allocation3_spill] sm:$0xff] %v4320_v59  ;;  %1299 = vmatmul.f32.gmra.mxu0 %v4320_v59  ;;  %1355 = vmatmul.f32.gmra.mxu1 %v4320_v59  ;;  %v885_v15 = vmul.f32 %v4289_v14, %v868_v39 }
 0x1c8   : > { %v740_v62 = vsub.f32 1.5, %v739_v60  ;;  %1412 = vmatmul.f32.vlgmr.msrb.gmra.mxu2 %v4320_v59  ;;  %v673_v63 = vpop.f32.mrf.mxu2 }
 0x1c9   : > { %v3462_v10 = vpop.eup %3461  ;;  %v674_v1 = vadd.f32 1e-05, %v673_v63  ;;  %v902_v2 = vadd.f32 %v4293_v21, %v885_v15 }
 0x1ca   : > { %v741_v13 = vmul.f32 %v3460_v17, %v740_v62  ;;  %v747_v7 = vmul.f32 %v3462_v10, %v671_v54  ;;  %vm753_vm13 = vweird.f32 %v3462_v10 }
 0x1cb   : > { %3463 = vrsqrt.f32 %v674_v1  ;;  %v1190_v5 = vmul.f32 %v4300_v55, %v902_v2  ;;  %vm754_vm15 = vmor %vm752_vm14, %vm753_vm13  ;;  %vm762_vm1 = vweird.f32 %v674_v1 }
 0x1cc   : > { %v745_v11 = vsel %vm744_vm12, %v3460_v17, %v741_v13  ;;  %v748_v12 = vmul.f32 %v3462_v10, %v747_v7 }
 0x1cd   : > { %v869_v43 = vmul.f32 %v745_v11, %v4041_v16  ;;  %v1218_v18 = vadd.f32 %v4303_v40, %v1190_v5 }
 0x1ce   : > { %v749_v47 = vmul.f32 0.5, %v748_v12 }
 0x1cf   : > { %1302 = vmatmul.f32.gmra.mxu0 %v1218_v18  ;;  %1357 = vmatmul.f32.gmra.mxu1 %v1218_v18  ;;  %v886_v20 = vmul.f32 %v4289_v14, %v869_v43 }
 0x1d0   : > { %v750_v52 = vsub.f32 1.5, %v749_v47  ;;  %1414 = vmatmul.f32.gmra.mxu2 %v1218_v18  ;;  %v676_v51 = vpop.f32.mrf.mxu2 }
 0x1d1   : > { %v3464_v23 = vpop.eup %3463  ;;  %v677_v53 = vadd.f32 1e-05, %v676_v51  ;;  %v903_v26 = vadd.f32 %v4293_v21, %v886_v20 }
 0x1d2   : > { %v751_v28 = vmul.f32 %v3462_v10, %v750_v52  ;;  %v757_v16 = vmul.f32 %v3464_v23, %v674_v1  ;;  %vm763_vm0 = vweird.f32 %v3464_v23 }
 0x1d3   : > { %3465 = vrsqrt.f32 %v677_v53  ;;  %v1191_v4 = vmul.f32 %v4300_v55, %v903_v26  ;;  %v4338_v55 = vperm.slane %v1173_v57, 0  ;;  %vm764_vm2 = vmor %vm762_vm1, %vm763_vm0  ;;  %vm772_vm4 = vweird.f32 %v677_v53 }
 0x1d4   : > { %v755_v30 = vsel %vm754_vm15, %v3462_v10, %v751_v28  ;;  %v758_v33 = vmul.f32 %v3464_v23, %v757_v16 }
 0x1d5   : > { %v870_v31 = vmul.f32 %v755_v30, %v4046_v19  ;;  %v1219_v36 = vadd.f32 %v4303_v40, %v1191_v4 }
 0x1d6   : > { %v759_v61 = vmul.f32 0.5, %v758_v33 }
 0x1d7   : > { %v887_v3 = vmul.f32 %v4289_v14, %v870_v31  ;;  %1304 = vmatmul.f32.gmra.mxu0 %v1219_v36  ;;  %1360 = vmatmul.f32.gmra.mxu1 %v1219_v36 }
 0x1d8   : > { %v760_v44 = vsub.f32 1.5, %v759_v61  ;;  %1417 = vmatmul.f32.gmra.mxu2 %v1219_v36  ;;  %v679_v50 = vpop.f32.mrf.mxu2 }
 0x1d9   : > { %v3466_v17 = vpop.eup %3465  ;;  %v904_v48 = vadd.f32 %v4293_v21, %v887_v3  ;;  %v680_v54 = vadd.f32 1e-05, %v679_v50 }
 0x1da   : > { %v761_v19 = vmul.f32 %v3464_v23, %v760_v44  ;;  %v767_v40 = vmul.f32 %v3466_v17, %v677_v53  ;;  %vm773_vm3 = vweird.f32 %v3466_v17 }
 0x1db   : > { %v1192_v56 = vmul.f32 %v4338_v55, %v904_v48  ;;  %3467 = vrsqrt.f32 %v680_v54  ;;  %vm774_vm5 = vmor %vm772_vm4, %vm773_vm3  ;;  %vm782_vm7 = vweird.f32 %v680_v54 }
 0x1dc   : > { %v765_v8 = vsel %vm764_vm2, %v3464_v23, %v761_v19  ;;  %v768_v27 = vmul.f32 %v3466_v17, %v767_v40  ;;  %v1174_v19 = vadd.f32 1.0, %v1167_v42 }
 0x1dd   : > { %v871_v9 = vmul.f32 %v765_v8, %v4054_v49  ;;  %v4346_v39 = vadd.f32 %v4341_v6, %v1192_v56 }
 0x1de   : > { %v769_v60 = vmul.f32 0.5, %v768_v27  ;;  %v1206_v27 = vrot.slane %v4296_v22, 2 }
 0x1df   : > { %5801 = vst [vmem:[#allocation4_spill] sm:$0xff] %v4346_v39  ;;  %v888_v15 = vmul.f32 %v4289_v14, %v871_v9  ;;  %1306 = vmatmul.f32.gmra.mxu0 %v4346_v39  ;;  %1363 = vmatmul.f32.gmra.mxu1 %v4346_v39 }
 0x1e0   : > { %v770_v62 = vsub.f32 1.5, %v769_v60  ;;  %1420 = vmatmul.f32.gmra.mxu2 %v4346_v39  ;;  %v682_v63 = vpop.f32.mrf.mxu2 }
 0x1e1   : > { %v3468_v10 = vpop.eup %3467  ;;  %v905_v1 = vadd.f32 %v4293_v21, %v888_v15  ;;  %v683_v2 = vadd.f32 1e-05, %v682_v63 }
 0x1e2   : > { %v771_v49 = vmul.f32 %v3466_v17, %v770_v62  ;;  %v777_v13 = vmul.f32 %v3468_v10, %v680_v54  ;;  %vm783_vm6 = vweird.f32 %v3468_v10 }
 0x1e3   : > { %v1193_v7 = vmul.f32 %v4338_v55, %v905_v1  ;;  %3469 = vrsqrt.f32 %v683_v2  ;;  %vm784_vm8 = vmor %vm782_vm7, %vm783_vm6  ;;  %vm792_vm10 = vweird.f32 %v683_v2  ;;  %v4377_v1 = vperm.slane %v1206_v27, 0 }
 0x1e4   : > { %v775_v5 = vsel %vm774_vm5, %v3466_v17, %v771_v49  ;;  %v778_v11 = vmul.f32 %v3468_v10, %v777_v13 }
 0x1e5   : > { %v872_v12 = vmul.f32 %v775_v5, %v4062_v24  ;;  %v4356_v43 = vadd.f32 %v4341_v6, %v1193_v7 }
 0x1e6   : > { %v779_v18 = vmul.f32 0.5, %v778_v11  ;;  %v1062_v11 = vld [vmem:[%s5772_s3 + $0x1f0] sm:$0xff] }
 0x1e7   : > { %5802 = vst [vmem:[#allocation5_spill] sm:$0xff] %v4356_v43  ;;  %1309 = vmatmul.f32.gmra.mxu0 %v4356_v43  ;;  %1365 = vmatmul.f32.gmra.mxu1 %v4356_v43  ;;  %v889_v47 = vmul.f32 %v4289_v14, %v872_v12 }
 0x1e8   : > { %v780_v20 = vsub.f32 1.5, %v779_v18  ;;  %1422 = vmatmul.f32.gmra.mxu2 %v4356_v43  ;;  %v685_v52 = vpop.f32.mrf.mxu2  ;;  %1117 = vmatpush.msra.mxu3 %v1062_v11 }
 0x1e9   : > { %v3470_v51 = vpop.eup %3469  ;;  %v686_v23 = vadd.f32 1e-05, %v685_v52  ;;  %v906_v25 = vadd.f32 %v4293_v21, %v889_v47  ;;  %v1058_v47 = vld [vmem:[%s5772_s3 + $0x1d0] sm:$0xff] }
 0x1ea   : > { %v781_v24 = vmul.f32 %v3468_v10, %v780_v20  ;;  %v787_v53 = vmul.f32 %v3470_v51, %v683_v2  ;;  %vm793_vm9 = vweird.f32 %v3470_v51  ;;  %1118 = vmatpush.msra.mxu3 %v1058_v47 }
 0x1eb   : > { %3471 = vrsqrt.f32 %v686_v23  ;;  %v1194_v26 = vmul.f32 %v4338_v55, %v906_v25  ;;  %vm794_vm11 = vmor %vm792_vm10, %vm793_vm9  ;;  %vm802_vm13 = vweird.f32 %v686_v23  ;;  %v1054_v25 = vld [vmem:[%s5772_s3 + $0x1b0] sm:$0xff] }
 0x1ec   : > { %v785_v28 = vsel %vm784_vm8, %v3468_v10, %v781_v24  ;;  %v788_v16 = vmul.f32 %v3470_v51, %v787_v53  ;;  %1119 = vmatpush.msra.mxu3 %v1054_v25 }
 0x1ed   : > { %v873_v4 = vmul.f32 %v785_v28, %v4070_v29  ;;  %v1222_v30 = vadd.f32 %v4341_v6, %v1194_v26  ;;  %v1050_v28 = vld [vmem:[%s5772_s3 + $0x190] sm:$0xff] }
 0x1ee   : > { %v789_v33 = vmul.f32 0.5, %v788_v16  ;;  %1120 = vmatpush.msra.mxu3 %v1050_v28 }
 0x1ef   : > { %1312 = vmatmul.f32.gmra.mxu0 %v1222_v30  ;;  %1367 = vmatmul.f32.gmra.mxu1 %v1222_v30  ;;  %v890_v57 = vmul.f32 %v4289_v14, %v873_v4 }
 0x1f0   : > { %v790_v31 = vsub.f32 1.5, %v789_v33  ;;  %1424 = vmatmul.f32.gmra.mxu2 %v1222_v30  ;;  %v688_v36 = vpop.f32.mrf.mxu2 }
 0x1f1   : > { %v3472_v61 = vpop.eup %3471  ;;  %v689_v3 = vadd.f32 1e-05, %v688_v36  ;;  %v907_v44 = vadd.f32 %v4293_v21, %v890_v57  ;;  %v1046_v57 = vld [vmem:[%s5772_s3 + $0x170] sm:$0xff] }
 0x1f2   : > { %v791_v50 = vmul.f32 %v3470_v51, %v790_v31  ;;  %v797_v29 = vmul.f32 %v3472_v61, %v686_v23  ;;  %vm803_vm12 = vweird.f32 %v3472_v61  ;;  %1121 = vmatpush.msra.mxu3 %v1046_v57  ;;  %v1063_v57 = vld [vmem:[%s5772_s3 + $0x1f8] sm:$0xff] }
 0x1f3   : > { %3473 = vrsqrt.f32 %v689_v3  ;;  %v1195_v17 = vmul.f32 %v4338_v55, %v907_v44  ;;  %v4374_v55 = vperm.slane %v1174_v19, 0  ;;  %vm804_vm14 = vmor %vm802_vm13, %vm803_vm12  ;;  %vm812_vm0 = vweird.f32 %v689_v3  ;;  %v1034_v19 = vld [vmem:[%s5772_s3 + $0x110] sm:$0xff] }
 0x1f4   : > { %v795_v48 = vsel %vm794_vm11, %v3470_v51, %v791_v50  ;;  %v798_v54 = vmul.f32 %v3472_v61, %v797_v29  ;;  %v1038_v29 = vld [vmem:[%s5772_s3 + $0x130] sm:$0xff] }
 0x1f5   : > { %v874_v40 = vmul.f32 %v795_v48, %v4078_v32  ;;  %v1223_v56 = vadd.f32 %v4341_v6, %v1195_v17 }
 0x1f6   : > { %v799_v8 = vmul.f32 0.5, %v798_v54 }
 0x1f7   : > { %v891_v9 = vmul.f32 %v4289_v14, %v874_v40  ;;  %1314 = vmatmul.f32.gmra.mxu0 %v1223_v56  ;;  %1370 = vmatmul.f32.gmra.mxu1 %v1223_v56 }
 0x1f8   : > { %v800_v60 = vsub.f32 1.5, %v799_v8  ;;  %1427 = vmatmul.f32.gmra.mxu2 %v1223_v56  ;;  %v691_v15 = vpop.f32.mrf.mxu2 }
 0x1f9   : > { %v3474_v62 = vpop.eup %3473  ;;  %v908_v63 = vadd.f32 %v4293_v21, %v891_v9  ;;  %v692_v10 = vadd.f32 1e-05, %v691_v15  ;;  %v1030_v9 = vld [vmem:[%s5772_s3 + $0xf0] sm:$0xff] }
 0x1fa   : > { %v801_v32 = vmul.f32 %v3472_v61, %v800_v60  ;;  %v807_v6 = vmul.f32 %v3474_v62, %v689_v3  ;;  %vm813_vm15 = vweird.f32 %v3474_v62  ;;  %v1026_v60 = vld [vmem:[%s5772_s3 + $0xd0] sm:$0xff] }
 0x1fb   : > { %v1196_v2 = vmul.f32 %v4374_v55, %v908_v63  ;;  %3475 = vrsqrt.f32 %v692_v10  ;;  %vm814_vm1 = vmor %vm812_vm0, %vm813_vm15  ;;  %vm822_vm3 = vweird.f32 %v692_v10 }
 0x1fc   : > { %v805_v49 = vsel %vm804_vm14, %v3472_v61, %v801_v32  ;;  %v808_v13 = vmul.f32 %v3474_v62, %v807_v6  ;;  %v1042_v61 = vld [vmem:[%s5772_s3 + $0x150] sm:$0xff]  ;;  %v1168_v6 = vrot.slane %v4286_v41, 3 }
 0x1fd   : > { %v875_v7 = vmul.f32 %v805_v49, %v4086_v35  ;;  %v4382_v5 = vadd.f32 %v4377_v1, %v1196_v2  ;;  %1122 = vmatpush.msra.mxu3 %v1042_v61  ;;  %v1014_v41 = vld [vmem:[%s5772_s3 + $0x70] sm:$0xff] }
 0x1fe   : > { %v809_v12 = vmul.f32 0.5, %v808_v13  ;;  %v1018_v13 = vld [vmem:[%s5772_s3 + $0x90] sm:$0xff] }
 0x1ff   : > { %5803 = vst [vmem:[#allocation6_spill] sm:$0xff] %v4382_v5  ;;  %v892_v18 = vmul.f32 %v4289_v14, %v875_v7  ;;  %1316 = vmatmul.f32.gmra.mxu0 %v4382_v5  ;;  %1373 = vmatmul.f32.gmra.mxu1 %v4382_v5 }
 0x200   : > { %v810_v35 = vsub.f32 1.5, %v809_v12  ;;  %1430 = vmatmul.f32.gmra.mxu2 %v4382_v5  ;;  %v694_v20 = vpop.f32.mrf.mxu2  ;;  %1123 = vmatpush.msra.mxu3 %v1038_v29  ;;  %v4489_v29 = vld [vmem:[#allocation1] sm:$0xff] }
 0x201   : > { %v3476_v52 = vpop.eup %3475  ;;  %v909_v51 = vadd.f32 %v4293_v21, %v892_v18  ;;  %v4395_v23 = vadd.f32 1e-05, %v694_v20 }
 0x202   : > { %v811_v24 = vmul.f32 %v3474_v62, %v810_v35  ;;  %v817_v53 = vmul.f32 %v3476_v52, %v692_v10  ;;  %vm823_vm2 = vweird.f32 %v3476_v52  ;;  %1124 = vmatpush.msra.mxu3 %v1034_v19  ;;  %v1022_v10 = vld [vmem:[%s5772_s3 + $0xb0] sm:$0xff]  ;;  %v1175_v35 = vadd.f32 1.0, %v1168_v6  ;;  %v1039_v6 = vld [vmem:[%s5772_s3 + $0x138] sm:$0xff] }
 0x203   : > { %v1197_v26 = vmul.f32 %v4374_v55, %v909_v51  ;;  %3477 = vrsqrt.f32 %v4395_v23  ;;  %vm824_vm4 = vmor %vm822_vm3, %vm823_vm2  ;;  %vm832_vm6 = vweird.f32 %v4395_v23  ;;  %v1010_v51 = vld [vmem:[%s5772_s3 + $0x50] sm:$0xff] }
 0x204   : > { %v815_v16 = vsel %vm814_vm1, %v3474_v62, %v811_v24  ;;  %v818_v4 = vmul.f32 %v3476_v52, %v817_v53  ;;  %1125 = vmatpush.msra.mxu3 %v1030_v9 }
 0x205   : > { %v876_v30 = vmul.f32 %v815_v16, %v4094_v38  ;;  %v4407_v33 = vadd.f32 %v4377_v1, %v1197_v26  ;;  %v4467_v26 = vperm.slane %v1175_v35, 0 }
 0x206   : > { %v819_v31 = vmul.f32 0.5, %v818_v4  ;;  %1126 = vmatpush.msra.mxu3 %v1026_v60 }
 0x207   : > { %5804 = vst [vmem:[#allocation7_spill] sm:$0xff] %v4407_v33  ;;  %1319 = vmatmul.f32.gmra.mxu0 %v4407_v33  ;;  %1375 = vmatmul.f32.gmra.mxu1 %v4407_v33  ;;  %v893_v36 = vmul.f32 %v4289_v14, %v876_v30 }
 0x208   : > { %v820_v38 = vsub.f32 1.5, %v819_v31  ;;  %1432 = vmatmul.f32.gmra.mxu2 %v4407_v33  ;;  %v697_v42 = vpop.f32.mrf.mxu2  ;;  %1127 = vmatpush.msra.mxu3 %v1022_v10  ;;  %v1043_v10 = vld [vmem:[%s5772_s3 + $0x158] sm:$0xff] }
 0x209   : > { %v3478_v3 = vpop.eup %3477  ;;  %v4419_v44 = vadd.f32 1e-05, %v697_v42  ;;  %v910_v50 = vadd.f32 %v4293_v21, %v893_v36 }
 0x20a   : > { %v821_v17 = vmul.f32 %v3476_v52, %v820_v38  ;;  %v827_v48 = vmul.f32 %v3478_v3, %v4395_v23  ;;  %vm833_vm5 = vweird.f32 %v3478_v3  ;;  %1128 = vmatpush.msra.mxu3 %v1018_v13 }
 0x20b   : > { %3479 = vrsqrt.f32 %v4419_v44  ;;  %v1198_v54 = vmul.f32 %v4374_v55, %v910_v50  ;;  %vm834_vm7 = vmor %vm832_vm6, %vm833_vm5  ;;  %vm842_vm9 = vweird.f32 %v4419_v44  ;;  %v1059_v50 = vld [vmem:[%s5772_s3 + $0x1d8] sm:$0xff] }
 0x20c   : > { %v825_v40 = vsel %vm824_vm4, %v3476_v52, %v821_v17  ;;  %v828_v56 = vmul.f32 %v3478_v3, %v827_v48  ;;  %1129 = vmatpush.msra.mxu3 %v1014_v41  ;;  %v1055_v48 = vld [vmem:[%s5772_s3 + $0x1b8] sm:$0xff] }
 0x20d   : > { %v877_v8 = vmul.f32 %v825_v40, %v4102_v46  ;;  %v1226_v27 = vadd.f32 %v4377_v1, %v1198_v54 }
 0x20e   : > { %v829_v15 = vmul.f32 0.5, %v828_v56  ;;  %1130 = vmatpush.msra.mxu3 %v1010_v51 }
 0x20f   : > { %1322 = vmatmul.f32.gmra.mxu0 %v1226_v27  ;;  %1377 = vmatmul.f32.gmra.mxu1 %v1226_v27  ;;  %v894_v62 = vmul.f32 %v4289_v14, %v877_v8  ;;  %v1051_v8 = vld [vmem:[%s5772_s3 + $0x198] sm:$0xff] }
 0x210   : > { %v830_v63 = vsub.f32 1.5, %v829_v15  ;;  %1434 = vmatmul.f32.gmra.mxu2 %v1226_v27  ;;  %v700_v46 = vpop.f32.mrf.mxu2  ;;  %v1047_v15 = vld [vmem:[%s5772_s3 + $0x178] sm:$0xff] }
 0x211   : > { %v3480_v32 = vpop.eup %3479  ;;  %v4444_v2 = vadd.f32 1e-05, %v700_v46  ;;  %v911_v49 = vadd.f32 %v4293_v21, %v894_v62 }
 0x212   : > { %v831_v7 = vmul.f32 %v3478_v3, %v830_v63  ;;  %v837_v11 = vmul.f32 %v3480_v32, %v4419_v44  ;;  %vm843_vm8 = vweird.f32 %v3480_v32 }
 0x213   : > { %3481 = vrsqrt.f32 %v4444_v2  ;;  %v1199_v12 = vmul.f32 %v4374_v55, %v911_v49  ;;  %v1207_v55 = vrot.slane %v4296_v22, 3  ;;  %v1002_v22 = vld [vmem:[%s5772_s3 + $0x10] sm:$0xff]  ;;  %vm844_vm10 = vmor %vm842_vm9, %vm843_vm8  ;;  %vm852_vm12 = vweird.f32 %v4444_v2  ;;  %v1035_v49 = vld [vmem:[%s5772_s3 + $0x118] sm:$0xff] }
 0x214   : > { %v835_v18 = vsel %vm834_vm7, %v3478_v3, %v831_v7  ;;  %v838_v47 = vmul.f32 %v3480_v32, %v837_v11  ;;  %v1031_v11 = vld [vmem:[%s5772_s3 + $0xf8] sm:$0xff]  ;;  %vm1563_vm9 = vcmask 130048  }
 0x215   : > { %v878_v20 = vmul.f32 %v835_v18, %v4113_v34  ;;  %v1227_v52 = vadd.f32 %v4377_v1, %v1199_v12  ;;  %v1006_v34 = vld [vmem:[%s5772_s3 + $0x30] sm:$0xff]  ;;  %v4478_v31 = vperm.slane %v1207_v55, 0  ;;  %v1011_v55 = vld [vmem:[%s5772_s3 + $0x58] sm:$0xff] }
 0x216   : > { %v839_v23 = vmul.f32 0.5, %v838_v47  ;;  %1131 = vmatpush.msra.mxu3 %v1006_v34  ;;  %v1027_v47 = vld [vmem:[%s5772_s3 + $0xd8] sm:$0xff] }
 0x217   : > { %v895_v25 = vmul.f32 %v4289_v14, %v878_v20  ;;  %1324 = vmatmul.f32.gmra.mxu0 %v1227_v52  ;;  %1380 = vmatmul.f32.gmra.mxu1 %v1227_v52  ;;  %v1023_v20 = vld [vmem:[%s5772_s3 + $0xb8] sm:$0xff] }
 0x218   : > { %v840_v24 = vsub.f32 1.5, %v839_v23  ;;  %1437 = vmatmul.f32.gmra.mxu2 %v1227_v52  ;;  %v703_v53 = vpop.f32.mrf.mxu2  ;;  %1132 = vmatpush.msra.mxu3 %v1002_v22  ;;  %v1015_v23 = vld [vmem:[%s5772_s3 + $0x78] sm:$0xff] }
 0x219   : > { %v3482_v1 = vpop.eup %3481  ;;  %v912_v28 = vadd.f32 %v4293_v21, %v895_v25  ;;  %v704_v16 = vadd.f32 1e-05, %v703_v53  ;;  %1133 = vmatmul.f32.vlgmr.msra.gmra.mxu3 %v4489_v29  ;;  %v1003_v25 = vld [vmem:[%s5772_s3 + $0x18] sm:$0xff] }
 0x21a   : > { %v841_v4 = vmul.f32 %v3480_v32, %v840_v24  ;;  %v847_v30 = vmul.f32 %v3482_v1, %v4444_v2  ;;  %1137 = vmatpush.msrb.mxu3 %v1063_v57  ;;  %vm853_vm11 = vweird.f32 %v3482_v1 }
 0x21b   : > { %v1200_v36 = vmul.f32 %v4467_v26, %v912_v28  ;;  %3483 = vrsqrt.f32 %v704_v16  ;;  %vm854_vm13 = vmor %vm852_vm12, %vm853_vm11  ;;  %vm862_vm15 = vweird.f32 %v704_v16 }
 0x21c   : > { %v845_v61 = vsel %vm844_vm10, %v3480_v32, %v841_v4  ;;  %v848_v38 = vmul.f32 %v3482_v1, %v847_v30  ;;  %1138 = vmatpush.msrb.mxu3 %v1059_v50 }
 0x21d   : > { %v879_v42 = vmul.f32 %v845_v61, %v4121_v58  ;;  %v4484_v3 = vadd.f32 %v4478_v31, %v1200_v36 }
 0x21e   : > { %v849_v44 = vmul.f32 0.5, %v848_v38  ;;  %1139 = vmatpush.msrb.mxu3 %v1055_v48 }
 0x21f   : > { %5805 = vst [vmem:[#allocation8_spill] sm:$0xff] %v4484_v3  ;;  %v896_v17 = vmul.f32 %v4289_v14, %v879_v42  ;;  %1326 = vmatmul.f32.gmra.mxu0 %v4484_v3  ;;  %1383 = vmatmul.f32.gmra.mxu1 %v4484_v3 }
 0x220   : > { %v850_v58 = vsub.f32 1.5, %v849_v44  ;;  %1440 = vmatmul.f32.gmra.mxu2 %v4484_v3  ;;  %1140 = vmatpush.msrb.mxu3 %v1051_v8  ;;  %v393_v3 = vld [vmem:[%s5774_s5 + $0x120] sm:$0xff] }
 0x221   : > { %v3484_v54 = vpop.eup %3483  ;;  %v913_v19 = vadd.f32 %v4293_v21, %v896_v17 }
 0x222   : > { %v851_v40 = vmul.f32 %v3482_v1, %v850_v58  ;;  %v857_v56 = vmul.f32 %v3484_v54, %v704_v16  ;;  %1141 = vmatpush.msrb.mxu3 %v1047_v15  ;;  %vm863_vm14 = vweird.f32 %v3484_v54 }
 0x223   : > { %v1201_v27 = vmul.f32 %v4467_v26, %v913_v19  ;;  %vm864_vm0 = vmor %vm862_vm15, %vm863_vm14 }
 0x224   : > { %v855_v9 = vsel %vm854_vm13, %v3482_v1, %v851_v40  ;;  %v858_v60 = vmul.f32 %v3484_v54, %v857_v56  ;;  %1142 = vmatpush.msrb.mxu3 %v1043_v10 }
 0x225   : > { %v880_v62 = vmul.f32 %v855_v9, %v4144_v0  ;;  %v4510_v63 = vadd.f32 %v4478_v31, %v1201_v27 }
 0x226   : > { %v859_v46 = vmul.f32 0.5, %v858_v60  ;;  %1143 = vmatpush.msrb.mxu3 %v1039_v6 }
 0x227   : > { %5806 = vst [vmem:[#allocation9_spill] sm:$0xff] %v4510_v63  ;;  %1329 = vmatmul.f32.gmra.mxu0 %v4510_v63  ;;  %1385 = vmatmul.f32.gmra.mxu1 %v4510_v63  ;;  %v897_v32 = vmul.f32 %v4289_v14, %v880_v62 }
 0x228   : > { %v860_v0 = vsub.f32 1.5, %v859_v46  ;;  %1442 = vmatmul.f32.gmra.mxu2 %v4510_v63  ;;  %1144 = vmatpush.msrb.mxu3 %v1035_v49 }
 0x229   : > { %v914_v2 = vadd.f32 %v4293_v21, %v897_v32 }
 0x22a   : > { %v861_v13 = vmul.f32 %v3484_v54, %v860_v0  ;;  %1145 = vmatpush.msrb.mxu3 %v1031_v11 }
 0x22b   : > { %v1202_v7 = vmul.f32 %v4467_v26, %v914_v2 }
 0x22c   : > { %v865_v12 = vsel %vm864_vm0, %v3484_v54, %v861_v13  ;;  %1146 = vmatpush.msrb.mxu3 %v1027_v47 }
 0x22d   : > { %v881_v41 = vmul.f32 %v865_v12, %v4185_v45  ;;  %v1230_v18 = vadd.f32 %v4478_v31, %v1202_v7  ;;  %v1019_v45 = vld [vmem:[%s5772_s3 + $0x98] sm:$0xff] }
 0x22e   : > { %1147 = vmatpush.msrb.mxu3 %v1023_v20 }
 0x22f   : > { %1332 = vmatmul.f32.gmra.mxu0 %v1230_v18  ;;  %1387 = vmatmul.f32.gmra.mxu1 %v1230_v18  ;;  %v898_v35 = vmul.f32 %v4289_v14, %v881_v41 }
 0x230   : > { %1444 = vmatmul.f32.gmra.mxu2 %v1230_v18  ;;  %1148 = vmatpush.msrb.mxu3 %v1019_v45 }
 0x231   : > { %v915_v52 = vadd.f32 %v4293_v21, %v898_v35  ;;  %v1007_v21 = vld [vmem:[%s5772_s3 + $0x38] sm:$0xff] }
 0x232   : > { %1149 = vmatpush.msrb.mxu3 %v1015_v23 }
 0x233   : > { %v1203_v51 = vmul.f32 %v4467_v26, %v915_v52 }
 0x234   : > { %1150 = vmatpush.msrb.mxu3 %v1011_v55 }
 0x235   : > { %v1231_v14 = vadd.f32 %v4478_v31, %v1203_v51 }
 0x236   : > { %1151 = vmatpush.msrb.mxu3 %v1007_v21 }
 0x237   : > { %1334 = vmatmul.f32.gmra.mxu0 %v1231_v14  ;;  %1390 = vmatmul.f32.gmra.mxu1 %v1231_v14 }
 0x238   : > { %1447 = vmatmul.f32.gmra.mxu2 %v1231_v14  ;;  %1152 = vmatpush.msrb.mxu3 %v1003_v25 }
 0x239   : > { %1153 = vmatmul.f32.vlgmr.msrb.gmra.mxu3 %v4489_v29 }
 0x23c   : > { %v4557_v24 = vpop.f32.mrf.mxu0  ;;  %v1354_v53 = vpop.f32.mrf.mxu1 }
 0x23d   : > { %vm1451_vm10 = vcmp.gt.f32.partialorder %v4557_v24, 0.0 }
 0x23f   : > { %1410 = vmatmul.f32.vlgmr.msra.gmra.mxu0 %v4310_v37 }
 0x244   : > { %v4561_v34 = vpop.f32.mrf.mxu0  ;;  %v1356_v1 = vpop.f32.mrf.mxu1 }
 0x245   : > { %vm1452_vm11 = vcmp.gt.f32.partialorder %v4561_v34, 0.0 }
 0x24b   : > { %v1413_v26 = vpop.f32.mrf.mxu2 }
 0x24c   : > { %v1303_v28 = vpop.f32.mrf.mxu0  ;;  %v1358_v16 = vpop.f32.mrf.mxu1 }
 0x24d   : > { %v1507_v22 = vmul.f32 1.442695, %v1358_v16  ;;  %v1499_v31 = vadd.f32 1.0, %v1358_v16  ;;  %vm1491_vm1 = vcmp.gt.f32.partialorder %v1358_v16, 0.0 }
 0x24f   : > { %3485 = vpow2.f32 %v1507_v22 }
 0x253   : > { %v1415_v4 = vpop.f32.mrf.mxu2 }
 0x254   : > { %v1305_v30 = vpop.f32.mrf.mxu0  ;;  %v1361_v57 = vpop.f32.mrf.mxu1 }
 0x255   : > { %v3486_v36 = vpop.eup %3485  ;;  %v1509_v61 = vmul.f32 1.442695, %v1361_v57  ;;  %v1500_v29 = vadd.f32 1.0, %v1361_v57  ;;  %vm1492_vm2 = vcmp.gt.f32.partialorder %v1361_v57, 0.0 }
 0x256   : > { %v1523_v38 = vsel %vm1491_vm1, %v1499_v31, %v3486_v36 }
 0x257   : > { %3487 = vpow2.f32 %v1509_v61  ;;  %1531 = vxpose.xlu0.b32.start [1/2] (short) %v1523_v38, 128 }
 0x25b   : > { %v1418_v42 = vpop.f32.mrf.mxu2 }
 0x25c   : > { %1626 = vmatpush.msra.mxu3 %v1418_v42  ;;  %v4563_v44 = vpop.f32.mrf.mxu0  ;;  %v1364_v50 = vpop.f32.mrf.mxu1 }
 0x25d   : > { %v3488_v17 = vpop.eup %3487  ;;  %vm1453_vm12 = vcmp.gt.f32.partialorder %v4563_v44, 0.0 }
 0x25e   : > { %1627 = vmatpush.msra.mxu3 %v1415_v4  ;;  %v1524_v58 = vsel %vm1492_vm2, %v1500_v29, %v3488_v17 }
 0x25f   : > { %1532 = vxpose.xlu0.b32.end [2/2] (short) %v1524_v58, 128  ;;  %v4565_v48 = vadd.f32 %v1524_v58, %v1523_v38 }
 0x263   : > { %v1421_v54 = vpop.f32.mrf.mxu2 }
 0x264   : > { %v4567_v19 = vpop.f32.mrf.mxu0  ;;  %v1366_v40 = vpop.f32.mrf.mxu1 }
 0x265   : > { %vm1454_vm13 = vcmp.gt.f32.partialorder %v4567_v19, 0.0 }
 0x26b   : > { %v1423_v56 = vpop.f32.mrf.mxu2 }
 0x26c   : > { %v1313_v8 = vpop.f32.mrf.mxu0  ;;  %v1368_v27 = vpop.f32.mrf.mxu1 }
 0x26d   : > { %v1511_v9 = vmul.f32 1.442695, %v1368_v27  ;;  %v1501_v46 = vadd.f32 1.0, %v1368_v27  ;;  %vm1493_vm3 = vcmp.gt.f32.partialorder %v1368_v27, 0.0 }
 0x26f   : > { %3489 = vpow2.f32 %v1511_v9 }
 0x273   : > { %v1425_v60 = vpop.f32.mrf.mxu2 }
 0x274   : > { %v1315_v15 = vpop.f32.mrf.mxu0  ;;  %v1371_v62 = vpop.f32.mrf.mxu1 }
 0x275   : > { %v3490_v10 = vpop.eup %3489  ;;  %v1513_v32 = vmul.f32 1.442695, %v1371_v62  ;;  %v1502_v13 = vadd.f32 1.0, %v1371_v62  ;;  %vm1494_vm4 = vcmp.gt.f32.partialorder %v1371_v62, 0.0 }
 0x276   : > { %v1525_v6 = vsel %vm1493_vm3, %v1501_v46, %v3490_v10  ;;  %v3566_v10 = vld [vmem:[%s5774_s5 + $0x178] sm:$0xff] }
 0x277   : > { %3491 = vpow2.f32 %v1513_v32  ;;  %1677 = vxpose.xlu1.b32.start [1/2] (short) %v1525_v6, 128  ;;  %v3567_v32 = vld [vmem:[%s5774_s5 + $0x160] sm:$0xff] }
 0x27b   : > { %v1428_v0 = vpop.f32.mrf.mxu2 }
 0x27c   : > { %1771 = vmatpush.msrb.mxu3 %v1428_v0  ;;  %v4569_v2 = vpop.f32.mrf.mxu0  ;;  %v1374_v49 = vpop.f32.mrf.mxu1  ;;  %v3569_v0 = vld [vmem:[%s5774_s5 + $0x130] sm:$0xff] }
 0x27d   : > { %v3492_v7 = vpop.eup %3491  ;;  %v3570_v49 = vld [vmem:[%s5774_s5 + $0x118] sm:$0xff]  ;;  %vm1455_vm14 = vcmp.gt.f32.partialorder %v4569_v2, 0.0 }
 0x27e   : > { %1772 = vmatpush.msrb.mxu3 %v1425_v60  ;;  %v1526_v11 = vsel %vm1494_vm4, %v1502_v13, %v3492_v7  ;;  %v3571_v13 = vld [vmem:[%s5774_s5 + $0x100] sm:$0xff]  ;;  %v3572_v7 = vld [vmem:[%s5774_s5 + $0xe8] sm:$0xff] }
 0x27f   : > { %1678 = vxpose.xlu1.b32.end [2/2] (short) %v1526_v11, 128  ;;  %v4571_v12 = vadd.f32 %v1526_v11, %v1525_v6  ;;  %v3568_v6 = vld [vmem:[%s5774_s5 + $0x148] sm:$0xff]  ;;  %v3573_v11 = vld [vmem:[%s5774_s5 + $0xd0] sm:$0xff] }
 0x283   : > { %v1431_v41 = vpop.f32.mrf.mxu2 }
 0x284   : > { %v4573_v18 = vpop.f32.mrf.mxu0  ;;  %v1376_v47 = vpop.f32.mrf.mxu1  ;;  %v3574_v41 = vld [vmem:[%s5774_s5 + $0xb8] sm:$0xff] }
 0x285   : > { %v3575_v47 = vld [vmem:[%s5774_s5 + $0xa0] sm:$0xff]  ;;  %vm1456_vm15 = vcmp.gt.f32.partialorder %v4573_v18, 0.0 }
 0x28b   : > { %v1433_v35 = vpop.f32.mrf.mxu2 }
 0x28c   : > { %v1323_v20 = vpop.f32.mrf.mxu0  ;;  %v1378_v52 = vpop.f32.mrf.mxu1  ;;  %v3576_v35 = vld [vmem:[%s5774_s5 + $0x88] sm:$0xff] }
 0x28d   : > { %v1515_v45 = vmul.f32 1.442695, %v1378_v52  ;;  %v1503_v55 = vadd.f32 1.0, %v1378_v52  ;;  %vm1495_vm5 = vcmp.gt.f32.partialorder %v1378_v52, 0.0  ;;  %v3577_v20 = vld [vmem:[%s5774_s5 + $0x70] sm:$0xff]  ;;  %v3578_v52 = vld [vmem:[%s5774_s5 + $0x58] sm:$0xff] }
 0x28f   : > { %3493 = vpow2.f32 %v1515_v45  ;;  %v3579_v45 = vld [vmem:[%s5774_s5 + $0x40] sm:$0xff] }
 0x293   : > { %v1435_v51 = vpop.f32.mrf.mxu2 }
 0x294   : > { %v1325_v23 = vpop.f32.mrf.mxu0  ;;  %v1381_v14 = vpop.f32.mrf.mxu1 }
 0x295   : > { %v3494_v21 = vpop.eup %3493  ;;  %v1517_v25 = vmul.f32 1.442695, %v1381_v14  ;;  %v1504_v16 = vadd.f32 1.0, %v1381_v14  ;;  %vm1496_vm6 = vcmp.gt.f32.partialorder %v1381_v14, 0.0  ;;  %v3581_v23 = vld [vmem:[%s5774_s5 + $0x10] sm:$0xff] }
 0x296   : > { %v1527_v53 = vsel %vm1495_vm5, %v1503_v55, %v3494_v21 }
 0x297   : > { %3495 = vpow2.f32 %v1517_v25  ;;  %1822 = vxpose.xlu2.b32.start [1/2] (short) %v1527_v53, 128 }
 0x29b   : > { %v1438_v1 = vpop.f32.mrf.mxu2 }
 0x29c   : > { %1916 = vmatpush.msrb.mxu0 %v1438_v1  ;;  %v4575_v26 = vpop.f32.mrf.mxu0  ;;  %v1384_v28 = vpop.f32.mrf.mxu1 }
 0x29d   : > { %v3496_v22 = vpop.eup %3495  ;;  %vm1457_vm0 = vcmp.gt.f32.partialorder %v4575_v26, 0.0 }
 0x29e   : > { %1917 = vmatpush.msrb.mxu0 %v1435_v51  ;;  %v1528_v4 = vsel %vm1496_vm6, %v1504_v16, %v3496_v22  ;;  %v3580_v51 = vld [vmem:[%s5774_s5 + $0x28] sm:$0xff] }
 0x29f   : > { %1823 = vxpose.xlu2.b32.end [2/2] (short) %v1528_v4, 128  ;;  %v4577_v30 = vadd.f32 %v1528_v4, %v1527_v53 }
 0x2a3   : > { %v1441_v57 = vpop.f32.mrf.mxu2 }
 0x2a4   : > { %v4579_v31 = vpop.f32.mrf.mxu0  ;;  %v1386_v36 = vpop.f32.mrf.mxu1 }
 0x2a5   : > { %vm1458_vm1 = vcmp.gt.f32.partialorder %v4579_v31, 0.0 }
 0x2ab   : > { %v1443_v61 = vpop.f32.mrf.mxu2 }
 0x2ac   : > { %v1333_v38 = vpop.f32.mrf.mxu0  ;;  %v1388_v42 = vpop.f32.mrf.mxu1 }
 0x2ad   : > { %v1519_v50 = vmul.f32 1.442695, %v1388_v42  ;;  %v1505_v9 = vadd.f32 1.0, %v1388_v42  ;;  %vm1497_vm7 = vcmp.gt.f32.partialorder %v1388_v42, 0.0 }
 0x2af   : > { %3497 = vpow2.f32 %v1519_v50 }
 0x2b3   : > { %v1445_v29 = vpop.f32.mrf.mxu2 }
 0x2b4   : > { %v1335_v17 = vpop.f32.mrf.mxu0  ;;  %v1391_v58 = vpop.f32.mrf.mxu1 }
 0x2b5   : > { %v1521_v54 = vmul.f32 1.442695, %v1391_v58  ;;  %v3498_v40 = vpop.eup %3497  ;;  %v1506_v8 = vadd.f32 1.0, %v1391_v58  ;;  %vm1498_vm8 = vcmp.gt.f32.partialorder %v1391_v58, 0.0  ;;  %v4645_v17 = vpop.f32.mrf.mxu3 }
 0x2b6   : > { %v1529_v15 = vsel %vm1497_vm7, %v1505_v9, %v3498_v40  ;;  %5807 = vst [vmem:[#allocation10_spill] sm:$0xff] %v4645_v17 }
 0x2b7   : > { %3499 = vpow2.f32 %v1521_v54 }
 0x2bb   : > { %v1448_v56 = vpop.f32.mrf.mxu2 }
 0x2bc   : > { %2061 = vmatpush.msra.mxu1 %v1448_v56  ;;  %v1411_v27 = vpop.f32.mrf.mxu0 }
 0x2bd   : > { %v3500_v60 = vpop.eup %3499  ;;  %v4649_v40 = vpop.f32.mrf.mxu3 }
 0x2be   : > { %2062 = vmatpush.msra.mxu1 %v1445_v29  ;;  %v1530_v62 = vsel %vm1498_vm8, %v1506_v8, %v3500_v60  ;;  %5808 = vst [vmem:[#allocation11_spill] sm:$0xff] %v4649_v40 }
 0x2bf   : > { %v4581_v46 = vadd.f32 %v1530_v62, %v1529_v15 }
 0x2c0   : > { %2402 = vmatpush.msrb.mxu1 %v3566_v10 }
 0x2c2   : > { %2403 = vmatpush.msrb.mxu1 %v3567_v32 }
 0x2c4   : > { %2404 = vmatpush.msrb.mxu1 %v3568_v6 }
 0x2c6   : > { %2405 = vmatpush.msrb.mxu1 %v3569_v0 }
 0x2c8   : > { %2406 = vmatpush.msrb.mxu1 %v3570_v49 }
 0x2ca   : > { %2407 = vmatpush.msrb.mxu1 %v3571_v13 }
 0x2cc   : > { %2408 = vmatpush.msrb.mxu1 %v3572_v7 }
 0x2ce   : > { %2409 = vmatpush.msrb.mxu1 %v3573_v11 }
 0x2d0   : > { %2410 = vmatpush.msrb.mxu1 %v3574_v41 }
 0x2d2   : > { %2411 = vmatpush.msrb.mxu1 %v3575_v47 }
 0x2d4   : > { %2412 = vmatpush.msrb.mxu1 %v3576_v35 }
 0x2d6   : > { %2413 = vmatpush.msrb.mxu1 %v3577_v20 }
 0x2d7   : > { %1967 = vxpose.xlu0.b32.start [1/2] (short) %v1529_v15, 128 }
 0x2d8   : > { %2414 = vmatpush.msrb.mxu1 %v3578_v52 }
 0x2da   : > { %2415 = vmatpush.msrb.mxu1 %v3579_v45 }
 0x2dc   : > { %2416 = vmatpush.msrb.mxu1 %v3580_v51 }
 0x2de   : > { %2417 = vmatpush.msrb.mxu1 %v3581_v23 }
 0x2df   : > { %1968 = vxpose.xlu0.b32.end [2/2] (short) %v1530_v62, 128 }
 0x2fb   : > { %v1547_v14 = vpop.trf.xlu0 }
 0x2fc   : > { %3330 = vmatmul.msk.f32.vlgmr.msra.gmra.mxu3 %vm1563_vm9, %v1547_v14 }
 0x303   : > { %v1548_v55 = vpop.trf.xlu0 }
 0x304   : > { %3331 = vmatmul.msk.f32.gmra.mxu3 %vm1563_vm9, %v1548_v55 }
 0x30b   : > { %v1549_v21 = vpop.trf.xlu0 }
 0x30c   : > { %3332 = vmatmul.msk.f32.gmra.mxu3 %vm1563_vm9, %v1549_v21 }
 0x313   : > { %v1550_v25 = vpop.trf.xlu0 }
 0x314   : > { %3333 = vmatmul.msk.f32.gmra.mxu3 %vm1563_vm9, %v1550_v25 }
 0x31b   : > { %v1551_v53 = vpop.trf.xlu0  ;;  %v1693_v38 = vpop.trf.xlu1 }
 0x31c   : > { %3334 = vmatmul.msk.f32.gmra.mxu3 %vm1563_vm9, %v1551_v53  ;;  %v4691_v53 = vld [vmem:[%s5774_s5 + $0x170] sm:$0xff] }
 0x31d   : > { %2304 = vmatpush.msra.mxu3 %v4691_v53 }
 0x323   : > { %v1552_v1 = vpop.trf.xlu0  ;;  %v1694_v50 = vpop.trf.xlu1 }
 0x324   : > { %3335 = vmatmul.msk.f32.gmra.mxu3 %vm1563_vm9, %v1552_v1 }
 0x32b   : > { %v1553_v28 = vpop.trf.xlu0  ;;  %v1695_v58 = vpop.trf.xlu1 }
 0x32c   : > { %3336 = vmatmul.msk.f32.gmra.mxu3 %vm1563_vm9, %v1553_v28 }
 0x330   : > { %v1838_v27 = vpop.trf.xlu2 }
 0x331   : > { %3362 = vmatmul.msk.f32.vlgmr.msrb.gmra.mxu0 %vm1563_vm9, %v1838_v27  ;;  %v4749_v27 = vld [vmem:[%s5774_s5 + $0xb0] sm:$0xff] }
 0x333   : > { %v1554_v16 = vpop.trf.xlu0  ;;  %v1696_v56 = vpop.trf.xlu1 }
 0x334   : > { %3337 = vmatmul.msk.f32.gmra.mxu3 %vm1563_vm9, %v1554_v16  ;;  %v4699_v16 = vld [vmem:[%s5774_s5 + $0x158] sm:$0xff] }
 0x335   : > { %2305 = vmatpush.msra.mxu3 %v4699_v16 }
 0x338   : > { %v1839_v15 = vpop.trf.xlu2 }
 0x339   : > { %3363 = vmatmul.msk.f32.gmra.mxu0 %vm1563_vm9, %v1839_v15  ;;  %v4757_v15 = vld [vmem:[%s5774_s5 + $0x98] sm:$0xff] }
 0x33b   : > { %v1555_v22 = vpop.trf.xlu0  ;;  %v1697_v9 = vpop.trf.xlu1 }
 0x33c   : > { %3338 = vmatmul.msk.f32.gmra.mxu3 %vm1563_vm9, %v1555_v22 }
 0x340   : > { %v1840_v32 = vpop.trf.xlu2 }
 0x341   : > { %3364 = vmatmul.msk.f32.gmra.mxu0 %vm1563_vm9, %v1840_v32 }
 0x343   : > { %v1556_v4 = vpop.trf.xlu0  ;;  %v1698_v62 = vpop.trf.xlu1 }
 0x344   : > { %3339 = vmatmul.msk.f32.gmra.mxu3 %vm1563_vm9, %v1556_v4 }
 0x348   : > { %v1841_v49 = vpop.trf.xlu2 }
 0x349   : > { %3365 = vmatmul.msk.f32.gmra.mxu0 %vm1563_vm9, %v1841_v49 }
 0x34b   : > { %v1557_v57 = vpop.trf.xlu0  ;;  %v1699_v0 = vpop.trf.xlu1 }
 0x34c   : > { %3340 = vmatmul.msk.f32.gmra.mxu3 %vm1563_vm9, %v1557_v57  ;;  %v4705_v57 = vld [vmem:[%s5774_s5 + $0x140] sm:$0xff] }
 0x34d   : > { %2306 = vmatpush.msra.mxu3 %v4705_v57 }
 0x350   : > { %v1842_v11 = vpop.trf.xlu2 }
 0x351   : > { %3366 = vmatmul.msk.f32.gmra.mxu0 %vm1563_vm9, %v1842_v11  ;;  %v4778_v11 = vld [vmem:[%s5774_s5 + $0x50] sm:$0xff] }
 0x353   : > { %v1558_v36 = vpop.trf.xlu0  ;;  %v1700_v41 = vpop.trf.xlu1 }
 0x354   : > { %3341 = vmatmul.msk.f32.gmra.mxu3 %vm1563_vm9, %v1558_v36  ;;  %v4714_v36 = vld [vmem:[%s5774_s5 + $0x128] sm:$0xff] }
 0x355   : > { %2307 = vmatpush.msra.mxu3 %v4714_v36 }
 0x358   : > { %v1843_v20 = vpop.trf.xlu2 }
 0x359   : > { %3367 = vmatmul.msk.f32.gmra.mxu0 %vm1563_vm9, %v1843_v20 }
 0x35b   : > { %v1559_v61 = vpop.trf.xlu0  ;;  %v1701_v52 = vpop.trf.xlu1 }
 0x35c   : > { %3342 = vmatmul.msk.f32.gmra.mxu3 %vm1563_vm9, %v1559_v61  ;;  %v4720_v61 = vld [vmem:[%s5774_s5 + $0x110] sm:$0xff] }
 0x35d   : > { %2308 = vmatpush.msra.mxu3 %v4720_v61 }
 0x360   : > { %v1844_v23 = vpop.trf.xlu2 }
 0x361   : > { %3368 = vmatmul.msk.f32.gmra.mxu0 %vm1563_vm9, %v1844_v23  ;;  %v4800_v23 = vld [vmem:[%s5774_s5 + $0x8] sm:$0xff] }
 0x363   : > { %v1560_v42 = vpop.trf.xlu0  ;;  %v1702_v14 = vpop.trf.xlu1 }
 0x364   : > { %3343 = vmatmul.msk.f32.gmra.mxu3 %vm1563_vm9, %v1560_v42  ;;  %v4728_v42 = vld [vmem:[%s5774_s5 + $0xf8] sm:$0xff] }
 0x365   : > { %2309 = vmatpush.msra.mxu3 %v4728_v42 }
 0x368   : > { %v1845_v25 = vpop.trf.xlu2 }
 0x369   : > { %3369 = vmatmul.msk.f32.gmra.mxu0 %vm1563_vm9, %v1845_v25 }
 0x36b   : > { %v1561_v29 = vpop.trf.xlu0  ;;  %v1703_v28 = vpop.trf.xlu1 }
 0x36c   : > { %3344 = vmatmul.msk.f32.gmra.mxu3 %vm1563_vm9, %v1561_v29 }
 0x370   : > { %v1846_v4 = vpop.trf.xlu2 }
 0x371   : > { %3370 = vmatmul.msk.f32.gmra.mxu0 %vm1563_vm9, %v1846_v4 }
 0x373   : > { %v1562_v54 = vpop.trf.xlu0 }
 0x374   : > { %3345 = vmatmul.msk.f32.gmra.mxu3 %vm1563_vm9, %v1562_v54  ;;  %v4735_v54 = vld [vmem:[%s5774_s5 + $0xe0] sm:$0xff] }
 0x375   : > { %2310 = vmatpush.msra.mxu3 %v4735_v54 }
 0x378   : > { %v1847_v29 = vpop.trf.xlu2 }
 0x379   : > { %3371 = vmatmul.msk.f32.gmra.mxu0 %vm1563_vm9, %v1847_v29 }
 0x37b   : > { %v1983_v7 = vpop.trf.xlu0 }
 0x37c   : > { %3346 = vmatmul.msk.f32.vlgmr.msrb.gmra.mxu3 %vm1563_vm9, %v1693_v38  ;;  %3378 = vmatmul.msk.f32.vlgmr.msra.gmra.mxu1 %vm1563_vm9, %v1983_v7  ;;  %v4771_v7 = vld [vmem:[%s5774_s5 + $0x68] sm:$0xff] }
 0x37f   : > { %v4652_v8 = vpop.f32.mrf.mxu3 }
 0x380   : > { %v1848_v32 = vpop.trf.xlu2 }
 0x381   : > { %3372 = vmatmul.msk.f32.gmra.mxu0 %vm1563_vm9, %v1848_v32 }
 0x383   : > { %v1984_v35 = vpop.trf.xlu0 }
 0x384   : > { %3347 = vmatmul.msk.f32.gmra.mxu3 %vm1563_vm9, %v1694_v50  ;;  %3379 = vmatmul.msk.f32.gmra.mxu1 %vm1563_vm9, %v1984_v35  ;;  %v4786_v35 = vld [vmem:[%s5774_s5 + $0x38] sm:$0xff] }
 0x387   : > { %v4656_v60 = vpop.f32.mrf.mxu3 }
 0x38b   : > { %v1985_v51 = vpop.trf.xlu0 }
 0x38c   : > { %3348 = vmatmul.msk.f32.gmra.mxu3 %vm1563_vm9, %v1695_v58  ;;  %3380 = vmatmul.msk.f32.gmra.mxu1 %vm1563_vm9, %v1985_v51  ;;  %v1704_v58 = vpop.trf.xlu1  ;;  %v4793_v51 = vld [vmem:[%s5774_s5 + $0x20] sm:$0xff] }
 0x38f   : > { %v4660_v10 = vpop.f32.mrf.mxu3 }
 0x393   : > { %v1986_v21 = vpop.trf.xlu0 }
 0x394   : > { %3349 = vmatmul.msk.f32.gmra.mxu3 %vm1563_vm9, %v1696_v56  ;;  %3381 = vmatmul.msk.f32.gmra.mxu1 %vm1563_vm9, %v1986_v21  ;;  %v4742_v56 = vld [vmem:[%s5774_s5 + $0xc8] sm:$0xff]  ;;  %v1705_v49 = vpop.trf.xlu1 }
 0x395   : > { %2311 = vmatpush.msra.mxu3 %v4742_v56 }
 0x397   : > { %v4664_v6 = vpop.f32.mrf.mxu3  ;;  %2312 = vmatpush.msra.mxu3 %v4749_v27 }
 0x399   : > { %2313 = vmatpush.msra.mxu3 %v4757_v15 }
 0x39b   : > { %v1987_v22 = vpop.trf.xlu0 }
 0x39c   : > { %3350 = vmatmul.msk.f32.gmra.mxu3 %vm1563_vm9, %v1697_v9  ;;  %3382 = vmatmul.msk.f32.gmra.mxu1 %vm1563_vm9, %v1987_v22  ;;  %v2269_v22 = vrot.slane %v4565_v48, 4 }
 0x39e   : > { %v2270_v4 = vadd.f32 %v2269_v22, %v4565_v48  ;;  %v2276_v22 = vrot.slane %v4571_v12, 4 }
 0x39f   : > { %v4668_v13 = vpop.f32.mrf.mxu3 }
 0x3a0   : > { %v2271_v32 = vrot.slane %v2270_v4, 2 }
 0x3a3   : > { %v1988_v50 = vpop.trf.xlu0 }
 0x3a4   : > { %3351 = vmatmul.msk.f32.gmra.mxu3 %vm1563_vm9, %v1698_v62  ;;  %3383 = vmatmul.msk.f32.gmra.mxu1 %vm1563_vm9, %v1988_v50 }
 0x3a7   : > { %v4673_v47 = vpop.f32.mrf.mxu3 }
 0x3ab   : > { %v1989_v62 = vpop.trf.xlu0 }
 0x3ac   : > { %3352 = vmatmul.msk.f32.gmra.mxu3 %vm1563_vm9, %v1699_v0  ;;  %3384 = vmatmul.msk.f32.gmra.mxu1 %vm1563_vm9, %v1989_v62  ;;  %v4764_v0 = vld [vmem:[%s5774_s5 + $0x80] sm:$0xff] }
 0x3ad   : > { %2314 = vmatpush.msra.mxu3 %v4764_v0 }
 0x3af   : > { %v4678_v45 = vpop.f32.mrf.mxu3  ;;  %2315 = vmatpush.msra.mxu3 %v4771_v7 }
 0x3b1   : > { %2316 = vmatpush.msra.mxu3 %v4778_v11 }
 0x3b3   : > { %v1990_v20 = vpop.trf.xlu0  ;;  %2317 = vmatpush.msra.mxu3 %v4786_v35 }
 0x3b4   : > { %3353 = vmatmul.msk.f32.gmra.mxu3 %vm1563_vm9, %v1700_v41  ;;  %3385 = vmatmul.msk.f32.gmra.mxu1 %vm1563_vm9, %v1990_v20  ;;  %v2272_v20 = vadd.f32 %v2271_v32, %v2270_v4  ;;  %v2277_v4 = vadd.f32 %v2276_v22, %v4571_v12  ;;  %v1471_v12 = vmul.f32 1.442695, %v4563_v44 }
 0x3b5   : > { %2318 = vmatpush.msra.mxu3 %v4793_v51 }
 0x3b6   : > { %v2273_v48 = vrot.slane %v2272_v20, 1 }
 0x3b7   : > { %v4683_v55 = vpop.f32.mrf.mxu3  ;;  %2319 = vmatpush.msra.mxu3 %v4800_v23 }
 0x3b8   : > { %v2274_v40 = vadd.f32 %v2273_v48, %v2272_v20 }
 0x3bb   : > { %v1991_v25 = vpop.trf.xlu0 }
 0x3bc   : > { %3354 = vmatmul.msk.f32.gmra.mxu3 %vm1563_vm9, %v1701_v52  ;;  %v1849_v52 = vpop.trf.xlu2  ;;  %3386 = vmatmul.msk.f32.gmra.mxu1 %vm1563_vm9, %v1991_v25 }
 0x3bd   : > { %3373 = vmatmul.msk.f32.gmra.mxu0 %vm1563_vm9, %v1849_v52 }
 0x3bf   : > { %v4694_v1 = vpop.f32.mrf.mxu3 }
 0x3c4   : > { %3355 = vmatmul.msk.f32.gmra.mxu3 %vm1563_vm9, %v1702_v14  ;;  %v1706_v14 = vpop.trf.xlu1 }
 0x3c7   : > { %v4722_v38 = vpop.f32.mrf.mxu3 }
 0x3cc   : > { %3356 = vmatmul.msk.f32.gmra.mxu3 %vm1563_vm9, %v1703_v28  ;;  %v1850_v28 = vpop.trf.xlu2  ;;  %v1707_v29 = vpop.trf.xlu1 }
 0x3cd   : > { %3374 = vmatmul.msk.f32.gmra.mxu0 %vm1563_vm9, %v1850_v28 }
 0x3cf   : > { %v4751_v9 = vpop.f32.mrf.mxu3 }
 0x3d4   : > { %3357 = vmatmul.msk.f32.gmra.mxu3 %vm1563_vm9, %v1704_v58  ;;  %v1992_v58 = vpop.trf.xlu0  ;;  %v1851_v62 = vpop.trf.xlu2 }
 0x3d5   : > { %3387 = vmatmul.msk.f32.gmra.mxu1 %vm1563_vm9, %v1992_v58  ;;  %3375 = vmatmul.msk.f32.gmra.mxu0 %vm1563_vm9, %v1851_v62  ;;  %v1708_v28 = vpop.trf.xlu1  ;;  %v1469_v58 = vmul.f32 1.442695, %v4561_v34 }
 0x3d7   : > { %v4780_v41 = vpop.f32.mrf.mxu3 }
 0x3dc   : > { %3358 = vmatmul.msk.f32.gmra.mxu3 %vm1563_vm9, %v1705_v49  ;;  %v1467_v49 = vmul.f32 1.442695, %v4557_v24  ;;  %v1993_v25 = vpop.trf.xlu0 }
 0x3dd   : > { %3388 = vmatmul.msk.f32.gmra.mxu1 %vm1563_vm9, %v1993_v25 }
 0x3de   : > { %3501 = vpow2.f32 %v1467_v49 }
 0x3df   : > { %v1665_v21 = vpop.f32.mrf.mxu3  ;;  %3503 = vpow2.f32 %v1469_v58 }
 0x3e0   : > { %v2124_v58 = vmul.f32 %v1665_v21, %v4714_v36  ;;  %3505 = vpow2.f32 %v1471_v12 }
 0x3e4   : > { %3359 = vmatmul.msk.f32.gmra.mxu3 %vm1563_vm9, %v1706_v14  ;;  %v1852_v14 = vpop.trf.xlu2  ;;  %v3502_v62 = vpop.eup %3501 }
 0x3e5   : > { %3376 = vmatmul.msk.f32.gmra.mxu0 %vm1563_vm9, %v1852_v14  ;;  %v1994_v25 = vpop.trf.xlu0  ;;  %v3504_v48 = vpop.eup %3503 }
 0x3e6   : > { %3389 = vmatmul.msk.f32.gmra.mxu1 %vm1563_vm9, %v1994_v25 }
 0x3e7   : > { %v1668_v50 = vpop.f32.mrf.mxu3 }
 0x3ec   : > { %3360 = vmatmul.msk.f32.gmra.mxu3 %vm1563_vm9, %v1707_v29  ;;  %v1459_v29 = vadd.f32 1.0, %v4557_v24  ;;  %v1853_v17 = vpop.trf.xlu2  ;;  %v2125_v24 = vmul.f32 %v1668_v50, %v4705_v57 }
 0x3ed   : > { %3377 = vmatmul.msk.f32.gmra.mxu0 %vm1563_vm9, %v1853_v17  ;;  %v2123_v17 = vmul.f32 %v4780_v41, %v4720_v61  ;;  %v1995_v50 = vpop.trf.xlu0  ;;  %v2121_v41 = vmul.f32 %v4722_v38, %v4735_v54  ;;  %v2119_v38 = vmul.f32 %v4683_v55, %v4749_v27 }
 0x3ee   : > { %v4822_v63 = vsel %vm1451_vm10, %v1459_v29, %v3502_v62  ;;  %v4831_v62 = vpop.f32.mrf.mxu0  ;;  %v1460_v29 = vadd.f32 1.0, %v4561_v34  ;;  %3390 = vmatmul.msk.f32.gmra.mxu1 %vm1563_vm9, %v1995_v50  ;;  %v1473_v34 = vmul.f32 1.442695, %v4567_v19  ;;  %v2116_v50 = vmul.f32 %v4668_v13, %v4771_v7 }
 0x3ef   : > { %v1671_v52 = vpop.f32.mrf.mxu3  ;;  %v2296_v14 = vmul.f32 %v2274_v40, %v4822_v63 }
 0x3f0   : > { %v2126_v20 = vmul.f32 %v1671_v52, %v4699_v16  ;;  %v4839_v52 = vsel %vm1452_vm11, %v1460_v29, %v3504_v48  ;;  %3507 = vpow2.f32 %v1473_v34  ;;  %v1475_v29 = vmul.f32 1.442695, %v4569_v2 }
 0x3f1   : > { %v2297_v25 = vmul.f32 %v2274_v40, %v4839_v52  ;;  %v2290_v34 = vrot.slane %v4581_v46, 4 }
 0x3f2   : > { %3509 = vpow2.f32 %v1475_v29 }
 0x3f4   : > { %3361 = vmatmul.msk.f32.gmra.mxu3 %vm1563_vm9, %v1708_v28  ;;  %v2278_v28 = vrot.slane %v2277_v4, 2 }
 0x3f5   : > { %v1996_v48 = vpop.trf.xlu0 }
 0x3f6   : > { %v2279_v22 = vadd.f32 %v2278_v28, %v2277_v4  ;;  %v2283_v4 = vrot.slane %v4577_v30, 4  ;;  %v4855_v40 = vpop.f32.mrf.mxu0  ;;  %3391 = vmatmul.msk.f32.gmra.mxu1 %vm1563_vm9, %v1996_v48 }
 0x3f7   : > { %v1674_v32 = vpop.f32.mrf.mxu3 }
 0x3f8   : > { %v2127_v49 = vmul.f32 %v1674_v32, %v4691_v53  ;;  %v2280_v21 = vrot.slane %v2279_v22, 1  ;;  %v2284_v28 = vadd.f32 %v2283_v4, %v4577_v30 }
 0x3fa   : > { %2176 = vmatpush.msra.mxu2 %v2127_v49  ;;  %v2122_v49 = vmul.f32 %v4751_v9, %v4728_v42  ;;  %v2281_v12 = vadd.f32 %v2280_v21, %v2279_v22  ;;  %v1461_v9 = vadd.f32 1.0, %v4563_v44  ;;  %v2118_v22 = vmul.f32 %v4678_v45, %v4757_v15 }
 0x3fb   : > { %v2117_v44 = vmul.f32 %v4673_v47, %v4764_v0  ;;  %v1462_v21 = vadd.f32 1.0, %v4567_v19  ;;  %v2115_v45 = vmul.f32 %v4664_v6, %v4778_v11  ;;  %v2113_v6 = vmul.f32 %v4656_v60, %v4793_v51 }
 0x3fc   : > { %2177 = vmatpush.msra.mxu2 %v2126_v20  ;;  %2320 = vmatmul.f32.vlgmr.msra.gmra.mxu3 %v2296_v14  ;;  %v3506_v14 = vpop.eup %3505  ;;  %v2120_v20 = vmul.f32 %v4694_v1, %v4742_v56  ;;  %v2285_v1 = vrot.slane %v2284_v28, 2 }
 0x3fd   : > { %v4860_v30 = vsel %vm1453_vm12, %v1461_v9, %v3506_v14  ;;  %v3508_v55 = vpop.eup %3507  ;;  %v1997_v47 = vpop.trf.xlu0  ;;  %v1477_v14 = vmul.f32 1.442695, %v4573_v18  ;;  %v2112_v9 = vmul.f32 %v4652_v8, %v4800_v23 }
 0x3fe   : > { %2178 = vmatpush.msra.mxu2 %v2125_v24  ;;  %3392 = vmatmul.msk.f32.gmra.mxu1 %vm1563_vm9, %v1997_v47 }
 0x3ff   : > { %v4834_v32 = vpop.f32.mrf.mxu3  ;;  %3511 = vpow2.f32 %v1477_v14 }
 0x400   : > { %2179 = vmatpush.msra.mxu2 %v2124_v58  ;;  %v2298_v58 = vmul.f32 %v2281_v12, %v4860_v30 }
 0x402   : > { %2180 = vmatpush.msra.mxu2 %v2123_v17  ;;  %v2286_v17 = vadd.f32 %v2285_v1, %v2284_v28  ;;  %v3510_v28 = vpop.eup %3509 }
 0x404   : > { %2181 = vmatpush.msra.mxu2 %v2122_v49  ;;  %2323 = vmatmul.f32.gmra.mxu3 %v2297_v25  ;;  %v4877_v49 = vsel %vm1454_vm13, %v1462_v21, %v3508_v55  ;;  %v4879_v25 = vpop.f32.mrf.mxu0  ;;  %v2287_v13 = vrot.slane %v2286_v17, 1  ;;  %v1481_v21 = vmul.f32 1.442695, %v4579_v31 }
 0x405   : > { %v2299_v19 = vmul.f32 %v2281_v12, %v4877_v49  ;;  %v1998_v12 = vpop.trf.xlu0 }
 0x406   : > { %2182 = vmatpush.msra.mxu2 %v2121_v41  ;;  %v2114_v41 = vmul.f32 %v4660_v10, %v4786_v35  ;;  %v1463_v10 = vadd.f32 1.0, %v4569_v2  ;;  %3393 = vmatmul.msk.f32.gmra.mxu1 %vm1563_vm9, %v1998_v12  ;;  %v4904_v2 = vpop.f32.mrf.mxu1 }
 0x407   : > { %v4853_v24 = vpop.f32.mrf.mxu3  ;;  %5809 = vst [vmem:[#allocation12_spill] sm:$0xff] %v4904_v2 }
 0x408   : > { %2183 = vmatpush.msra.mxu2 %v2120_v20  ;;  %v2291_v20 = vadd.f32 %v2290_v34, %v4581_v46  ;;  %v4897_v60 = vsel %vm1455_vm14, %v1463_v10, %v3510_v28  ;;  %v1465_v34 = vadd.f32 1.0, %v4575_v26 }
 0x40a   : > { %2184 = vmatpush.msra.mxu2 %v2119_v38  ;;  %v2288_v38 = vadd.f32 %v2287_v13, %v2286_v17  ;;  %v2292_v46 = vrot.slane %v2291_v20, 2 }
 0x40c   : > { %2185 = vmatpush.msra.mxu2 %v2118_v22  ;;  %2326 = vmatmul.f32.gmra.mxu3 %v2298_v58  ;;  %v2300_v8 = vmul.f32 %v2288_v38, %v4897_v60  ;;  %v4901_v1 = vpop.f32.mrf.mxu0  ;;  %v1479_v22 = vmul.f32 1.442695, %v4575_v26  ;;  %v3512_v58 = vpop.eup %3511  ;;  %v2293_v29 = vadd.f32 %v2292_v46, %v2291_v20 }
 0x40e   : > { %2186 = vmatpush.msra.mxu2 %v2117_v44  ;;  %v1464_v44 = vadd.f32 1.0, %v4573_v18  ;;  %3513 = vpow2.f32 %v1479_v22  ;;  %v2294_v17 = vrot.slane %v2293_v29, 1  ;;  %v4920_v18 = vpop.f32.mrf.mxu1 }
 0x40f   : > { %v4872_v4 = vpop.f32.mrf.mxu3  ;;  %3515 = vpow2.f32 %v1481_v21 }
 0x410   : > { %2187 = vmatpush.msra.mxu2 %v2116_v50  ;;  %v2295_v13 = vadd.f32 %v2294_v17, %v2293_v29 }
 0x412   : > { %2188 = vmatpush.msra.mxu2 %v2115_v45 }
 0x414   : > { %2189 = vmatpush.msra.mxu2 %v2114_v41  ;;  %2329 = vmatmul.f32.gmra.mxu3 %v2299_v19  ;;  %v4915_v45 = vpop.f32.mrf.mxu0  ;;  %v3514_v47 = vpop.eup %3513 }
 0x415   : > { %v3516_v14 = vpop.eup %3515 }
 0x416   : > { %2190 = vmatpush.msra.mxu2 %v2113_v6  ;;  %v1466_v6 = vadd.f32 1.0, %v4579_v31 }
 0x417   : > { %v4893_v48 = vpop.f32.mrf.mxu3 }
 0x418   : > { %2191 = vmatpush.msra.mxu2 %v2112_v9  ;;  %v4932_v9 = vsel %vm1458_vm1, %v1466_v6, %v3516_v14  ;;  %v399_v14 = vld [vmem:[%s5774_s5 + $0x150] sm:$0xff] }
 0x419   : > { %2192 = vmatmul.f32.vlgmr.msra.gmra.mxu2 %v4822_v63  ;;  %v4911_v63 = vsel %vm1456_vm15, %v1464_v44, %v3512_v58  ;;  %5811 = vst [vmem:[#allocation14_spill] sm:$0xff] %v4932_v9  ;;  %v2303_v26 = vmul.f32 %v2295_v13, %v4932_v9 }
 0x41a   : > { %v2301_v50 = vmul.f32 %v2288_v38, %v4911_v63  ;;  %v4934_v38 = vpop.f32.mrf.mxu1 }
 0x41c   : > { %2332 = vmatmul.f32.gmra.mxu3 %v2300_v8  ;;  %v4929_v20 = vpop.f32.mrf.mxu0 }
 0x41f   : > { %v4907_v55 = vpop.f32.mrf.mxu3 }
 0x421   : > { %2195 = vmatmul.f32.gmra.mxu2 %v4839_v52  ;;  %v4923_v52 = vsel %vm1457_vm0, %v1465_v34, %v3514_v47  ;;  %v402_v34 = vld [vmem:[%s5774_s5 + $0x168] sm:$0xff] }
 0x422   : > { %5810 = vst [vmem:[#allocation13_spill] sm:$0xff] %v4923_v52  ;;  %v2302_v19 = vmul.f32 %v2295_v13, %v4923_v52  ;;  %v4941_v46 = vpop.f32.mrf.mxu1  ;;  %2361 = vmatpush.msra.mxu0 %v402_v34  ;;  %v390_v34 = vld [vmem:[%s5774_s5 + $0x108] sm:$0xff] }
 0x424   : > { %2335 = vmatmul.f32.gmra.mxu3 %v2301_v50  ;;  %v4939_v12 = vpop.f32.mrf.mxu0  ;;  %2362 = vmatpush.msra.mxu0 %v399_v14  ;;  %v387_v14 = vld [vmem:[%s5774_s5 + $0xf0] sm:$0xff] }
 0x427   : > { %v4918_v41 = vpop.f32.mrf.mxu3 }
 0x42a   : > { %v4947_v58 = vpop.f32.mrf.mxu1 }
 0x42c   : > { %2338 = vmatmul.f32.gmra.mxu3 %v2302_v19  ;;  %v4945_v22 = vpop.f32.mrf.mxu0 }
 0x42f   : > { %v4927_v28 = vpop.f32.mrf.mxu3 }
 0x432   : > { %v4951_v17 = vpop.f32.mrf.mxu1 }
 0x434   : > { %2341 = vmatmul.f32.gmra.mxu3 %v2303_v26  ;;  %v4949_v29 = vpop.f32.mrf.mxu0  ;;  %v396_v26 = vld [vmem:[%s5774_s5 + $0x138] sm:$0xff] }
 0x435   : > { %2363 = vmatpush.msra.mxu0 %v396_v26  ;;  %v384_v26 = vld [vmem:[%s5774_s5 + $0xd8] sm:$0xff] }
 0x437   : > { %v4937_v10 = vpop.f32.mrf.mxu3  ;;  %2364 = vmatpush.msra.mxu0 %v393_v3  ;;  %v381_v3 = vld [vmem:[%s5774_s5 + $0xc0] sm:$0xff] }
 0x439   : > { %2365 = vmatpush.msra.mxu0 %v390_v34  ;;  %v378_v34 = vld [vmem:[%s5774_s5 + $0xa8] sm:$0xff] }
 0x43a   : > { %v4955_v47 = vpop.f32.mrf.mxu1 }
 0x43b   : > { %2366 = vmatpush.msra.mxu0 %v387_v14  ;;  %v375_v14 = vld [vmem:[%s5774_s5 + $0x90] sm:$0xff] }
 0x43c   : > { %v4953_v21 = vpop.f32.mrf.mxu0 }
 0x43d   : > { %2367 = vmatpush.msra.mxu0 %v384_v26  ;;  %v372_v26 = vld [vmem:[%s5774_s5 + $0x78] sm:$0xff] }
 0x43f   : > { %v4943_v8 = vpop.f32.mrf.mxu3  ;;  %2368 = vmatpush.msra.mxu0 %v381_v3  ;;  %v369_v3 = vld [vmem:[%s5774_s5 + $0x60] sm:$0xff] }
 0x441   : > { %2369 = vmatpush.msra.mxu0 %v378_v34 }
 0x442   : > { %v4965_v6 = vpop.f32.mrf.mxu1 }
 0x443   : > { %2370 = vmatpush.msra.mxu0 %v375_v14  ;;  %v366_v14 = vld [vmem:[%s5774_s5 + $0x48] sm:$0xff] }
 0x444   : > { %v4960_v19 = vpop.f32.mrf.mxu0 }
 0x445   : > { %2371 = vmatpush.msra.mxu0 %v372_v26  ;;  %v363_v26 = vld [vmem:[%s5774_s5 + $0x30] sm:$0xff] }
 0x447   : > { %v1801_v31 = vpop.f32.mrf.mxu3  ;;  %2372 = vmatpush.msra.mxu0 %v369_v3 }
 0x449   : > { %2373 = vmatpush.msra.mxu0 %v366_v14 }
 0x44a   : > { %v4984_v43 = vpop.f32.mrf.mxu1 }
 0x44b   : > { %2374 = vmatpush.msra.mxu0 %v363_v26 }
 0x44c   : > { %v4979_v5 = vpop.f32.mrf.mxu0 }
 0x44f   : > { %v1804_v44 = vpop.f32.mrf.mxu3 }
 0x452   : > { %v5003_v9 = vpop.f32.mrf.mxu1 }
 0x454   : > { %v4998_v59 = vpop.f32.mrf.mxu0 }
 0x457   : > { %v1807_v50 = vpop.f32.mrf.mxu3 }
 0x458   : > { %v2139_v14 = vmul.f32 %v1807_v50, %v4720_v61  ;;  %v2134_v50 = vmul.f32 %v4927_v28, %v4757_v15 }
 0x45a   : > { %v5022_v26 = vpop.f32.mrf.mxu1 }
 0x45f   : > { %v1810_v13 = vpop.f32.mrf.mxu3 }
 0x460   : > { %v2140_v3 = vmul.f32 %v1810_v13, %v4714_v36  ;;  %v2135_v13 = vmul.f32 %v4937_v10, %v4749_v27  ;;  %v2131_v10 = vmul.f32 %v4893_v48, %v4778_v11 }
 0x467   : > { %v1813_v33 = vpop.f32.mrf.mxu3 }
 0x468   : > { %v2141_v2 = vmul.f32 %v1813_v33, %v4705_v57  ;;  %v2138_v33 = vmul.f32 %v1804_v44, %v4728_v42  ;;  %v2133_v44 = vmul.f32 %v4918_v41, %v4764_v0 }
 0x46f   : > { %v1816_v39 = vpop.f32.mrf.mxu3 }
 0x470   : > { %v2142_v52 = vmul.f32 %v1816_v39, %v4699_v16  ;;  %v357_v39 = vld [vmem:[%s5774_s5] sm:$0xff] }
 0x477   : > { %v1819_v37 = vpop.f32.mrf.mxu3 }
 0x478   : > { %v2143_v34 = vmul.f32 %v1819_v37, %v4691_v53  ;;  %v360_v37 = vld [vmem:[%s5774_s5 + $0x18] sm:$0xff] }
 0x479   : > { %2375 = vmatpush.msra.mxu0 %v360_v37 }
 0x47a   : > { %2199 = vmatpush.msrb.mxu2 %v2143_v34  ;;  %v1958_v34 = vpop.f32.mrf.mxu0 }
 0x47b   : > { %2376 = vmatpush.msra.mxu0 %v357_v39  ;;  %v2130_v39 = vmul.f32 %v4872_v4, %v4786_v35 }
 0x47c   : > { %2200 = vmatpush.msrb.mxu2 %v2142_v52  ;;  %v2137_v52 = vmul.f32 %v1801_v31, %v4735_v54 }
 0x47e   : > { %2201 = vmatpush.msrb.mxu2 %v2141_v2  ;;  %v2136_v2 = vmul.f32 %v4943_v8, %v4742_v56  ;;  %v2132_v8 = vmul.f32 %v4907_v55, %v4771_v7 }
 0x47f   : > { %v2321_v31 = vpop.f32.mrf.mxu3 }
 0x480   : > { %2202 = vmatpush.msrb.mxu2 %v2140_v3  ;;  %v5032_v3 = vpop.f32.mrf.mxu1  ;;  %v2322_v28 = vadd.f32 1e-06, %v2321_v31 }
 0x482   : > { %2203 = vmatpush.msrb.mxu2 %v2139_v14  ;;  %v1961_v37 = vpop.f32.mrf.mxu0  ;;  %3517 = vrcp.f32 %v2322_v28  ;;  %v2148_v28 = vmul.f32 %v4915_v45, %v4771_v7 }
 0x484   : > { %2204 = vmatpush.msrb.mxu2 %v2138_v33  ;;  %v2129_v33 = vmul.f32 %v4853_v24, %v4793_v51  ;;  %v2157_v24 = vmul.f32 %v1958_v34, %v4705_v57 }
 0x486   : > { %2205 = vmatpush.msrb.mxu2 %v2137_v52  ;;  %v2128_v52 = vmul.f32 %v4834_v32, %v4800_v23  ;;  %v2156_v32 = vmul.f32 %v4998_v59, %v4714_v36 }
 0x487   : > { %v2324_v48 = vpop.f32.mrf.mxu3 }
 0x488   : > { %2206 = vmatpush.msrb.mxu2 %v2136_v2  ;;  %v2100_v41 = vpop.f32.mrf.mxu1  ;;  %v2325_v4 = vadd.f32 1e-06, %v2324_v48  ;;  %v2158_v2 = vmul.f32 %v1961_v37, %v4699_v16  ;;  %v2154_v37 = vmul.f32 %v4960_v19, %v4728_v42  ;;  %v2150_v19 = vmul.f32 %v4939_v12, %v4757_v15 }
 0x489   : > { %v2145_v12 = vmul.f32 %v4855_v40, %v4793_v51  ;;  %v2172_v45 = vmul.f32 %v2100_v41, %v4714_v36  ;;  %v2171_v40 = vmul.f32 %v5032_v3, %v4720_v61  ;;  %v2167_v36 = vmul.f32 %v4965_v6, %v4749_v27  ;;  %v5190_v6 = vld [vmem:[%s5774_s5 + $0x40] sm:$0xff]  ;;  %v5202_v3 = vld [vmem:[%s5774_s5 + $0x10] sm:$0xff] }
 0x48a   : > { %2207 = vmatpush.msrb.mxu2 %v2135_v13  ;;  %v1964_v14 = vpop.f32.mrf.mxu0  ;;  %v3518_v13 = vpop.eup %3517  ;;  %3519 = vrcp.f32 %v2325_v4 }
 0x48b   : > { %v2159_v55 = vmul.f32 %v1964_v14, %v4691_v53 }
 0x48c   : > { %2208 = vmatpush.msrb.mxu2 %v2134_v50 }
 0x48e   : > { %2209 = vmatpush.msrb.mxu2 %v2133_v44 }
 0x48f   : > { %v2327_v41 = vpop.f32.mrf.mxu3 }
 0x490   : > { %2210 = vmatpush.msrb.mxu2 %v2132_v8  ;;  %v2103_v31 = vpop.f32.mrf.mxu1  ;;  %v3520_v34 = vpop.eup %3519  ;;  %v2153_v8 = vmul.f32 %v4953_v21, %v4735_v54  ;;  %v2149_v21 = vmul.f32 %v4929_v20, %v4764_v0  ;;  %v2144_v20 = vmul.f32 %v4831_v62, %v4800_v23  ;;  %v5813_v62 = vld [vmem:[#allocation13_spill] sm:$0xff] }
 0x492   : > { %2211 = vmatpush.msrb.mxu2 %v2131_v10 }
 0x494   : > { %2212 = vmatpush.msrb.mxu2 %v2130_v39  ;;  %v2152_v39 = vmul.f32 %v4949_v29, %v4742_v56  ;;  %v2147_v29 = vmul.f32 %v4901_v1, %v4778_v11 }
 0x496   : > { %2213 = vmatpush.msrb.mxu2 %v2129_v33 }
 0x498   : > { %2214 = vmatpush.msrb.mxu2 %v2128_v52  ;;  %v2328_v52 = vadd.f32 1e-06, %v2327_v41 }
 0x499   : > { %2215 = vmatmul.f32.vlgmr.msrb.gmra.mxu2 %v4860_v30  ;;  %v2155_v30 = vmul.f32 %v4979_v5, %v4720_v61  ;;  %v2151_v5 = vmul.f32 %v4945_v22, %v4749_v27  ;;  %v2146_v22 = vmul.f32 %v4879_v25, %v4786_v35  ;;  %v2173_v25 = vmul.f32 %v2103_v31, %v4705_v57 }
 0x49a   : > { %2222 = vmatpush.msra.mxu2 %v2159_v55  ;;  %v2168_v57 = vmul.f32 %v4984_v43, %v4742_v56  ;;  %v2166_v61 = vmul.f32 %v4955_v47, %v4757_v15  ;;  %v2163_v43 = vmul.f32 %v4941_v46, %v4778_v11  ;;  %v2162_v56 = vmul.f32 %v4934_v38, %v4786_v35  ;;  %v5812_v15 = vld [vmem:[#allocation12_spill] sm:$0xff]  ;;  %v5117_v11 = vld [vmem:[%s5774_s5 + $0x160] sm:$0xff]  ;;  %v5123_v35 = vld [vmem:[%s5774_s5 + $0x148] sm:$0xff]  ;;  %v2330_v55 = vpop.f32.mrf.mxu3 }
 0x49b   : > { %v2161_v27 = vmul.f32 %v4920_v18, %v4793_v51  ;;  %v5129_v51 = vld [vmem:[%s5774_s5 + $0x130] sm:$0xff]  ;;  %v5148_v18 = vld [vmem:[%s5774_s5 + $0xe8] sm:$0xff]  ;;  %v5160_v38 = vld [vmem:[%s5774_s5 + $0xb8] sm:$0xff]  ;;  %3521 = vrcp.f32 %v2328_v52  ;;  %v2331_v48 = vadd.f32 1e-06, %v2330_v55 }
 0x49c   : > { %2223 = vmatpush.msra.mxu2 %v2158_v2  ;;  %v2193_v50 = vpop.f32.mrf.mxu2  ;;  %v5166_v46 = vld [vmem:[%s5774_s5 + $0xa0] sm:$0xff]  ;;  %v5184_v47 = vld [vmem:[%s5774_s5 + $0x58] sm:$0xff] }
 0x49d   : > { %v2353_v44 = vmul.f32 %v3518_v13, %v2193_v50  ;;  %3523 = vrcp.f32 %v2331_v48  ;;  %v2685_v52 = vld [vmem:[%s5775_s6 + $0xe0] sm:$0xff] }
 0x49e   : > { %2224 = vmatpush.msra.mxu2 %v2157_v24  ;;  %v2681_v55 = vld [vmem:[%s5775_s6 + $0xc0] sm:$0xff] }
 0x49f   : > { %2377 = vmatmul.f32.vlgmr.msra.gmra.mxu0 %v2353_v44  ;;  %v2677_v48 = vld [vmem:[%s5775_s6 + $0xa0] sm:$0xff] }
 0x4a0   : > { %2225 = vmatpush.msra.mxu2 %v2156_v32 }
 0x4a1   : > { %2218 = vmatmul.f32.gmra.mxu2 %v4877_v49  ;;  %v2106_v49 = vpop.f32.mrf.mxu1  ;;  %v3522_v4 = vpop.eup %3521 }
 0x4a2   : > { %2226 = vmatpush.msra.mxu2 %v2155_v30  ;;  %v2174_v1 = vmul.f32 %v2106_v49, %v4699_v16  ;;  %v2169_v16 = vmul.f32 %v5003_v9, %v4735_v54  ;;  %v2164_v54 = vmul.f32 %v4947_v58, %v4771_v7  ;;  %v5111_v7 = vld [vmem:[%s5774_s5 + $0x178] sm:$0xff]  ;;  %v5154_v9 = vld [vmem:[%s5774_s5 + $0xd0] sm:$0xff]  ;;  %v5172_v58 = vld [vmem:[%s5774_s5 + $0x88] sm:$0xff]  ;;  %v2333_v30 = vpop.f32.mrf.mxu3 }
 0x4a3   : > { %v3524_v50 = vpop.eup %3523 }
 0x4a4   : > { %2227 = vmatpush.msra.mxu2 %v2154_v37  ;;  %v2196_v59 = vpop.f32.mrf.mxu2  ;;  %v2334_v37 = vadd.f32 1e-06, %v2333_v30  ;;  %v5815_v30 = vld [vmem:[#allocation2_spill] sm:$0xff] }
 0x4a5   : > { %v2354_v10 = vmul.f32 %v3520_v34, %v2196_v59 }
 0x4a6   : > { %2228 = vmatpush.msra.mxu2 %v2153_v8  ;;  %3525 = vrcp.f32 %v2334_v37  ;;  %v5816_v37 = vld [vmem:[#allocation3_spill] sm:$0xff] }
 0x4a7   : > { %2380 = vmatmul.f32.gmra.mxu0 %v2354_v10 }
 0x4a8   : > { %2229 = vmatpush.msra.mxu2 %v2152_v39 }
 0x4a9   : > { %v2109_v14 = vpop.f32.mrf.mxu1 }
 0x4aa   : > { %2230 = vmatpush.msra.mxu2 %v2151_v5  ;;  %v2175_v33 = vmul.f32 %v2109_v14, %v4691_v53  ;;  %v2170_v53 = vmul.f32 %v5022_v26, %v4728_v42  ;;  %v2165_v42 = vmul.f32 %v4951_v17, %v4764_v0  ;;  %v2160_v0 = vmul.f32 %v5812_v15, %v4800_v23  ;;  %v5814_v23 = vld [vmem:[#allocation14_spill] sm:$0xff]  ;;  %v5178_v17 = vld [vmem:[%s5774_s5 + $0x70] sm:$0xff]  ;;  %v2336_v34 = vpop.f32.mrf.mxu3  ;;  %v2701_v15 = vld [vmem:[%s5775_s6 + $0x160] sm:$0xff] }
 0x4ab   : > { %v5196_v26 = vld [vmem:[%s5774_s5 + $0x28] sm:$0xff]  ;;  %v2337_v8 = vadd.f32 1e-06, %v2336_v34  ;;  %v5817_v34 = vld [vmem:[#allocation4_spill] sm:$0xff] }
 0x4ac   : > { %2231 = vmatpush.msra.mxu2 %v2150_v19  ;;  %v3526_v59 = vpop.eup %3525 }
 0x4ad   : > { %3527 = vrcp.f32 %v2337_v8  ;;  %v2719_v8 = vld [vmem:[%s5775_s6 + $0x1f0] sm:$0xff] }
 0x4ae   : > { %2232 = vmatpush.msra.mxu2 %v2149_v21  ;;  %2721 = vmatpush.msrb.mxu3 %v2719_v8  ;;  %v2660_v8 = vld [vmem:[%s5775_s6 + $0x18] sm:$0xff] }
 0x4b0   : > { %2233 = vmatpush.msra.mxu2 %v2148_v28 }
 0x4b2   : > { %2234 = vmatpush.msra.mxu2 %v2147_v29  ;;  %v2339_v21 = vpop.f32.mrf.mxu3 }
 0x4b3   : > { %v3528_v5 = vpop.eup %3527  ;;  %v2340_v28 = vadd.f32 1e-06, %v2339_v21  ;;  %v2707_v21 = vld [vmem:[%s5775_s6 + $0x190] sm:$0xff] }
 0x4b4   : > { %2235 = vmatpush.msra.mxu2 %v2146_v22 }
 0x4b5   : > { %3529 = vrcp.f32 %v2340_v28  ;;  %v2708_v28 = vld [vmem:[%s5775_s6 + $0x198] sm:$0xff] }
 0x4b6   : > { %2236 = vmatpush.msra.mxu2 %v2145_v12 }
 0x4b8   : > { %2237 = vmatpush.msra.mxu2 %v2144_v20 }
 0x4b9   : > { %2238 = vmatmul.f32.vlgmr.msra.gmra.mxu2 %v4897_v60  ;;  %v5136_v60 = vld [vmem:[%s5774_s5 + $0x118] sm:$0xff] }
 0x4ba   : > { %2245 = vmatpush.msrb.mxu2 %v2175_v33  ;;  %v2342_v29 = vpop.f32.mrf.mxu3 }
 0x4bb   : > { %v2343_v22 = vadd.f32 1e-06, %v2342_v29  ;;  %v3530_v14 = vpop.eup %3529  ;;  %v2703_v29 = vld [vmem:[%s5775_s6 + $0x170] sm:$0xff] }
 0x4bc   : > { %2246 = vmatpush.msrb.mxu2 %v2174_v1 }
 0x4bd   : > { %3531 = vrcp.f32 %v2343_v22  ;;  %v2704_v22 = vld [vmem:[%s5775_s6 + $0x178] sm:$0xff] }
 0x4be   : > { %2247 = vmatpush.msrb.mxu2 %v2173_v25 }
 0x4c0   : > { %2248 = vmatpush.msrb.mxu2 %v2172_v45 }
 0x4c1   : > { %2241 = vmatmul.f32.gmra.mxu2 %v4911_v63  ;;  %v5142_v63 = vld [vmem:[%s5774_s5 + $0x100] sm:$0xff] }
 0x4c2   : > { %2249 = vmatpush.msrb.mxu2 %v2171_v40 }
 0x4c3   : > { %v3532_v33 = vpop.eup %3531 }
 0x4c4   : > { %2250 = vmatpush.msrb.mxu2 %v2170_v53 }
 0x4c6   : > { %2251 = vmatpush.msrb.mxu2 %v2169_v16 }
 0x4c8   : > { %2252 = vmatpush.msrb.mxu2 %v2168_v57 }
 0x4ca   : > { %2253 = vmatpush.msrb.mxu2 %v2167_v36 }
 0x4cc   : > { %2254 = vmatpush.msrb.mxu2 %v2166_v61 }
 0x4ce   : > { %2255 = vmatpush.msrb.mxu2 %v2165_v42 }
 0x4d0   : > { %2256 = vmatpush.msrb.mxu2 %v2164_v54  ;;  %v2717_v54 = vld [vmem:[%s5775_s6 + $0x1e0] sm:$0xff] }
 0x4d1   : > { %2803 = vmatpush.msra.mxu1 %v2717_v54  ;;  %v2683_v54 = vld [vmem:[%s5775_s6 + $0xd0] sm:$0xff] }
 0x4d2   : > { %2257 = vmatpush.msrb.mxu2 %v2163_v43  ;;  %v2713_v43 = vld [vmem:[%s5775_s6 + $0x1c0] sm:$0xff] }
 0x4d3   : > { %2804 = vmatpush.msra.mxu1 %v2713_v43  ;;  %v2684_v43 = vld [vmem:[%s5775_s6 + $0xd8] sm:$0xff] }
 0x4d4   : > { %2258 = vmatpush.msrb.mxu2 %v2162_v56  ;;  %v2709_v56 = vld [vmem:[%s5775_s6 + $0x1a0] sm:$0xff] }
 0x4d5   : > { %2805 = vmatpush.msra.mxu1 %v2709_v56  ;;  %v2679_v56 = vld [vmem:[%s5775_s6 + $0xb0] sm:$0xff] }
 0x4d6   : > { %2259 = vmatpush.msrb.mxu2 %v2161_v27  ;;  %v2705_v27 = vld [vmem:[%s5775_s6 + $0x180] sm:$0xff] }
 0x4d7   : > { %2806 = vmatpush.msra.mxu1 %v2705_v27  ;;  %v2680_v27 = vld [vmem:[%s5775_s6 + $0xb8] sm:$0xff] }
 0x4d8   : > { %2260 = vmatpush.msrb.mxu2 %v2160_v0  ;;  %v2697_v0 = vld [vmem:[%s5775_s6 + $0x140] sm:$0xff] }
 0x4d9   : > { %2261 = vmatmul.f32.vlgmr.msrb.gmra.mxu2 %v5813_v62  ;;  %2807 = vmatpush.msra.mxu1 %v2701_v15  ;;  %v2693_v62 = vld [vmem:[%s5775_s6 + $0x120] sm:$0xff]  ;;  %v2675_v15 = vld [vmem:[%s5775_s6 + $0x90] sm:$0xff] }
 0x4da   : > { %2459 = vmatpush.msra.mxu2 %v5111_v7 }
 0x4db   : > { %2808 = vmatpush.msra.mxu1 %v2697_v0  ;;  %v2676_v0 = vld [vmem:[%s5775_s6 + $0x98] sm:$0xff] }
 0x4dc   : > { %2460 = vmatpush.msra.mxu2 %v5117_v11 }
 0x4dd   : > { %2809 = vmatpush.msra.mxu1 %v2693_v62 }
 0x4de   : > { %2461 = vmatpush.msra.mxu2 %v5123_v35 }
 0x4e0   : > { %2462 = vmatpush.msra.mxu2 %v5129_v51 }
 0x4e1   : > { %2264 = vmatmul.f32.gmra.mxu2 %v5814_v23  ;;  %v2689_v23 = vld [vmem:[%s5775_s6 + $0x100] sm:$0xff] }
 0x4e2   : > { %2463 = vmatpush.msra.mxu2 %v5136_v60  ;;  %2810 = vmatpush.msra.mxu1 %v2689_v23 }
 0x4e4   : > { %2464 = vmatpush.msra.mxu2 %v5142_v63  ;;  %2811 = vmatpush.msra.mxu1 %v2685_v52  ;;  %v2671_v52 = vld [vmem:[%s5775_s6 + $0x70] sm:$0xff] }
 0x4e6   : > { %2465 = vmatpush.msra.mxu2 %v5148_v18  ;;  %2812 = vmatpush.msra.mxu1 %v2681_v55  ;;  %v2672_v55 = vld [vmem:[%s5775_s6 + $0x78] sm:$0xff] }
 0x4e8   : > { %2466 = vmatpush.msra.mxu2 %v5154_v9  ;;  %2813 = vmatpush.msra.mxu1 %v2677_v48 }
 0x4ea   : > { %2467 = vmatpush.msra.mxu2 %v5160_v38 }
 0x4ec   : > { %2468 = vmatpush.msra.mxu2 %v5166_v46 }
 0x4ee   : > { %2469 = vmatpush.msra.mxu2 %v5172_v58 }
 0x4f0   : > { %2470 = vmatpush.msra.mxu2 %v5178_v17 }
 0x4f2   : > { %2471 = vmatpush.msra.mxu2 %v5184_v47 }
 0x4f4   : > { %2472 = vmatpush.msra.mxu2 %v5190_v6 }
 0x4f6   : > { %2473 = vmatpush.msra.mxu2 %v5196_v26 }
 0x4f8   : > { %2474 = vmatpush.msra.mxu2 %v5202_v3 }
 0x51c   : > { %v2216_v2 = vpop.f32.mrf.mxu2  ;;  %v2378_v13 = vpop.f32.mrf.mxu0 }
 0x51d   : > { %v2355_v24 = vmul.f32 %v3522_v4, %v2216_v2  ;;  %2418 = vmatmul.f32.vlgmr.msrb.gmra.mxu1 %v2378_v13  ;;  %v2673_v4 = vld [vmem:[%s5775_s6 + $0x80] sm:$0xff] }
 0x51e   : > { %2814 = vmatpush.msra.mxu1 %v2673_v4  ;;  %v5821_v4 = vld [vmem:[#allocation8_spill] sm:$0xff] }
 0x51f   : > { %2383 = vmatmul.f32.gmra.mxu0 %v2355_v24  ;;  %v2665_v24 = vld [vmem:[%s5775_s6 + $0x40] sm:$0xff] }
 0x524   : > { %v2219_v44 = vpop.f32.mrf.mxu2  ;;  %v2381_v32 = vpop.f32.mrf.mxu0 }
 0x525   : > { %v2356_v31 = vmul.f32 %v3524_v50, %v2219_v44  ;;  %2421 = vmatmul.f32.gmra.mxu1 %v2381_v32  ;;  %v2661_v50 = vld [vmem:[%s5775_s6 + $0x20] sm:$0xff] }
 0x526   : > { %v2657_v44 = vld [vmem:[%s5775_s6] sm:$0xff] }
 0x527   : > { %2386 = vmatmul.f32.gmra.mxu0 %v2356_v31 }
 0x53c   : > { %v2239_v10 = vpop.f32.mrf.mxu2 }
 0x53d   : > { %v2357_v39 = vmul.f32 %v3526_v59, %v2239_v10  ;;  %v2720_v59 = vld [vmem:[%s5775_s6 + $0x1f8] sm:$0xff]  ;;  %v5818_v10 = vld [vmem:[#allocation5_spill] sm:$0xff] }
 0x53e   : > { %2762 = vmatpush.msrb.mxu0 %v2720_v59 }
 0x53f   : > { %2389 = vmatmul.f32.gmra.mxu0 %v2357_v39  ;;  %v2715_v39 = vld [vmem:[%s5775_s6 + $0x1d0] sm:$0xff] }
 0x540   : > { %2722 = vmatpush.msrb.mxu3 %v2715_v39 }
 0x544   : > { %v2242_v49 = vpop.f32.mrf.mxu2 }
 0x545   : > { %v2358_v19 = vmul.f32 %v3528_v5, %v2242_v49  ;;  %v2716_v5 = vld [vmem:[%s5775_s6 + $0x1d8] sm:$0xff]  ;;  %v2711_v49 = vld [vmem:[%s5775_s6 + $0x1b0] sm:$0xff] }
 0x546   : > { %2763 = vmatpush.msrb.mxu0 %v2716_v5  ;;  %2723 = vmatpush.msrb.mxu3 %v2711_v49 }
 0x547   : > { %2392 = vmatmul.f32.gmra.mxu0 %v2358_v19  ;;  %v2712_v19 = vld [vmem:[%s5775_s6 + $0x1b8] sm:$0xff] }
 0x548   : > { %2764 = vmatpush.msrb.mxu0 %v2712_v19  ;;  %2724 = vmatpush.msrb.mxu3 %v2707_v21  ;;  %v5822_v21 = vld [vmem:[#allocation9_spill] sm:$0xff] }
 0x54a   : > { %2765 = vmatpush.msrb.mxu0 %v2708_v28  ;;  %2725 = vmatpush.msrb.mxu3 %v2703_v29  ;;  %v2718_v28 = vld [vmem:[%s5775_s6 + $0x1e8] sm:$0xff] }
 0x54b   : > { %v2714_v29 = vld [vmem:[%s5775_s6 + $0x1c8] sm:$0xff]  ;;  %2844 = vmatpush.msrb.mxu2 %v2718_v28 }
 0x54c   : > { %2766 = vmatpush.msrb.mxu0 %v2704_v22 }
 0x54d   : > { %2845 = vmatpush.msrb.mxu2 %v2714_v29 }
 0x55c   : > { %v2262_v12 = vpop.f32.mrf.mxu2 }
 0x55d   : > { %v2359_v20 = vmul.f32 %v3530_v14, %v2262_v12  ;;  %v5819_v14 = vld [vmem:[#allocation6_spill] sm:$0xff]  ;;  %v2699_v12 = vld [vmem:[%s5775_s6 + $0x150] sm:$0xff] }
 0x55e   : > { %2726 = vmatpush.msrb.mxu3 %v2699_v12 }
 0x55f   : > { %2395 = vmatmul.f32.gmra.mxu0 %v2359_v20  ;;  %v2700_v20 = vld [vmem:[%s5775_s6 + $0x158] sm:$0xff] }
 0x560   : > { %2767 = vmatpush.msrb.mxu0 %v2700_v20  ;;  %v2710_v20 = vld [vmem:[%s5775_s6 + $0x1a8] sm:$0xff] }
 0x561   : > { %2846 = vmatpush.msrb.mxu2 %v2710_v20  ;;  %v2694_v20 = vld [vmem:[%s5775_s6 + $0x128] sm:$0xff] }
 0x564   : > { %v2265_v1 = vpop.f32.mrf.mxu2 }
 0x565   : > { %v2360_v25 = vmul.f32 %v3532_v33, %v2265_v1  ;;  %v2695_v33 = vld [vmem:[%s5775_s6 + $0x130] sm:$0xff]  ;;  %v2696_v1 = vld [vmem:[%s5775_s6 + $0x138] sm:$0xff] }
 0x566   : > { %2727 = vmatpush.msrb.mxu3 %v2695_v33  ;;  %2768 = vmatpush.msrb.mxu0 %v2696_v1  ;;  %v2706_v1 = vld [vmem:[%s5775_s6 + $0x188] sm:$0xff] }
 0x567   : > { %2398 = vmatmul.f32.gmra.mxu0 %v2360_v25  ;;  %v2691_v25 = vld [vmem:[%s5775_s6 + $0x110] sm:$0xff]  ;;  %2847 = vmatpush.msrb.mxu2 %v2706_v1 }
 0x568   : > { %2728 = vmatpush.msrb.mxu3 %v2691_v25 }
 0x59a   : > { %v2419_v45 = vpop.f32.mrf.mxu1 }
 0x59b   : > { %v5205_v40 = vsub.f32 %v2378_v13, %v2419_v45  ;;  %v2669_v13 = vld [vmem:[%s5775_s6 + $0x60] sm:$0xff]  ;;  %v2692_v45 = vld [vmem:[%s5775_s6 + $0x118] sm:$0xff] }
 0x59c   : > { %v5207_v53 = vpop.f32.mrf.mxu0  ;;  %2815 = vmatpush.msra.mxu1 %v2669_v13  ;;  %2769 = vmatpush.msrb.mxu0 %v2692_v45  ;;  %v2668_v13 = vld [vmem:[%s5775_s6 + $0x58] sm:$0xff]  ;;  %v3598_v45 = vld [vmem:[%s5777_s8 + $0x8] sm:$0xff] }
 0x59d   : > { %v2451_v16 = vmul.f32 %v5205_v40, %v5205_v40  ;;  %2424 = vmatmul.f32.gmra.mxu1 %v5207_v53 }
 0x59e   : > { %2816 = vmatpush.msra.mxu1 %v2665_v24  ;;  %v2663_v24 = vld [vmem:[%s5775_s6 + $0x30] sm:$0xff] }
 0x59f   : > { %2475 = vmatmul.f32.vlgmr.msra.gmra.mxu2 %v2451_v16  ;;  %v2687_v16 = vld [vmem:[%s5775_s6 + $0xf0] sm:$0xff] }
 0x5a0   : > { %2817 = vmatpush.msra.mxu1 %v2661_v50  ;;  %2729 = vmatpush.msrb.mxu3 %v2687_v16  ;;  %v2664_v50 = vld [vmem:[%s5775_s6 + $0x38] sm:$0xff]  ;;  %v1161_v16 = vperm.slane %v3598_v45, 1 }
 0x5a2   : > { %v2422_v57 = vpop.f32.mrf.mxu1  ;;  %2818 = vmatpush.msra.mxu1 %v2657_v44  ;;  %2730 = vmatpush.msrb.mxu3 %v2683_v54  ;;  %v2659_v44 = vld [vmem:[%s5775_s6 + $0x10] sm:$0xff] }
 0x5a3   : > { %v5212_v36 = vsub.f32 %v2381_v32, %v2422_v57  ;;  %v2688_v57 = vld [vmem:[%s5775_s6 + $0xf8] sm:$0xff] }
 0x5a4   : > { %v5214_v61 = vpop.f32.mrf.mxu0  ;;  %3015 = vmatpush.msrb.mxu1 %v5111_v7  ;;  %2770 = vmatpush.msrb.mxu0 %v2688_v57  ;;  %v2702_v57 = vld [vmem:[%s5775_s6 + $0x168] sm:$0xff] }
 0x5a5   : > { %v2452_v42 = vmul.f32 %v5212_v36, %v5212_v36  ;;  %2427 = vmatmul.f32.gmra.mxu1 %v5214_v61  ;;  %2731 = vmatpush.msrb.mxu3 %v2679_v56 }
 0x5a6   : > { %3016 = vmatpush.msrb.mxu1 %v5117_v11  ;;  %2771 = vmatpush.msrb.mxu0 %v2684_v43 }
 0x5a7   : > { %2478 = vmatmul.f32.gmra.mxu2 %v2452_v42  ;;  %v5820_v42 = vld [vmem:[#allocation7_spill] sm:$0xff]  ;;  %2732 = vmatpush.msrb.mxu3 %v2675_v15 }
 0x5a8   : > { %3017 = vmatpush.msrb.mxu1 %v5123_v35  ;;  %2772 = vmatpush.msrb.mxu0 %v2680_v27  ;;  %v5823_v27 = vld [vmem:[#allocation10_spill] sm:$0xff] }
 0x5a9   : > { %2733 = vmatpush.msrb.mxu3 %v2671_v52  ;;  %2848 = vmatpush.msrb.mxu2 %v2702_v57  ;;  %v5428_v15 = vadd.f32 %v1161_v16, %v5823_v27  ;;  %v1163_v52 = vperm.slane %v3598_v45, 2  ;;  %v2690_v16 = vld [vmem:[%s5775_s6 + $0x108] sm:$0xff] }
 0x5aa   : > { %3018 = vmatpush.msrb.mxu1 %v5129_v51  ;;  %2773 = vmatpush.msrb.mxu0 %v2676_v0  ;;  %v2682_v27 = vld [vmem:[%s5775_s6 + $0xc8] sm:$0xff] }
 0x5ac   : > { %3019 = vmatpush.msrb.mxu1 %v5136_v60  ;;  %2774 = vmatpush.msrb.mxu0 %v2672_v55  ;;  %v5433_v55 = vld [vmem:[%s5777_s8] sm:$0xff] }
 0x5ae   : > { %3020 = vmatpush.msrb.mxu1 %v5142_v63  ;;  %2775 = vmatpush.msrb.mxu0 %v2668_v13 }
 0x5b0   : > { %3021 = vmatpush.msrb.mxu1 %v5148_v18  ;;  %2776 = vmatpush.msrb.mxu0 %v2664_v50 }
 0x5b2   : > { %3022 = vmatpush.msrb.mxu1 %v5154_v9  ;;  %2777 = vmatpush.msrb.mxu0 %v2660_v8 }
 0x5b4   : > { %3023 = vmatpush.msrb.mxu1 %v5160_v38 }
 0x5b6   : > { %3024 = vmatpush.msrb.mxu1 %v5166_v46 }
 0x5b8   : > { %3025 = vmatpush.msrb.mxu1 %v5172_v58 }
 0x5ba   : > { %3026 = vmatpush.msrb.mxu1 %v5178_v17 }
 0x5bc   : > { %v5243_v41 = vpop.f32.mrf.mxu0  ;;  %3027 = vmatpush.msrb.mxu1 %v5184_v47 }
 0x5bd   : > { %2430 = vmatmul.f32.gmra.mxu1 %v5243_v41 }
 0x5be   : > { %3028 = vmatpush.msrb.mxu1 %v5190_v6 }
 0x5c0   : > { %3029 = vmatpush.msrb.mxu1 %v5196_v26 }
 0x5c2   : > { %3030 = vmatpush.msrb.mxu1 %v5202_v3 }
 0x5c4   : > { %v5258_v2 = vpop.f32.mrf.mxu0 }
 0x5c5   : > { %2433 = vmatmul.f32.gmra.mxu1 %v5258_v2 }
 0x5dc   : > { %v5281_v32 = vpop.f32.mrf.mxu0 }
 0x5dd   : > { %2436 = vmatmul.f32.gmra.mxu1 %v5281_v32 }
 0x5e4   : > { %v5287_v31 = vpop.f32.mrf.mxu0 }
 0x5e5   : > { %2439 = vmatmul.f32.gmra.mxu1 %v5287_v31 }
 0x5ed   : > { %2819 = vmatmul.f32.vlgmr.msra.gmra.mxu1 %v5815_v30 }
 0x5f5   : > { %2822 = vmatmul.f32.gmra.mxu1 %v5816_v37 }
 0x5fd   : > { %2825 = vmatmul.f32.gmra.mxu1 %v5817_v34 }
 0x605   : > { %2828 = vmatmul.f32.gmra.mxu1 %v5818_v10 }
 0x60d   : > { %2831 = vmatmul.f32.gmra.mxu1 %v5819_v14 }
 0x615   : > { %2834 = vmatmul.f32.gmra.mxu1 %v5820_v42 }
 0x61a   : > { %v2425_v62 = vpop.f32.mrf.mxu1 }
 0x61b   : > { %v5374_v23 = vsub.f32 %v5207_v53, %v2425_v62  ;;  %v2667_v53 = vld [vmem:[%s5775_s6 + $0x50] sm:$0xff] }
 0x61c   : > { %2734 = vmatpush.msrb.mxu3 %v2667_v53 }
 0x61d   : > { %v2453_v48 = vmul.f32 %v5374_v23, %v5374_v23  ;;  %2837 = vmatmul.f32.gmra.mxu1 %v5821_v4 }
 0x61e   : > { %2735 = vmatpush.msrb.mxu3 %v2663_v24  ;;  %v2613_v24 = vadd.f32 1.0, %v5428_v15 }
 0x61f   : > { %2481 = vmatmul.f32.gmra.mxu2 %v2453_v48  ;;  %v5436_v48 = vperm.slane %v5433_v55, 3 }
 0x620   : > { %2736 = vmatpush.msrb.mxu3 %v2659_v44  ;;  %v5441_v44 = vperm.slane %v5433_v55, 4 }
 0x622   : > { %v2428_v59 = vpop.f32.mrf.mxu1  ;;  %v2476_v39 = vpop.f32.mrf.mxu2 }
 0x623   : > { %v5404_v5 = vsub.f32 %v5214_v61, %v2428_v59  ;;  %v2477_v49 = vadd.f32 1e-05, %v2476_v39  ;;  %v5824_v59 = vld [vmem:[#allocation11_spill] sm:$0xff] }
 0x624   : > { %v5444_v39 = vadd.f32 %v1163_v52, %v5824_v59  ;;  %v2658_v59 = vld [vmem:[%s5775_s6 + $0x8] sm:$0xff] }
 0x625   : > { %v2454_v19 = vmul.f32 %v5404_v5, %v5404_v5  ;;  %3533 = vrsqrt.f32 %v2477_v49  ;;  %2840 = vmatmul.f32.gmra.mxu1 %v5822_v21  ;;  %vm2506_vm3 = vweird.f32 %v2477_v49 }
 0x626   : > { %v2641_v1 = vperm.slane %v5444_v39, 0 }
 0x627   : > { %2484 = vmatmul.f32.gmra.mxu2 %v2454_v19  ;;  %v2698_v19 = vld [vmem:[%s5775_s6 + $0x148] sm:$0xff] }
 0x628   : > { %2849 = vmatpush.msrb.mxu2 %v2698_v19 }
 0x62a   : > { %v2479_v22 = vpop.f32.mrf.mxu2  ;;  %2850 = vmatpush.msrb.mxu2 %v2694_v20 }
 0x62b   : > { %v3534_v61 = vpop.eup %3533  ;;  %v2480_v12 = vadd.f32 1e-05, %v2479_v22  ;;  %v2621_v22 = vperm.slane %v2613_v24, 0 }
 0x62c   : > { %v2501_v33 = vmul.f32 %v3534_v61, %v2477_v49  ;;  %vm2507_vm2 = vweird.f32 %v3534_v61  ;;  %2851 = vmatpush.msrb.mxu2 %v2690_v16 }
 0x62d   : > { %3535 = vrsqrt.f32 %v2480_v12  ;;  %vm2508_vm4 = vmor %vm2506_vm3, %vm2507_vm2  ;;  %vm2516_vm6 = vweird.f32 %v2480_v12 }
 0x62e   : > { %v2502_v25 = vmul.f32 %v3534_v61, %v2501_v33 }
 0x630   : > { %v2503_v54 = vmul.f32 0.5, %v2502_v25 }
 0x632   : > { %v2504_v43 = vsub.f32 1.5, %v2503_v54 }
 0x633   : > { %v3536_v56 = vpop.eup %3535 }
 0x634   : > { %v2505_v0 = vmul.f32 %v3534_v61, %v2504_v43  ;;  %v2511_v62 = vmul.f32 %v3536_v56, %v2480_v12  ;;  %vm2517_vm5 = vweird.f32 %v3536_v56  ;;  %v2686_v12 = vld [vmem:[%s5775_s6 + $0xe8] sm:$0xff] }
 0x635   : > { %vm2518_vm7 = vmor %vm2516_vm6, %vm2517_vm5  ;;  %2852 = vmatpush.msrb.mxu2 %v2686_v12 }
 0x636   : > { %v2509_v53 = vsel %vm2508_vm4, %v3534_v61, %v2505_v0  ;;  %v2512_v13 = vmul.f32 %v3536_v56, %v2511_v62  ;;  %v2678_v62 = vld [vmem:[%s5775_s6 + $0xa8] sm:$0xff] }
 0x637   : > { %v2580_v50 = vmul.f32 %v2509_v53, %v5205_v40  ;;  %2853 = vmatpush.msrb.mxu2 %v2682_v27 }
 0x638   : > { %v2513_v8 = vmul.f32 0.5, %v2512_v13  ;;  %v2674_v13 = vld [vmem:[%s5775_s6 + $0x88] sm:$0xff] }
 0x639   : > { %v2589_v49 = vmul.f32 %v5436_v48, %v2580_v50  ;;  %2854 = vmatpush.msrb.mxu2 %v2678_v62  ;;  %v2666_v50 = vld [vmem:[%s5775_s6 + $0x48] sm:$0xff] }
 0x63a   : > { %v2514_v28 = vsub.f32 1.5, %v2513_v8  ;;  %v2431_v29 = vpop.f32.mrf.mxu1  ;;  %v2662_v8 = vld [vmem:[%s5775_s6 + $0x28] sm:$0xff] }
 0x63b   : > { %v2598_v40 = vadd.f32 %v5441_v44, %v2589_v49  ;;  %v5452_v61 = vsub.f32 %v5243_v41, %v2431_v29  ;;  %2855 = vmatpush.msrb.mxu2 %v2674_v13 }
 0x63c   : > { %v2515_v33 = vmul.f32 %v3536_v56, %v2514_v28 }
 0x63d   : > { %v2455_v25 = vmul.f32 %v5452_v61, %v5452_v61  ;;  %v2629_v45 = vmul.f32 %v2621_v22, %v2598_v40 }
 0x63e   : > { %v2519_v41 = vsel %vm2518_vm7, %v3536_v56, %v2515_v33 }
 0x63f   : > { %v2581_v57 = vmul.f32 %v2519_v41, %v5212_v36  ;;  %2487 = vmatmul.f32.gmra.mxu2 %v2455_v25  ;;  %v2649_v54 = vadd.f32 %v2641_v1, %v2629_v45  ;;  %v2638_v41 = vrot.slane %v5444_v39, 1 }
 0x641   : > { %2737 = vmatmul.f32.vlgmr.msrb.gmra.mxu3 %v2649_v54  ;;  %2778 = vmatmul.f32.vlgmr.msrb.gmra.mxu0 %v2649_v54  ;;  %v2590_v43 = vmul.f32 %v5436_v48, %v2581_v57 }
 0x642   : > { %v2434_v0 = vpop.f32.mrf.mxu1 }
 0x643   : > { %v5472_v56 = vsub.f32 %v5258_v2, %v2434_v0  ;;  %v2599_v36 = vadd.f32 %v5441_v44, %v2590_v43  ;;  %v2670_v2 = vld [vmem:[%s5775_s6 + $0x68] sm:$0xff]  ;;  %v2642_v0 = vperm.slane %v2638_v41, 0  ;;  %v2928_v41 = vld [vmem:[%s5776_s7 + $0xd8] sm:$0xff] }
 0x644   : > { %2856 = vmatpush.msrb.mxu2 %v2670_v2 }
 0x645   : > { %v2456_v52 = vmul.f32 %v5472_v56, %v5472_v56  ;;  %v2630_v53 = vmul.f32 %v2621_v22, %v2599_v36 }
 0x646   : > { %2857 = vmatpush.msrb.mxu2 %v2666_v50 }
 0x647   : > { %2490 = vmatmul.f32.gmra.mxu2 %v2456_v52  ;;  %v2650_v24 = vadd.f32 %v2641_v1, %v2630_v53 }
 0x648   : > { %2858 = vmatpush.msrb.mxu2 %v2662_v8 }
 0x649   : > { %2740 = vmatmul.f32.gmra.mxu3 %v2650_v24  ;;  %2781 = vmatmul.f32.gmra.mxu0 %v2650_v24 }
 0x64a   : > { %2859 = vmatpush.msrb.mxu2 %v2658_v59 }
 0x64c   : > { %3072 = vmatpush.msra.mxu2 %v5111_v7 }
 0x64e   : > { %3073 = vmatpush.msra.mxu2 %v5117_v11 }
 0x650   : > { %3074 = vmatpush.msra.mxu2 %v5123_v35 }
 0x652   : > { %3075 = vmatpush.msra.mxu2 %v5129_v51 }
 0x654   : > { %3076 = vmatpush.msra.mxu2 %v5136_v60 }
 0x656   : > { %3077 = vmatpush.msra.mxu2 %v5142_v63 }
 0x658   : > { %3078 = vmatpush.msra.mxu2 %v5148_v18 }
 0x65a   : > { %v2437_v49 = vpop.f32.mrf.mxu1  ;;  %3079 = vmatpush.msra.mxu2 %v5154_v9 }
 0x65b   : > { %v5502_v19 = vsub.f32 %v5281_v32, %v2437_v49  ;;  %v2607_v32 = vrot.slane %v5428_v15, 1 }
 0x65c   : > { %3080 = vmatpush.msra.mxu2 %v5160_v38 }
 0x65d   : > { %v2457_v28 = vmul.f32 %v5502_v19, %v5502_v19  ;;  %v2614_v25 = vadd.f32 1.0, %v2607_v32 }
 0x65e   : > { %3081 = vmatpush.msra.mxu2 %v5166_v46 }
 0x65f   : > { %2493 = vmatmul.f32.gmra.mxu2 %v2457_v28  ;;  %v2622_v12 = vperm.slane %v2614_v25, 0 }
 0x660   : > { %3082 = vmatpush.msra.mxu2 %v5172_v58 }
 0x662   : > { %v2440_v29 = vpop.f32.mrf.mxu1  ;;  %3083 = vmatpush.msra.mxu2 %v5178_v17 }
 0x663   : > { %v5511_v22 = vsub.f32 %v5287_v31, %v2440_v29 }
 0x664   : > { %3084 = vmatpush.msra.mxu2 %v5184_v47 }
 0x665   : > { %v2458_v63 = vmul.f32 %v5511_v22, %v5511_v22 }
 0x666   : > { %3085 = vmatpush.msra.mxu2 %v5190_v6 }
 0x667   : > { %2496 = vmatmul.f32.gmra.mxu2 %v2458_v63  ;;  %v2916_v63 = vld [vmem:[%s5776_s7 + $0x78] sm:$0xff] }
 0x668   : > { %3086 = vmatpush.msra.mxu2 %v5196_v26  ;;  %2933 = vmatpush.msra.mxu3 %v2916_v63 }
 0x66a   : > { %3087 = vmatpush.msra.mxu2 %v5202_v3 }
 0x66f   : > { %2860 = vmatmul.f32.vlgmr.msrb.gmra.mxu2 %v5815_v30 }
 0x677   : > { %2863 = vmatmul.f32.gmra.mxu2 %v5816_v37 }
 0x67f   : > { %2866 = vmatmul.f32.gmra.mxu2 %v5817_v34 }
 0x687   : > { %2869 = vmatmul.f32.gmra.mxu2 %v5818_v10 }
 0x68f   : > { %2872 = vmatmul.f32.gmra.mxu2 %v5819_v14 }
 0x697   : > { %2875 = vmatmul.f32.gmra.mxu2 %v5820_v42 }
 0x69f   : > { %2878 = vmatmul.f32.gmra.mxu2 %v5821_v4 }
 0x6a2   : > { %v2482_v18 = vpop.f32.mrf.mxu2 }
 0x6a3   : > { %v2483_v9 = vadd.f32 1e-05, %v2482_v18  ;;  %v2932_v18 = vld [vmem:[%s5776_s7 + $0xf8] sm:$0xff] }
 0x6a4   : > { %2974 = vmatpush.msra.mxu0 %v2932_v18  ;;  %v2906_v18 = vld [vmem:[%s5776_s7 + $0x28] sm:$0xff] }
 0x6a5   : > { %3537 = vrsqrt.f32 %v2483_v9  ;;  %vm2526_vm9 = vweird.f32 %v2483_v9 }
 0x6a7   : > { %2881 = vmatmul.f32.gmra.mxu2 %v5822_v21 }
 0x6aa   : > { %v2485_v38 = vpop.f32.mrf.mxu2 }
 0x6ab   : > { %v3538_v46 = vpop.eup %3537  ;;  %v2486_v58 = vadd.f32 1e-05, %v2485_v38 }
 0x6ac   : > { %v2521_v17 = vmul.f32 %v3538_v46, %v2483_v9  ;;  %vm2527_vm8 = vweird.f32 %v3538_v46 }
 0x6ad   : > { %3539 = vrsqrt.f32 %v2486_v58  ;;  %vm2528_vm10 = vmor %vm2526_vm9, %vm2527_vm8  ;;  %vm2536_vm12 = vweird.f32 %v2486_v58 }
 0x6ae   : > { %v2522_v47 = vmul.f32 %v3538_v46, %v2521_v17  ;;  %v2931_v17 = vld [vmem:[%s5776_s7 + $0xf0] sm:$0xff] }
 0x6af   : > { %2975 = vmatpush.msra.mxu0 %v2931_v17 }
 0x6b0   : > { %v2523_v6 = vmul.f32 0.5, %v2522_v47 }
 0x6b2   : > { %v2524_v26 = vsub.f32 1.5, %v2523_v6 }
 0x6b3   : > { %v3540_v3 = vpop.eup %3539 }
 0x6b4   : > { %v2525_v31 = vmul.f32 %v3538_v46, %v2524_v26  ;;  %v2531_v40 = vmul.f32 %v3540_v3, %v2486_v58  ;;  %vm2537_vm11 = vweird.f32 %v3540_v3  ;;  %v2915_v58 = vld [vmem:[%s5776_s7 + $0x70] sm:$0xff]  ;;  %v2914_v26 = vld [vmem:[%s5776_s7 + $0x68] sm:$0xff] }
 0x6b5   : > { %vm2538_vm13 = vmor %vm2536_vm12, %vm2537_vm11  ;;  %2934 = vmatpush.msra.mxu3 %v2915_v58  ;;  %v2921_v58 = vld [vmem:[%s5776_s7 + $0xa0] sm:$0xff] }
 0x6b6   : > { %v2529_v20 = vsel %vm2528_vm10, %v3538_v46, %v2525_v31  ;;  %v2532_v33 = vmul.f32 %v3540_v3, %v2531_v40  ;;  %v2608_v46 = vrot.slane %v5428_v15, 2 }
 0x6b7   : > { %v2582_v1 = vmul.f32 %v2529_v20, %v5374_v23  ;;  %2935 = vmatpush.msra.mxu3 %v2914_v26 }
 0x6b8   : > { %v2533_v45 = vmul.f32 0.5, %v2532_v33  ;;  %v2615_v20 = vadd.f32 1.0, %v2608_v46  ;;  %v2913_v33 = vld [vmem:[%s5776_s7 + $0x60] sm:$0xff] }
 0x6b9   : > { %v2591_v16 = vmul.f32 %v5436_v48, %v2582_v1  ;;  %v2929_v1 = vld [vmem:[%s5776_s7 + $0xe0] sm:$0xff]  ;;  %2936 = vmatpush.msra.mxu3 %v2913_v33  ;;  %v2918_v33 = vld [vmem:[%s5776_s7 + $0x88] sm:$0xff] }
 0x6ba   : > { %v2534_v57 = vsub.f32 1.5, %v2533_v45  ;;  %v2905_v46 = vld [vmem:[%s5776_s7 + $0x20] sm:$0xff] }
 0x6bb   : > { %v2600_v54 = vadd.f32 %v5441_v44, %v2591_v16  ;;  %v2639_v16 = vrot.slane %v5444_v39, 2 }
 0x6bc   : > { %v2535_v43 = vmul.f32 %v3540_v3, %v2534_v57 }
 0x6bd   : > { %v2631_v27 = vmul.f32 %v2622_v12, %v2600_v54 }
 0x6be   : > { %v2539_v36 = vsel %vm2538_vm13, %v3540_v3, %v2535_v43  ;;  %v2930_v3 = vld [vmem:[%s5776_s7 + $0xe8] sm:$0xff]  ;;  %v2911_v43 = vld [vmem:[%s5776_s7 + $0x50] sm:$0xff] }
 0x6bf   : > { %v2583_v62 = vmul.f32 %v2539_v36, %v5404_v5  ;;  %v2651_v23 = vadd.f32 %v2642_v0, %v2631_v27  ;;  %2976 = vmatpush.msra.mxu0 %v2930_v3  ;;  %v2927_v27 = vld [vmem:[%s5776_s7 + $0xd0] sm:$0xff] }
 0x6c0   : > { %v2903_v3 = vld [vmem:[%s5776_s7 + $0x10] sm:$0xff] }
 0x6c1   : > { %2743 = vmatmul.f32.gmra.mxu3 %v2651_v23  ;;  %2784 = vmatmul.f32.gmra.mxu0 %v2651_v23  ;;  %v2592_v52 = vmul.f32 %v5436_v48, %v2583_v62  ;;  %v2643_v62 = vperm.slane %v2639_v16, 0  ;;  %v2910_v23 = vld [vmem:[%s5776_s7 + $0x48] sm:$0xff] }
 0x6c2   : > { %v2488_v53 = vpop.f32.mrf.mxu2  ;;  %2977 = vmatpush.msra.mxu0 %v2929_v1 }
 0x6c3   : > { %v2489_v13 = vadd.f32 1e-05, %v2488_v53  ;;  %v2601_v24 = vadd.f32 %v5441_v44, %v2592_v52  ;;  %v2926_v52 = vld [vmem:[%s5776_s7 + $0xc8] sm:$0xff] }
 0x6c4   : > { %2978 = vmatpush.msra.mxu0 %v2928_v41 }
 0x6c5   : > { %3541 = vrsqrt.f32 %v2489_v13  ;;  %v2632_v2 = vmul.f32 %v2622_v12, %v2601_v24  ;;  %vm2546_vm15 = vweird.f32 %v2489_v13  ;;  %v2623_v12 = vperm.slane %v2615_v20, 0  ;;  %v2902_v20 = vld [vmem:[%s5776_s7 + $0x8] sm:$0xff] }
 0x6c6   : > { %2979 = vmatpush.msra.mxu0 %v2927_v27 }
 0x6c7   : > { %v2652_v50 = vadd.f32 %v2642_v0, %v2632_v2  ;;  %v2909_v2 = vld [vmem:[%s5776_s7 + $0x40] sm:$0xff] }
 0x6c8   : > { %2980 = vmatpush.msra.mxu0 %v2926_v52 }
 0x6c9   : > { %2746 = vmatmul.f32.gmra.mxu3 %v2652_v50  ;;  %2787 = vmatmul.f32.gmra.mxu0 %v2652_v50  ;;  %v2925_v50 = vld [vmem:[%s5776_s7 + $0xc0] sm:$0xff] }
 0x6ca   : > { %v2491_v8 = vpop.f32.mrf.mxu2  ;;  %2981 = vmatpush.msra.mxu0 %v2925_v50  ;;  %v3602_v50 = vld [vmem:[%s5774_s5 + $0xd0] sm:$0xff] }
 0x6cb   : > { %v3542_v59 = vpop.eup %3541  ;;  %v2492_v49 = vadd.f32 1e-05, %v2491_v8 }
 0x6cc   : > { %v2541_v28 = vmul.f32 %v3542_v59, %v2489_v13  ;;  %vm2547_vm14 = vweird.f32 %v3542_v59 }
 0x6cd   : > { %3543 = vrsqrt.f32 %v2492_v49  ;;  %vm2548_vm0 = vmor %vm2546_vm15, %vm2547_vm14  ;;  %vm2556_vm2 = vweird.f32 %v2492_v49 }
 0x6ce   : > { %v2542_v5 = vmul.f32 %v3542_v59, %v2541_v28  ;;  %v2907_v28 = vld [vmem:[%s5776_s7 + $0x30] sm:$0xff] }
 0x6d0   : > { %v2543_v29 = vmul.f32 0.5, %v2542_v5  ;;  %v2923_v5 = vld [vmem:[%s5776_s7 + $0xb0] sm:$0xff] }
 0x6d2   : > { %v2544_v9 = vsub.f32 1.5, %v2543_v29 }
 0x6d3   : > { %v3544_v38 = vpop.eup %3543 }
 0x6d4   : > { %v2545_v47 = vmul.f32 %v3542_v59, %v2544_v9  ;;  %v2551_v6 = vmul.f32 %v3544_v38, %v2492_v49  ;;  %vm2557_vm1 = vweird.f32 %v3544_v38  ;;  %v2922_v9 = vld [vmem:[%s5776_s7 + $0xa8] sm:$0xff] }
 0x6d5   : > { %vm2558_vm3 = vmor %vm2556_vm2, %vm2557_vm1 }
 0x6d6   : > { %v2549_v32 = vsel %vm2548_vm0, %v3542_v59, %v2545_v47  ;;  %v2552_v31 = vmul.f32 %v3544_v38, %v2551_v6  ;;  %v2908_v59 = vld [vmem:[%s5776_s7 + $0x38] sm:$0xff] }
 0x6d7   : > { %v2584_v40 = vmul.f32 %v2549_v32, %v5452_v61  ;;  %v2912_v61 = vld [vmem:[%s5776_s7 + $0x58] sm:$0xff]  ;;  %v2919_v32 = vld [vmem:[%s5776_s7 + $0x90] sm:$0xff] }
 0x6d8   : > { %v2553_v25 = vmul.f32 0.5, %v2552_v31  ;;  %2937 = vmatpush.msra.mxu3 %v2912_v61  ;;  %v2904_v47 = vld [vmem:[%s5776_s7 + $0x18] sm:$0xff] }
 0x6d9   : > { %v2593_v45 = vmul.f32 %v5436_v48, %v2584_v40  ;;  %v2920_v6 = vld [vmem:[%s5776_s7 + $0x98] sm:$0xff] }
 0x6da   : > { %v2554_v57 = vsub.f32 1.5, %v2553_v25  ;;  %2938 = vmatpush.msra.mxu3 %v2911_v43  ;;  %v2901_v25 = vld [vmem:[%s5776_s7] sm:$0xff] }
 0x6db   : > { %v2602_v54 = vadd.f32 %v5441_v44, %v2593_v45  ;;  %v2917_v45 = vld [vmem:[%s5776_s7 + $0x80] sm:$0xff] }
 0x6dc   : > { %v2555_v0 = vmul.f32 %v3544_v38, %v2554_v57  ;;  %2939 = vmatpush.msra.mxu3 %v2910_v23 }
 0x6dd   : > { %v2633_v36 = vmul.f32 %v2623_v12, %v2602_v54  ;;  %v2609_v54 = vrot.slane %v5428_v15, 3  ;;  %v2640_v15 = vrot.slane %v5444_v39, 3  ;;  %v3601_v39 = vld [vmem:[%s5774_s5 + $0xe8] sm:$0xff] }
 0x6de   : > { %v2559_v53 = vsel %vm2558_vm3, %v3544_v38, %v2555_v0  ;;  %2940 = vmatpush.msra.mxu3 %v2909_v2 }
 0x6df   : > { %v2585_v13 = vmul.f32 %v2559_v53, %v5472_v56  ;;  %v2653_v24 = vadd.f32 %v2643_v62, %v2633_v36  ;;  %v2924_v56 = vld [vmem:[%s5776_s7 + $0xb8] sm:$0xff] }
 0x6e0   : > { %2941 = vmatpush.msra.mxu3 %v2908_v59  ;;  %2982 = vmatpush.msra.mxu0 %v2924_v56  ;;  %v3603_v59 = vld [vmem:[%s5774_s5 + $0xb8] sm:$0xff] }
 0x6e1   : > { %2749 = vmatmul.f32.gmra.mxu3 %v2653_v24  ;;  %2790 = vmatmul.f32.gmra.mxu0 %v2653_v24  ;;  %v2594_v8 = vmul.f32 %v5436_v48, %v2585_v13  ;;  %v2644_v13 = vperm.slane %v2640_v15, 0 }
 0x6e2   : > { %v2494_v49 = vpop.f32.mrf.mxu2  ;;  %2942 = vmatpush.msra.mxu3 %v2907_v28  ;;  %2983 = vmatpush.msra.mxu0 %v2923_v5  ;;  %v2738_v28 = vpop.f32.mrf.mxu3 }
 0x6e3   : > { %v2495_v29 = vadd.f32 1e-05, %v2494_v49  ;;  %v2603_v63 = vadd.f32 %v5441_v44, %v2594_v8 }
 0x6e4   : > { %2943 = vmatpush.msra.mxu3 %v2906_v18  ;;  %2984 = vmatpush.msra.mxu0 %v2922_v9  ;;  %v2779_v18 = vpop.f32.mrf.mxu0  ;;  %v3607_v9 = vld [vmem:[%s5774_s5 + $0x58] sm:$0xff] }
 0x6e5   : > { %3545 = vrsqrt.f32 %v2495_v29  ;;  %v2634_v38 = vmul.f32 %v2623_v12, %v2603_v63  ;;  %vm2566_vm5 = vweird.f32 %v2495_v29  ;;  %v2820_v63 = vpop.f32.mrf.mxu1 }
 0x6e6   : > { %2944 = vmatpush.msra.mxu3 %v2905_v46  ;;  %2985 = vmatpush.msra.mxu0 %v2921_v58  ;;  %v3608_v58 = vld [vmem:[%s5774_s5 + $0x40] sm:$0xff] }
 0x6e7   : > { %v2654_v17 = vadd.f32 %v2643_v62, %v2634_v38  ;;  %v2616_v62 = vadd.f32 1.0, %v2609_v54  ;;  %v2821_v38 = vadd.f32 %v2820_v63, %v2738_v28 }
 0x6e8   : > { %2945 = vmatpush.msra.mxu3 %v2904_v47  ;;  %2986 = vmatpush.msra.mxu0 %v2920_v6 }
 0x6e9   : > { %2752 = vmatmul.f32.gmra.mxu3 %v2654_v17  ;;  %2793 = vmatmul.f32.gmra.mxu0 %v2654_v17  ;;  %v2624_v53 = vperm.slane %v2616_v62, 0  ;;  %v3609_v17 = vld [vmem:[%s5774_s5 + $0x28] sm:$0xff]  ;;  %v2885_v47 = vmax.f32 %v2821_v38, 0.0 }
 0x6ea   : > { %v2497_v26 = vpop.f32.mrf.mxu2  ;;  %2946 = vmatpush.msra.mxu3 %v2903_v3  ;;  %2987 = vmatpush.msra.mxu0 %v2919_v32  ;;  %v3610_v32 = vld [vmem:[%s5774_s5 + $0x10] sm:$0xff] }
 0x6eb   : > { %v3546_v31 = vpop.eup %3545  ;;  %v2498_v40 = vadd.f32 1e-05, %v2497_v26  ;;  %v2741_v26 = vpop.f32.mrf.mxu3 }
 0x6ec   : > { %v2561_v1 = vmul.f32 %v3546_v31, %v2495_v29  ;;  %2947 = vmatpush.msra.mxu3 %v2902_v20  ;;  %2988 = vmatpush.msra.mxu0 %v2918_v33  ;;  %vm2567_vm4 = vweird.f32 %v3546_v31  ;;  %v3605_v29 = vld [vmem:[%s5774_s5 + $0x88] sm:$0xff] }
 0x6ed   : > { %3547 = vrsqrt.f32 %v2498_v40  ;;  %vm2568_vm6 = vmor %vm2566_vm5, %vm2567_vm4  ;;  %vm2576_vm8 = vweird.f32 %v2498_v40 }
 0x6ee   : > { %v2562_v16 = vmul.f32 %v3546_v31, %v2561_v1  ;;  %2948 = vmatpush.msra.mxu3 %v2901_v25  ;;  %2989 = vmatpush.msra.mxu0 %v2917_v45 }
 0x6f0   : > { %v2563_v61 = vmul.f32 0.5, %v2562_v16  ;;  %3412 = vmatpush.msrb.mxu3 %v5111_v7 }
 0x6f2   : > { %v2564_v41 = vsub.f32 1.5, %v2563_v61  ;;  %3413 = vmatpush.msrb.mxu3 %v5117_v11  ;;  %v2861_v5 = vpop.f32.mrf.mxu2 }
 0x6f3   : > { %v3548_v57 = vpop.eup %3547  ;;  %v2862_v46 = vadd.f32 %v2861_v5, %v2779_v18 }
 0x6f4   : > { %v2565_v12 = vmul.f32 %v3546_v31, %v2564_v41  ;;  %v2571_v43 = vmul.f32 %v3548_v57, %v2498_v40  ;;  %3414 = vmatpush.msrb.mxu3 %v5123_v35  ;;  %vm2577_vm7 = vweird.f32 %v3548_v57  ;;  %v3600_v35 = vld [vmem:[%s5774_s5 + $0x100] sm:$0xff]  ;;  %v2782_v40 = vpop.f32.mrf.mxu0 }
 0x6f5   : > { %vm2578_vm9 = vmor %vm2576_vm8, %vm2577_vm7  ;;  %v2886_v6 = vmax.f32 %v2862_v46, 0.0 }
 0x6f6   : > { %v2569_v27 = vsel %vm2568_vm6, %v3546_v31, %v2565_v12  ;;  %v2572_v0 = vmul.f32 %v3548_v57, %v2571_v43  ;;  %3415 = vmatpush.msrb.mxu3 %v5129_v51  ;;  %v2823_v31 = vpop.f32.mrf.mxu1 }
 0x6f7   : > { %v2586_v36 = vmul.f32 %v2569_v27, %v5502_v19  ;;  %v2824_v20 = vadd.f32 %v2823_v31, %v2741_v26 }
 0x6f8   : > { %v2573_v7 = vmul.f32 0.5, %v2572_v0  ;;  %3416 = vmatpush.msrb.mxu3 %v5136_v60 }
 0x6f9   : > { %v2595_v23 = vmul.f32 %v5436_v48, %v2586_v36  ;;  %v2887_v1 = vmax.f32 %v2824_v20, 0.0 }
 0x6fa   : > { %v2574_v11 = vsub.f32 1.5, %v2573_v7  ;;  %3417 = vmatpush.msrb.mxu3 %v3600_v35  ;;  %v2864_v3 = vpop.f32.mrf.mxu2 }
 0x6fb   : > { %v2604_v52 = vadd.f32 %v5441_v44, %v2595_v23  ;;  %v2865_v33 = vadd.f32 %v2864_v3, %v2782_v40 }
 0x6fc   : > { %v2575_v19 = vmul.f32 %v3548_v57, %v2574_v11  ;;  %3418 = vmatpush.msrb.mxu3 %v3601_v39 }
 0x6fd   : > { %v2635_v51 = vmul.f32 %v2624_v53, %v2604_v52  ;;  %v2888_v25 = vmax.f32 %v2865_v33, 0.0 }
 0x6fe   : > { %v2579_v60 = vsel %vm2578_vm9, %v3548_v57, %v2575_v19  ;;  %3419 = vmatpush.msrb.mxu3 %v3602_v50  ;;  %v2826_v57 = vpop.f32.mrf.mxu1 }
 0x6ff   : > { %v2587_v24 = vmul.f32 %v2579_v60, %v5511_v22  ;;  %v2655_v2 = vadd.f32 %v2644_v13, %v2635_v51  ;;  %v3604_v22 = vld [vmem:[%s5774_s5 + $0xa0] sm:$0xff] }
 0x700   : > { %3420 = vmatpush.msrb.mxu3 %v3603_v59 }
 0x701   : > { %2755 = vmatmul.f32.gmra.mxu3 %v2655_v2  ;;  %2796 = vmatmul.f32.gmra.mxu0 %v2655_v2  ;;  %v2596_v8 = vmul.f32 %v5436_v48, %v2587_v24 }
 0x702   : > { %3421 = vmatpush.msrb.mxu3 %v3604_v22  ;;  %v2867_v45 = vpop.f32.mrf.mxu2 }
 0x703   : > { %v2605_v56 = vadd.f32 %v5441_v44, %v2596_v8  ;;  %v3606_v44 = vld [vmem:[%s5774_s5 + $0x70] sm:$0xff] }
 0x704   : > { %3422 = vmatpush.msrb.mxu3 %v3605_v29 }
 0x705   : > { %v2636_v49 = vmul.f32 %v2624_v53, %v2605_v56 }
 0x706   : > { %3423 = vmatpush.msrb.mxu3 %v3606_v44  ;;  %v2829_v7 = vpop.f32.mrf.mxu1 }
 0x707   : > { %v2656_v48 = vadd.f32 %v2644_v13, %v2636_v49 }
 0x708   : > { %3424 = vmatpush.msrb.mxu3 %v3607_v9 }
 0x709   : > { %2758 = vmatmul.f32.gmra.mxu3 %v2656_v48  ;;  %2799 = vmatmul.f32.gmra.mxu0 %v2656_v48 }
 0x70a   : > { %3425 = vmatpush.msrb.mxu3 %v3608_v58  ;;  %v2870_v43 = vpop.f32.mrf.mxu2 }
 0x70c   : > { %3426 = vmatpush.msrb.mxu3 %v3609_v17 }
 0x70e   : > { %3427 = vmatpush.msrb.mxu3 %v3610_v32  ;;  %v2832_v51 = vpop.f32.mrf.mxu1 }
 0x711   : > { %2949 = vmatmul.f32.vlgmr.msra.gmra.mxu3 %v2885_v47  ;;  %2990 = vmatmul.f32.vlgmr.msra.gmra.mxu0 %v2886_v6 }
 0x712   : > { %v2873_v52 = vpop.f32.mrf.mxu2 }
 0x716   : > { %v2835_v59 = vpop.f32.mrf.mxu1 }
 0x719   : > { %2952 = vmatmul.f32.gmra.mxu3 %v2887_v1  ;;  %2993 = vmatmul.f32.gmra.mxu0 %v2888_v25 }
 0x71a   : > { %v2876_v60 = vpop.f32.mrf.mxu2 }
 0x71e   : > { %v2838_v63 = vpop.f32.mrf.mxu1 }
 0x722   : > { %v2879_v28 = vpop.f32.mrf.mxu2 }
 0x726   : > { %v2841_v47 = vpop.f32.mrf.mxu1 }
 0x72a   : > { %v2882_v9 = vpop.f32.mrf.mxu2 }
 0x73e   : > { %v2785_v16 = vpop.f32.mrf.mxu0 }
 0x73f   : > { %v2868_v61 = vadd.f32 %v2867_v45, %v2785_v16 }
 0x741   : > { %v2890_v41 = vmax.f32 %v2868_v61, 0.0 }
 0x743   : > { %2996 = vmatmul.f32.gmra.mxu0 %v2890_v41 }
 0x744   : > { %v2744_v54 = vpop.f32.mrf.mxu3 }
 0x745   : > { %v2827_v12 = vadd.f32 %v2826_v57, %v2744_v54 }
 0x746   : > { %v2788_v27 = vpop.f32.mrf.mxu0 }
 0x747   : > { %v2889_v0 = vmax.f32 %v2827_v12, 0.0  ;;  %v2871_v36 = vadd.f32 %v2870_v43, %v2788_v27 }
 0x749   : > { %v2892_v62 = vmax.f32 %v2871_v36, 0.0  ;;  %2955 = vmatmul.f32.gmra.mxu3 %v2889_v0 }
 0x74b   : > { %2999 = vmatmul.f32.gmra.mxu0 %v2892_v62 }
 0x74c   : > { %v2747_v23 = vpop.f32.mrf.mxu3 }
 0x74d   : > { %v2830_v15 = vadd.f32 %v2829_v7, %v2747_v23 }
 0x74f   : > { %v2891_v11 = vmax.f32 %v2830_v15, 0.0 }
 0x751   : > { %2958 = vmatmul.f32.gmra.mxu3 %v2891_v11 }
 0x75e   : > { %v2791_v53 = vpop.f32.mrf.mxu0 }
 0x75f   : > { %v2874_v35 = vadd.f32 %v2873_v52, %v2791_v53 }
 0x761   : > { %v2894_v19 = vmax.f32 %v2874_v35, 0.0 }
 0x763   : > { %3002 = vmatmul.f32.gmra.mxu0 %v2894_v19 }
 0x764   : > { %v2750_v13 = vpop.f32.mrf.mxu3 }
 0x765   : > { %v2833_v39 = vadd.f32 %v2832_v51, %v2750_v13 }
 0x766   : > { %v2794_v24 = vpop.f32.mrf.mxu0 }
 0x767   : > { %v2893_v2 = vmax.f32 %v2833_v39, 0.0  ;;  %v2877_v50 = vadd.f32 %v2876_v60, %v2794_v24 }
 0x769   : > { %v2896_v8 = vmax.f32 %v2877_v50, 0.0  ;;  %2961 = vmatmul.f32.gmra.mxu3 %v2893_v2 }
 0x76b   : > { %3005 = vmatmul.f32.gmra.mxu0 %v2896_v8 }
 0x76c   : > { %v2753_v56 = vpop.f32.mrf.mxu3 }
 0x76d   : > { %v2836_v22 = vadd.f32 %v2835_v59, %v2753_v56 }
 0x76f   : > { %v2895_v49 = vmax.f32 %v2836_v22, 0.0 }
 0x771   : > { %2964 = vmatmul.f32.gmra.mxu3 %v2895_v49 }
 0x77e   : > { %v2797_v5 = vpop.f32.mrf.mxu0 }
 0x77f   : > { %v2880_v29 = vadd.f32 %v2879_v28, %v2797_v5 }
 0x781   : > { %v2898_v48 = vmax.f32 %v2880_v29, 0.0 }
 0x783   : > { %3008 = vmatmul.f32.gmra.mxu0 %v2898_v48 }
 0x784   : > { %v2756_v18 = vpop.f32.mrf.mxu3 }
 0x785   : > { %v2839_v44 = vadd.f32 %v2838_v63, %v2756_v18 }
 0x786   : > { %v2800_v38 = vpop.f32.mrf.mxu0 }
 0x787   : > { %v2897_v46 = vmax.f32 %v2839_v44, 0.0  ;;  %v2883_v58 = vadd.f32 %v2882_v9, %v2800_v38 }
 0x789   : > { %v2900_v17 = vmax.f32 %v2883_v58, 0.0  ;;  %2967 = vmatmul.f32.gmra.mxu3 %v2897_v46 }
 0x78b   : > { %3011 = vmatmul.f32.gmra.mxu0 %v2900_v17 }
 0x78c   : > { %v2759_v6 = vpop.f32.mrf.mxu3 }
 0x78d   : > { %v2842_v26 = vadd.f32 %v2841_v47, %v2759_v6 }
 0x78e   : > { %v2991_v32 = vpop.f32.mrf.mxu0 }
 0x78f   : > { %v2899_v3 = vmax.f32 %v2842_v26, 0.0 }
 0x791   : > { %2970 = vmatmul.f32.gmra.mxu3 %v2899_v3 }
 0x794   : > { %v2950_v31 = vpop.f32.mrf.mxu3 }
 0x795   : > { %v2992_v40 = vadd.f32 %v2991_v32, %v2950_v31 }
 0x796   : > { %v2994_v20 = vpop.f32.mrf.mxu0 }
 0x797   : > { %3031 = vmatmul.f32.vlgmr.msrb.gmra.mxu1 %v2992_v40 }
 0x79c   : > { %v2953_v33 = vpop.f32.mrf.mxu3 }
 0x79d   : > { %v2995_v1 = vadd.f32 %v2994_v20, %v2953_v33 }
 0x79f   : > { %3034 = vmatmul.f32.gmra.mxu1 %v2995_v1 }
 0x7c0   : > { %v2997_v25 = vpop.f32.mrf.mxu0 }
 0x7c8   : > { %v3000_v61 = vpop.f32.mrf.mxu0 }
 0x7cc   : > { %v2956_v45 = vpop.f32.mrf.mxu3 }
 0x7cd   : > { %v2998_v16 = vadd.f32 %v2997_v25, %v2956_v45 }
 0x7cf   : > { %3037 = vmatmul.f32.gmra.mxu1 %v2998_v16 }
 0x7d4   : > { %v2959_v41 = vpop.f32.mrf.mxu3 }
 0x7d5   : > { %v3001_v57 = vadd.f32 %v3000_v61, %v2959_v41  ;;  %v5720_v61 = vperm.slane %v5433_v55, 6 }
 0x7d7   : > { %3040 = vmatmul.f32.gmra.mxu1 %v3001_v57 }
 0x7e0   : > { %v3003_v54 = vpop.f32.mrf.mxu0 }
 0x7e8   : > { %v3006_v27 = vpop.f32.mrf.mxu0 }
 0x7ec   : > { %v2962_v12 = vpop.f32.mrf.mxu3 }
 0x7ed   : > { %v3004_v43 = vadd.f32 %v3003_v54, %v2962_v12 }
 0x7ef   : > { %3043 = vmatmul.f32.gmra.mxu1 %v3004_v43 }
 0x7f4   : > { %v2965_v0 = vpop.f32.mrf.mxu3 }
 0x7f5   : > { %v3007_v36 = vadd.f32 %v3006_v27, %v2965_v0 }
 0x7f7   : > { %3046 = vmatmul.f32.gmra.mxu1 %v3007_v36 }
 0x800   : > { %v3009_v62 = vpop.f32.mrf.mxu0 }
 0x808   : > { %v3012_v15 = vpop.f32.mrf.mxu0 }
 0x80c   : > { %v2968_v7 = vpop.f32.mrf.mxu3 }
 0x80d   : > { %v3010_v23 = vadd.f32 %v3009_v62, %v2968_v7 }
 0x80f   : > { %3049 = vmatmul.f32.gmra.mxu1 %v3010_v23 }
 0x814   : > { %v2971_v11 = vpop.f32.mrf.mxu3  ;;  %v3032_v52 = vpop.f32.mrf.mxu1 }
 0x815   : > { %v3013_v53 = vadd.f32 %v3012_v15, %v2971_v11  ;;  %v3056_v35 = vsub.f32 %v2992_v40, %v3032_v52 }
 0x817   : > { %v3064_v19 = vmul.f32 %v3056_v35, %v3056_v35  ;;  %3052 = vmatmul.f32.vlgmr.msrb.gmra.mxu3 %v3013_v53 }
 0x819   : > { %3088 = vmatmul.f32.vlgmr.msra.gmra.mxu2 %v3064_v19 }
 0x81c   : > { %v3035_v51 = vpop.f32.mrf.mxu1 }
 0x81d   : > { %v5687_v13 = vsub.f32 %v2995_v1, %v3035_v51  ;;  %v5717_v1 = vperm.slane %v5433_v55, 5 }
 0x81f   : > { %v3065_v39 = vmul.f32 %v5687_v13, %v5687_v13 }
 0x821   : > { %3091 = vmatmul.f32.gmra.mxu2 %v3065_v39 }
 0x84c   : > { %v3038_v60 = vpop.f32.mrf.mxu1 }
 0x84d   : > { %v5691_v24 = vsub.f32 %v2998_v16, %v3038_v60 }
 0x84f   : > { %v3066_v2 = vmul.f32 %v5691_v24, %v5691_v24 }
 0x851   : > { %3094 = vmatmul.f32.gmra.mxu2 %v3066_v2 }
 0x854   : > { %v3041_v50 = vpop.f32.mrf.mxu1 }
 0x855   : > { %v5695_v8 = vsub.f32 %v3001_v57, %v3041_v50 }
 0x857   : > { %v3067_v59 = vmul.f32 %v5695_v8, %v5695_v8 }
 0x859   : > { %3097 = vmatmul.f32.gmra.mxu2 %v3067_v59 }
 0x86c   : > { %v3044_v56 = vpop.f32.mrf.mxu1 }
 0x86d   : > { %v5699_v22 = vsub.f32 %v3004_v43, %v3044_v56 }
 0x86f   : > { %v3068_v49 = vmul.f32 %v5699_v22, %v5699_v22 }
 0x871   : > { %3100 = vmatmul.f32.gmra.mxu2 %v3068_v49 }
 0x874   : > { %v3047_v28 = vpop.f32.mrf.mxu1 }
 0x875   : > { %v5703_v5 = vsub.f32 %v3007_v36, %v3047_v28 }
 0x877   : > { %v3069_v29 = vmul.f32 %v5703_v5, %v5703_v5 }
 0x879   : > { %3103 = vmatmul.f32.gmra.mxu2 %v3069_v29 }
 0x88c   : > { %v3050_v48 = vpop.f32.mrf.mxu1 }
 0x88d   : > { %v5707_v63 = vsub.f32 %v3010_v23, %v3050_v48 }
 0x88f   : > { %v3070_v18 = vmul.f32 %v5707_v63, %v5707_v63 }
 0x891   : > { %3106 = vmatmul.f32.gmra.mxu2 %v3070_v18 }
 0x89a   : > { %v3053_v44 = vpop.f32.mrf.mxu3 }
 0x89b   : > { %v5711_v9 = vsub.f32 %v3013_v53, %v3053_v44 }
 0x89c   : > { %v3089_v38 = vpop.f32.mrf.mxu2 }
 0x89d   : > { %v3071_v46 = vmul.f32 %v5711_v9, %v5711_v9  ;;  %v3090_v58 = vadd.f32 1e-05, %v3089_v38 }
 0x89f   : > { %3549 = vrsqrt.f32 %v3090_v58  ;;  %3109 = vmatmul.f32.gmra.mxu2 %v3071_v46  ;;  %vm3119_vm11 = vweird.f32 %v3090_v58 }
 0x8a4   : > { %v3092_v17 = vpop.f32.mrf.mxu2 }
 0x8a5   : > { %v3550_v47 = vpop.eup %3549  ;;  %v3093_v6 = vadd.f32 1e-05, %v3092_v17 }
 0x8a6   : > { %v3114_v26 = vmul.f32 %v3550_v47, %v3090_v58  ;;  %vm3120_vm10 = vweird.f32 %v3550_v47 }
 0x8a7   : > { %3551 = vrsqrt.f32 %v3093_v6  ;;  %vm3121_vm12 = vmor %vm3119_vm11, %vm3120_vm10  ;;  %vm3129_vm14 = vweird.f32 %v3093_v6 }
 0x8a8   : > { %v3115_v3 = vmul.f32 %v3550_v47, %v3114_v26 }
 0x8aa   : > { %v3116_v32 = vmul.f32 0.5, %v3115_v3 }
 0x8ac   : > { %v3117_v31 = vsub.f32 1.5, %v3116_v32 }
 0x8ad   : > { %v3552_v40 = vpop.eup %3551 }
 0x8ae   : > { %v3118_v20 = vmul.f32 %v3550_v47, %v3117_v31  ;;  %v3124_v33 = vmul.f32 %v3552_v40, %v3093_v6  ;;  %vm3130_vm13 = vweird.f32 %v3552_v40 }
 0x8af   : > { %vm3131_vm15 = vmor %vm3129_vm14, %vm3130_vm13 }
 0x8b0   : > { %v3122_v25 = vsel %vm3121_vm12, %v3550_v47, %v3118_v20  ;;  %v3125_v45 = vmul.f32 %v3552_v40, %v3124_v33 }
 0x8b1   : > { %v3193_v16 = vmul.f32 %v3122_v25, %v3056_v35 }
 0x8b2   : > { %v3126_v41 = vmul.f32 0.5, %v3125_v45 }
 0x8b3   : > { %v3202_v57 = vmul.f32 %v5717_v1, %v3193_v16 }
 0x8b4   : > { %v3127_v54 = vsub.f32 1.5, %v3126_v41 }
 0x8b5   : > { %v3211_v12 = vadd.f32 %v5720_v61, %v3202_v57 }
 0x8b6   : > { %v3128_v43 = vmul.f32 %v3552_v40, %v3127_v54 }
 0x8b7   : > { %v3219_v55 = vadd.f32 %v3211_v12, %v5815_v30 }
 0x8b8   : > { %v3132_v27 = vsel %vm3131_vm15, %v3552_v40, %v3128_v43 }
 0x8b9   : > { %3227 = vst [vmem:[%s5727_s19] sm:$0xff] %v3219_v55  ;;  %v3194_v0 = vmul.f32 %v3132_v27, %v5687_v13 }
 0x8bb   : > { %v3203_v36 = vmul.f32 %v5717_v1, %v3194_v0 }
 0x8bd   : > { %v3212_v62 = vadd.f32 %v5720_v61, %v3203_v36 }
 0x8bf   : > { %v3220_v7 = vadd.f32 %v3212_v62, %v5816_v37 }
 0x8c1   : > { %3228 = vst [vmem:[%s5727_s19 + $0x8] sm:$0xff] %v3220_v7 }
 0x8d4   : > { %v3095_v23 = vpop.f32.mrf.mxu2 }
 0x8d5   : > { %v3096_v15 = vadd.f32 1e-05, %v3095_v23 }
 0x8d7   : > { %3553 = vrsqrt.f32 %v3096_v15  ;;  %vm3139_vm1 = vweird.f32 %v3096_v15 }
 0x8dc   : > { %v3098_v11 = vpop.f32.mrf.mxu2 }
 0x8dd   : > { %v3554_v52 = vpop.eup %3553  ;;  %v3099_v53 = vadd.f32 1e-05, %v3098_v11 }
 0x8de   : > { %v3134_v35 = vmul.f32 %v3554_v52, %v3096_v15  ;;  %vm3140_vm0 = vweird.f32 %v3554_v52 }
 0x8df   : > { %3555 = vrsqrt.f32 %v3099_v53  ;;  %vm3141_vm2 = vmor %vm3139_vm1, %vm3140_vm0  ;;  %vm3149_vm4 = vweird.f32 %v3099_v53 }
 0x8e0   : > { %v3135_v30 = vmul.f32 %v3554_v52, %v3134_v35 }
 0x8e2   : > { %v3136_v19 = vmul.f32 0.5, %v3135_v30 }
 0x8e4   : > { %v3137_v51 = vsub.f32 1.5, %v3136_v19 }
 0x8e5   : > { %v3556_v13 = vpop.eup %3555 }
 0x8e6   : > { %v3138_v39 = vmul.f32 %v3554_v52, %v3137_v51  ;;  %v3144_v60 = vmul.f32 %v3556_v13, %v3099_v53  ;;  %vm3150_vm3 = vweird.f32 %v3556_v13 }
 0x8e7   : > { %vm3151_vm5 = vmor %vm3149_vm4, %vm3150_vm3 }
 0x8e8   : > { %v3142_v37 = vsel %vm3141_vm2, %v3554_v52, %v3138_v39  ;;  %v3145_v2 = vmul.f32 %v3556_v13, %v3144_v60 }
 0x8e9   : > { %v3195_v50 = vmul.f32 %v3142_v37, %v5691_v24 }
 0x8ea   : > { %v3146_v59 = vmul.f32 0.5, %v3145_v2 }
 0x8eb   : > { %v3204_v56 = vmul.f32 %v5717_v1, %v3195_v50 }
 0x8ec   : > { %v3147_v49 = vsub.f32 1.5, %v3146_v59 }
 0x8ed   : > { %v3213_v28 = vadd.f32 %v5720_v61, %v3204_v56 }
 0x8ee   : > { %v3148_v29 = vmul.f32 %v3556_v13, %v3147_v49 }
 0x8ef   : > { %v3221_v48 = vadd.f32 %v3213_v28, %v5817_v34 }
 0x8f0   : > { %v3152_v18 = vsel %vm3151_vm5, %v3556_v13, %v3148_v29 }
 0x8f1   : > { %3229 = vst [vmem:[%s5727_s19 + $0x10] sm:$0xff] %v3221_v48  ;;  %v3196_v44 = vmul.f32 %v3152_v18, %v5695_v8 }
 0x8f3   : > { %v3205_v38 = vmul.f32 %v5717_v1, %v3196_v44 }
 0x8f4   : > { %v3101_v24 = vpop.f32.mrf.mxu2 }
 0x8f5   : > { %v3214_v46 = vadd.f32 %v5720_v61, %v3205_v38  ;;  %v3102_v58 = vadd.f32 1e-05, %v3101_v24 }
 0x8f7   : > { %v3222_v17 = vadd.f32 %v3214_v46, %v5818_v10  ;;  %3557 = vrsqrt.f32 %v3102_v58  ;;  %vm3159_vm7 = vweird.f32 %v3102_v58 }
 0x8f9   : > { %3230 = vst [vmem:[%s5727_s19 + $0x18] sm:$0xff] %v3222_v17 }
 0x8fc   : > { %v3104_v47 = vpop.f32.mrf.mxu2 }
 0x8fd   : > { %v3558_v6 = vpop.eup %3557  ;;  %v3105_v26 = vadd.f32 1e-05, %v3104_v47 }
 0x8fe   : > { %v3154_v3 = vmul.f32 %v3558_v6, %v3102_v58  ;;  %vm3160_vm6 = vweird.f32 %v3558_v6 }
 0x8ff   : > { %3559 = vrsqrt.f32 %v3105_v26  ;;  %vm3161_vm8 = vmor %vm3159_vm7, %vm3160_vm6  ;;  %vm3169_vm10 = vweird.f32 %v3105_v26 }
 0x900   : > { %v3155_v34 = vmul.f32 %v3558_v6, %v3154_v3 }
 0x902   : > { %v3156_v32 = vmul.f32 0.5, %v3155_v34 }
 0x904   : > { %v3157_v31 = vsub.f32 1.5, %v3156_v32 }
 0x905   : > { %v3560_v8 = vpop.eup %3559 }
 0x906   : > { %v3158_v40 = vmul.f32 %v3558_v6, %v3157_v31  ;;  %v3164_v20 = vmul.f32 %v3560_v8, %v3105_v26  ;;  %vm3170_vm9 = vweird.f32 %v3560_v8 }
 0x907   : > { %vm3171_vm11 = vmor %vm3169_vm10, %vm3170_vm9 }
 0x908   : > { %v3162_v33 = vsel %vm3161_vm8, %v3558_v6, %v3158_v40  ;;  %v3165_v25 = vmul.f32 %v3560_v8, %v3164_v20 }
 0x909   : > { %v3197_v10 = vmul.f32 %v3162_v33, %v5699_v22 }
 0x90a   : > { %v3166_v45 = vmul.f32 0.5, %v3165_v25 }
 0x90b   : > { %v3206_v16 = vmul.f32 %v5717_v1, %v3197_v10 }
 0x90c   : > { %v3167_v41 = vsub.f32 1.5, %v3166_v45 }
 0x90d   : > { %v3215_v57 = vadd.f32 %v5720_v61, %v3206_v16 }
 0x90e   : > { %v3168_v54 = vmul.f32 %v3560_v8, %v3167_v41 }
 0x90f   : > { %v3223_v12 = vadd.f32 %v3215_v57, %v5819_v14 }
 0x910   : > { %v3172_v43 = vsel %vm3171_vm11, %v3560_v8, %v3168_v54 }
 0x911   : > { %3231 = vst [vmem:[%s5727_s19 + $0x20] sm:$0xff] %v3223_v12  ;;  %v3198_v55 = vmul.f32 %v3172_v43, %v5703_v5 }
 0x913   : > { %v3207_v27 = vmul.f32 %v5717_v1, %v3198_v55 }
 0x914   : > { %v3107_v22 = vpop.f32.mrf.mxu2 }
 0x915   : > { %v3216_v0 = vadd.f32 %v5720_v61, %v3207_v27  ;;  %v3108_v36 = vadd.f32 1e-05, %v3107_v22 }
 0x917   : > { %v3224_v62 = vadd.f32 %v3216_v0, %v5820_v42  ;;  %3561 = vrsqrt.f32 %v3108_v36  ;;  %vm3179_vm13 = vweird.f32 %v3108_v36 }
 0x919   : > { %3232 = vst [vmem:[%s5727_s19 + $0x28] sm:$0xff] %v3224_v62 }
 0x91d   : > { %v3562_v7 = vpop.eup %3561 }
 0x91e   : > { %v3174_v23 = vmul.f32 %v3562_v7, %v3108_v36  ;;  %vm3180_vm12 = vweird.f32 %v3562_v7 }
 0x91f   : > { %vm3181_vm14 = vmor %vm3179_vm13, %vm3180_vm12 }
 0x920   : > { %v3175_v15 = vmul.f32 %v3562_v7, %v3174_v23 }
 0x922   : > { %v3176_v11 = vmul.f32 0.5, %v3175_v15  ;;  %v3110_v14 = vpop.f32.mrf.mxu2 }
 0x923   : > { %v3111_v52 = vadd.f32 1e-05, %v3110_v14 }
 0x924   : > { %v3177_v53 = vsub.f32 1.5, %v3176_v11 }
 0x925   : > { %3563 = vrsqrt.f32 %v3111_v52  ;;  %vm3189_vm0 = vweird.f32 %v3111_v52 }
 0x926   : > { %v3178_v5 = vmul.f32 %v3562_v7, %v3177_v53 }
 0x928   : > { %v3182_v35 = vsel %vm3181_vm14, %v3562_v7, %v3178_v5 }
 0x929   : > { %v3199_v30 = vmul.f32 %v3182_v35, %v5707_v63 }
 0x92b   : > { %v3564_v19 = vpop.eup %3563  ;;  %v3208_v42 = vmul.f32 %v5717_v1, %v3199_v30 }
 0x92c   : > { %v3184_v51 = vmul.f32 %v3564_v19, %v3111_v52  ;;  %vm3190_vm15 = vweird.f32 %v3564_v19 }
 0x92d   : > { %v3217_v13 = vadd.f32 %v5720_v61, %v3208_v42  ;;  %vm3191_vm1 = vmor %vm3189_vm0, %vm3190_vm15 }
 0x92e   : > { %v3185_v39 = vmul.f32 %v3564_v19, %v3184_v51 }
 0x92f   : > { %v3225_v60 = vadd.f32 %v3217_v13, %v5821_v4 }
 0x930   : > { %v3186_v37 = vmul.f32 0.5, %v3185_v39 }
 0x931   : > { %3233 = vst [vmem:[%s5727_s19 + $0x30] sm:$0xff] %v3225_v60 }
 0x932   : > { %v3187_v2 = vsub.f32 1.5, %v3186_v37 }
 0x934   : > { %v3188_v50 = vmul.f32 %v3564_v19, %v3187_v2 }
 0x936   : > { %v3192_v59 = vsel %vm3191_vm1, %v3564_v19, %v3188_v50 }
 0x937   : > { %v3200_v63 = vmul.f32 %v3192_v59, %v5711_v9 }
 0x939   : > { %v3209_v56 = vmul.f32 %v5717_v1, %v3200_v63 }
 0x93b   : > { %v3218_v49 = vadd.f32 %v5720_v61, %v3209_v56 }
 0x93d   : > { %v3226_v28 = vadd.f32 %v3218_v49, %v5822_v21 }
 0x93f   : > { %3234 = vst [vmem:[%s5727_s19 + $0x38] sm:$0xff] %v3226_v28 }
 0x940 PF: > { %s19_s30 = sadd.s32 1, %s3617_s30  }
 0x941   : > { %p16_p6 = scmp.ge.s32.totalorder %s19_s30, 4  }
 0x943   :  { %18 = sbr.rel (!%p16_p6) target bundleno = 1 (0x1), region = 92 }

</bundles_post_ra>
